<compile_context>
chip_gen: v7x
topology: tpu7x:2x2x1
jax: 0.10.0
libtpu: 0.0.40
codegen_flags: <defaults>
</compile_context>

<pallas_src>
import math

import jax
import jax.numpy as jnp
from jax import lax
from jax.experimental import pallas as pl
from jax.experimental.pallas import tpu as pltpu


# ----------------------------------------------------------------------------- #
# In-kernel helpers
# ----------------------------------------------------------------------------- #
def _cumsum_last(x):
    """Inclusive prefix-sum along the last (lane) axis via log2(L) shift+adds."""
    L = x.shape[-1]
    n = 1
    while n < L:
        shifted = jnp.concatenate(
            [jnp.zeros(x.shape[:-1] + (n,), x.dtype), x[..., :L - n]], axis=-1)
        x = x + shifted
        n *= 2
    return x


# ----------------------------------------------------------------------------- #
# Single fused kernel: conv1+BN+GLU, conv1x1, predictor (3 convs + BN + SiLU),
# dynamic pooling -> (C_out, M) output tile per batch element.
# ----------------------------------------------------------------------------- #
def _dpool_fused_kernel(xcol_ref, w1f_ref, s1_ref, w1x1_ref,
                        w0_ref, s0_ref, w1p_ref, s1p_ref, w2p_ref, b2_ref,
                        nm_ref, o_ref):
    L = xcol_ref.shape[2]
    C_out = o_ref.shape[1]
    M = o_ref.shape[2]

    xcol = xcol_ref[0]                                        # (C_in*K, L)

    # ---- conv1 (BN scale pre-folded into weights) + BN shift + GLU(dim=1).
    # Dropout(eval) = identity.
    y = jnp.dot(w1f_ref[...], xcol,
                preferred_element_type=jnp.float32) + s1_ref[...]
    features = y[:C_out, :] * jax.nn.sigmoid(y[C_out:, :])    # (C_out, L)

    # ---- conv1x1 -> predictor input [xx ; xx*xx]
    xx = jnp.dot(w1x1_ref[...], xcol,
                 preferred_element_type=jnp.float32)          # (1, L)
    row2 = lax.broadcasted_iota(jnp.int32, (2, L), 0)
    pin = jnp.where(row2 == 0,
                    jnp.broadcast_to(xx, (2, L)),
                    jnp.broadcast_to(xx * xx, (2, L)))        # (2, L)

    # ---- "same" 1D conv over an in-kernel value (per-tap MXU accumulation).
    # TODO(synk): taps slice an in-register value at lane offsets; these conv
    # inputs are fused intermediates, so wrapper-side im2col is not possible.
    def conv_same(inp, w_ref, pad):
        K = w_ref.shape[0]
        c_in = inp.shape[0]
        zpad = jnp.zeros((c_in, pad), jnp.float32)
        xp = jnp.concatenate([zpad, inp, zpad], axis=1)       # (c_in, L + 2*pad)
        acc = jnp.zeros((w_ref.shape[1], L), jnp.float32)
        for k in range(K):                                    # static, unrolled
            acc = acc + jnp.dot(w_ref[k], xp[:, k:k + L],
                                preferred_element_type=jnp.float32)
        return acc

    # predictor: conv31 -> BN+SiLU -> conv15 -> BN+SiLU -> conv15 (+bias)
    h = conv_same(pin, w0_ref, 15) + s0_ref[...]
    h = h * jax.nn.sigmoid(h)                                 # SiLU (BN folded)
    h = conv_same(h, w1p_ref, 7) + s1p_ref[...]
    h = h * jax.nn.sigmoid(h)
    jumps = conv_same(h, w2p_ref, 7) + b2_ref[...]            # (2, L)

    # ---- dynamic pooling (big_pool with func = line; eval renorm = norm_mean)
    w_row = jax.nn.sigmoid(jumps[0:1, :])                     # (1, L) pool weights
    m_row = jax.nn.sigmoid(jumps[1:2, :]) * nm_ref[...]       # (1, L) moves*renorm
    row_renorm = jnp.maximum(jnp.mean(m_row, axis=1, keepdims=True), 1.0)
    m_row = m_row / row_renorm
    poses = _cumsum_last(m_row)                               # (1, L)
    floors = jnp.floor(poses)
    frac = poses - floors
    w1v = 1.0 - frac                                          # line(poses - floors)
    w2v = frac                                                # line(ceils - poses)
    fli = floors.astype(jnp.int32)
    m_idx = lax.broadcasted_iota(jnp.int32, (M, L), 0)
    scat = (jnp.where(m_idx == fli, w1v, 0.0)
            + jnp.where(m_idx == fli + 1, w2v, 0.0)) * w_row  # (M, L)
    # out[c, m] = sum_l features[c, l] * scat[m, l]  ->  (C_out, M), M on lanes
    o_ref[0] = lax.dot_general(features, scat,
                               (((1,), (1,)), ((), ())),
                               preferred_element_type=jnp.float32)


# ----------------------------------------------------------------------------- #
# Parameter init (deterministic, mimics shapes/init in dpool.__init__)
# ----------------------------------------------------------------------------- #
def init_params(key, in_channels, out_channels, kernel_size, prediction_size):
    ks = jax.random.split(key, 12)
    P = prediction_size

    def uni(k, shape, fan_in):
        bound = 1.0 / math.sqrt(fan_in)
        return jax.random.uniform(k, shape, jnp.float32, -bound, bound)

    def bn(k, C):
        k1, k2, k3 = jax.random.split(k, 3)
        return dict(gamma=1.0 + 0.1 * jax.random.normal(k1, (C,), jnp.float32),
                    beta=0.1 * jax.random.normal(k2, (C,), jnp.float32),
                    mean=0.1 * jax.random.normal(k3, (C,), jnp.float32),
                    var=jnp.ones((C,), jnp.float32))

    params = {
        "conv1_w": uni(ks[0], (out_channels * 2, in_channels, kernel_size),
                       in_channels * kernel_size),
        "conv1x1_w": uni(ks[1], (1, in_channels, kernel_size),
                         in_channels * kernel_size),
        "p0_w": uni(ks[2], (P, 2, 31), 2 * 31),
        "p0_b": uni(ks[3], (P,), 2 * 31),
        "p1_w": uni(ks[4], (P, P, 15), P * 15),
        "p1_b": uni(ks[5], (P,), P * 15),
        # last predictor conv: weight *= 0.01, bias = [-ln2, -ln2] (as in __init__)
        "p2_w": uni(ks[6], (2, P, 15), P * 15) * 0.01,
        "p2_b": jnp.array([-math.log(2.0), -math.log(2.0)], jnp.float32),
        "bn1": bn(ks[7], out_channels * 2),
        "pbn0": bn(ks[8], P),
        "pbn1": bn(ks[9], P),
        "norm_mean": jnp.ones((1, 1), jnp.float32),   # registered buffer == 1.0
    }
    return params


# ----------------------------------------------------------------------------- #
# Full forward (eval mode): one pallas_call over a parallel batch grid.
# ----------------------------------------------------------------------------- #
def dpool_forward(params, x, padding):
    # TODO(synk): stride=1, dilation=1, groups=1 assumed (module defaults and the
    # convblock call site); general stride/dilation not implemented.
    B, C_in, L = x.shape
    w1 = params["conv1_w"]
    C_out2, _, K = w1.shape
    C_out = C_out2 // 2
    P = params["p0_w"].shape[0]
    K0 = params["p0_w"].shape[2]     # 31
    K1 = params["p1_w"].shape[2]     # 15
    K2 = params["p2_w"].shape[2]     # 15
    L_out = L + 2 * padding - K + 1
    CK = C_in * K
    # moves < 1 after renorm -> cumsum < L_out -> ceils.max()+1 <= L_out + 1.
    # TODO(synk): torch returns the data-dependent length int(ceils.max())+1;
    # here the output is zero-padded to the static upper bound L_out + 2.
    M = L_out + 2

    # ---- wrapper-side im2col of x (shared by conv1 and conv1x1) ----
    x_pad = jnp.pad(x, ((0, 0), (0, 0), (padding, padding)))
    xcol = jnp.stack([x_pad[:, :, k:k + L_out] for k in range(K)], axis=2)
    xcol = xcol.reshape(B, CK, L_out)                    # row index = ci*K + k

    # ---- fold BatchNorm (eval running stats) + conv biases into weights/shifts
    def bn_fold(bnp, eps):
        inv = bnp["gamma"] / jnp.sqrt(bnp["var"] + eps)
        return inv, bnp["beta"] - bnp["mean"] * inv

    inv1, sh1 = bn_fold(params["bn1"], 1e-3)             # batch_norm1 eps=0.001
    w1f = w1.reshape(C_out2, CK) * inv1[:, None]
    s1 = sh1.reshape(C_out2, 1)

    w1x1f = params["conv1x1_w"].reshape(1, CK)

    inv0, sh0 = bn_fold(params["pbn0"], 1e-5)
    w0e = jnp.transpose(params["p0_w"], (2, 0, 1)) * inv0[None, :, None]   # (K0,P,2)
    s0 = (params["p0_b"] * inv0 + sh0).reshape(P, 1)

    invp1, shp1 = bn_fold(params["pbn1"], 1e-5)
    w1pe = jnp.transpose(params["p1_w"], (2, 0, 1)) * invp1[None, :, None]  # (K1,P,P)
    s1p = (params["p1_b"] * invp1 + shp1).reshape(P, 1)

    w2pe = jnp.transpose(params["p2_w"], (2, 0, 1))                         # (K2,2,P)
    b2 = params["p2_b"].reshape(2, 1)

    nm = params["norm_mean"].reshape(1, 1)

    return pl.pallas_call(
        _dpool_fused_kernel,
        out_shape=jax.ShapeDtypeStruct((B, C_out, M), jnp.float32),
        grid=(B,),
        in_specs=[
            pl.BlockSpec((1, CK, L_out), lambda i: (i, 0, 0)),
            pl.BlockSpec((C_out2, CK), lambda i: (0, 0)),
            pl.BlockSpec((C_out2, 1), lambda i: (0, 0)),
            pl.BlockSpec((1, CK), lambda i: (0, 0)),
            pl.BlockSpec((K0, P, 2), lambda i: (0, 0, 0)),
            pl.BlockSpec((P, 1), lambda i: (0, 0)),
            pl.BlockSpec((K1, P, P), lambda i: (0, 0, 0)),
            pl.BlockSpec((P, 1), lambda i: (0, 0)),
            pl.BlockSpec((K2, 2, P), lambda i: (0, 0, 0)),
            pl.BlockSpec((2, 1), lambda i: (0, 0)),
            pl.BlockSpec((1, 1), lambda i: (0, 0)),
        ],
        out_specs=pl.BlockSpec((1, C_out, M), lambda i: (i, 0, 0)),
        compiler_params=pltpu.CompilerParams(
            dimension_semantics=("parallel",)),
    )(xcol, w1f, s1, w1x1f, w0e, s0, w1pe, s1p, w2pe, b2, nm)


if __name__ == "__main__":
    key = jax.random.PRNGKey(0)
    kp, kx = jax.random.split(key)

    B, C_in, C_out, K, L, P = 2, 4, 8, 3, 16, 32
    padding = 1  # keep length so features and predictor outputs align

    params = init_params(kp, C_in, C_out, K, P)
    x = jax.random.normal(kx, (B, C_in, L), jnp.float32)

    fwd = jax.jit(dpool_forward, static_argnames=("padding",))
    out = fwd(params, x, padding=padding)
    jax.block_until_ready(out)
    assert out.shape == (B, C_out, L + 2), out.shape
    print("KERNEL_OK")
</pallas_src>

<mosaic_0001>
module attributes {stable_mosaic.version = 11 : i64} {
  func.func @_dpool_fused_kernel(%arg0: i32, %arg1: memref<1x12x16xf32, #tpu.memory_space<vmem>>, %arg2: memref<16x12xf32, #tpu.memory_space<vmem>>, %arg3: memref<16x1xf32, #tpu.memory_space<vmem>>, %arg4: memref<1x12xf32, #tpu.memory_space<vmem>>, %arg5: memref<31x32x2xf32, #tpu.memory_space<vmem>>, %arg6: memref<32x1xf32, #tpu.memory_space<vmem>>, %arg7: memref<15x32x32xf32, #tpu.memory_space<vmem>>, %arg8: memref<32x1xf32, #tpu.memory_space<vmem>>, %arg9: memref<15x2x32xf32, #tpu.memory_space<vmem>>, %arg10: memref<2x1xf32, #tpu.memory_space<vmem>>, %arg11: memref<1x1xf32, #tpu.memory_space<vmem>>, %arg12: memref<1x8x18xf32, #tpu.memory_space<vmem>>) attributes {dimension_semantics = [#tpu.dimension_semantics<parallel>], iteration_bounds = array<i64: 2>, scalar_prefetch = 0 : i64, scratch_operands = 0 : i64, tpu.core_type = #tpu.core_type<tc>, window_params = [{transform_indices = @transform_0, window_bounds = array<i64: 1, 12, 16>}, {pipeline_mode = #tpu.pipeline_mode<synchronous>, transform_indices = @transform_1, window_bounds = array<i64: 16, 12>}, {pipeline_mode = #tpu.pipeline_mode<synchronous>, transform_indices = @transform_2, window_bounds = array<i64: 16, 1>}, {pipeline_mode = #tpu.pipeline_mode<synchronous>, transform_indices = @transform_3, window_bounds = array<i64: 1, 12>}, {pipeline_mode = #tpu.pipeline_mode<synchronous>, transform_indices = @transform_4, window_bounds = array<i64: 31, 32, 2>}, {pipeline_mode = #tpu.pipeline_mode<synchronous>, transform_indices = @transform_5, window_bounds = array<i64: 32, 1>}, {pipeline_mode = #tpu.pipeline_mode<synchronous>, transform_indices = @transform_6, window_bounds = array<i64: 15, 32, 32>}, {pipeline_mode = #tpu.pipeline_mode<synchronous>, transform_indices = @transform_7, window_bounds = array<i64: 32, 1>}, {pipeline_mode = #tpu.pipeline_mode<synchronous>, transform_indices = @transform_8, window_bounds = array<i64: 15, 2, 32>}, {pipeline_mode = #tpu.pipeline_mode<synchronous>, transform_indices = @transform_9, window_bounds = array<i64: 2, 1>}, {pipeline_mode = #tpu.pipeline_mode<synchronous>, transform_indices = @transform_10, window_bounds = array<i64: 1, 1>}, {transform_indices = @transform_11, window_bounds = array<i64: 1, 8, 18>}]} {
    %c0 = arith.constant 0 : index
    %c0_0 = arith.constant 0 : index
    %c0_1 = arith.constant 0 : index
    %0 = vector.load %arg1[%c0, %c0_0, %c0_1] : memref<1x12x16xf32, #tpu.memory_space<vmem>>, vector<1x12x16xf32>
    %1 = vector.shape_cast %0 : vector<1x12x16xf32> to vector<12x16xf32>
    %c0_2 = arith.constant 0 : index
    %c0_3 = arith.constant 0 : index
    %2 = vector.load %arg2[%c0_2, %c0_3] : memref<16x12xf32, #tpu.memory_space<vmem>>, vector<16x12xf32>
    %cst = arith.constant dense<0.000000e+00> : vector<16x16xf32>
    %3 = tpu.matmul %2, %1, %cst {dimension_numbers = #tpu.dot_dimension_numbers<[1], [0], [0], [1], [0, 0, 1, 1], [], []>} : vector<16x12xf32>, vector<12x16xf32>, vector<16x16xf32> -> vector<16x16xf32>
    %c0_4 = arith.constant 0 : index
    %c0_5 = arith.constant 0 : index
    %4 = vector.load %arg3[%c0_4, %c0_5] : memref<16x1xf32, #tpu.memory_space<vmem>>, vector<16x1xf32>
    %5 = vector.broadcast %4 : vector<16x1xf32> to vector<16x16xf32>
    %6 = arith.addf %3, %5 : vector<16x16xf32>
    %7 = vector.extract_strided_slice %6 {offsets = [0, 0], sizes = [8, 16], strides = [1, 1]} : vector<16x16xf32> to vector<8x16xf32>
    %8 = vector.extract_strided_slice %6 {offsets = [8, 0], sizes = [8, 16], strides = [1, 1]} : vector<16x16xf32> to vector<8x16xf32>
    %9 = arith.negf %8 : vector<8x16xf32>
    %10 = math.exp %9 : vector<8x16xf32>
    %cst_6 = arith.constant 1.000000e+00 : f32
    %11 = vector.broadcast %cst_6 : f32 to vector<8x16xf32>
    %12 = arith.addf %11, %10 : vector<8x16xf32>
    %13 = arith.divf %11, %12 : vector<8x16xf32>
    %14 = arith.mulf %7, %13 : vector<8x16xf32>
    %c0_7 = arith.constant 0 : index
    %c0_8 = arith.constant 0 : index
    %15 = vector.load %arg4[%c0_7, %c0_8] : memref<1x12xf32, #tpu.memory_space<vmem>>, vector<1x12xf32>
    %cst_9 = arith.constant dense<0.000000e+00> : vector<1x16xf32>
    %16 = tpu.matmul %15, %1, %cst_9 {dimension_numbers = #tpu.dot_dimension_numbers<[1], [0], [0], [1], [0, 0, 1, 1], [], []>} : vector<1x12xf32>, vector<12x16xf32>, vector<1x16xf32> -> vector<1x16xf32>
    %17 = tpu.iota {dimensions = array<i32: 0>} : vector<2x16xi32>
    %c0_i32 = arith.constant 0 : i32
    %18 = vector.broadcast %c0_i32 : i32 to vector<2x16xi32>
    %19 = arith.cmpi eq, %17, %18 : vector<2x16xi32>
    %20 = vector.shape_cast %16 : vector<1x16xf32> to vector<1x16xf32>
    %21 = vector.broadcast %20 : vector<1x16xf32> to vector<2x16xf32>
    %22 = arith.mulf %16, %16 : vector<1x16xf32>
    %23 = vector.shape_cast %22 : vector<1x16xf32> to vector<1x16xf32>
    %24 = vector.broadcast %23 : vector<1x16xf32> to vector<2x16xf32>
    %25 = arith.select %19, %21, %24 : vector<2x16xi1>, vector<2x16xf32>
    %cst_10 = arith.constant 0.000000e+00 : f32
    %26 = vector.broadcast %cst_10 : f32 to vector<2x15xf32>
    %27 = tpu.concatenate %26, %25, %26 in 1 : vector<2x15xf32>, vector<2x16xf32>, vector<2x15xf32> -> vector<2x46xf32>
    %cst_11 = arith.constant 0.000000e+00 : f32
    %28 = vector.broadcast %cst_11 : f32 to vector<32x16xf32>
    %c0_12 = arith.constant 0 : index
    %c0_13 = arith.constant 0 : index
    %c0_14 = arith.constant 0 : index
    %29 = vector.load %arg5[%c0_12, %c0_13, %c0_14] : memref<31x32x2xf32, #tpu.memory_space<vmem>>, vector<1x32x2xf32>
    %30 = vector.shape_cast %29 : vector<1x32x2xf32> to vector<32x2xf32>
    %31 = vector.extract_strided_slice %27 {offsets = [0, 0], sizes = [2, 16], strides = [1, 1]} : vector<2x46xf32> to vector<2x16xf32>
    %cst_15 = arith.constant dense<0.000000e+00> : vector<32x16xf32>
    %32 = tpu.matmul %30, %31, %cst_15 {dimension_numbers = #tpu.dot_dimension_numbers<[1], [0], [0], [1], [0, 0, 1, 1], [], []>} : vector<32x2xf32>, vector<2x16xf32>, vector<32x16xf32> -> vector<32x16xf32>
    %33 = arith.addf %28, %32 : vector<32x16xf32>
    %c1 = arith.constant 1 : index
    %c0_16 = arith.constant 0 : index
    %c0_17 = arith.constant 0 : index
    %34 = vector.load %arg5[%c1, %c0_16, %c0_17] : memref<31x32x2xf32, #tpu.memory_space<vmem>>, vector<1x32x2xf32>
    %35 = vector.shape_cast %34 : vector<1x32x2xf32> to vector<32x2xf32>
    %36 = vector.extract_strided_slice %27 {offsets = [0, 1], sizes = [2, 16], strides = [1, 1]} : vector<2x46xf32> to vector<2x16xf32>
    %cst_18 = arith.constant dense<0.000000e+00> : vector<32x16xf32>
    %37 = tpu.matmul %35, %36, %cst_18 {dimension_numbers = #tpu.dot_dimension_numbers<[1], [0], [0], [1], [0, 0, 1, 1], [], []>} : vector<32x2xf32>, vector<2x16xf32>, vector<32x16xf32> -> vector<32x16xf32>
    %38 = arith.addf %33, %37 : vector<32x16xf32>
    %c2 = arith.constant 2 : index
    %c0_19 = arith.constant 0 : index
    %c0_20 = arith.constant 0 : index
    %39 = vector.load %arg5[%c2, %c0_19, %c0_20] : memref<31x32x2xf32, #tpu.memory_space<vmem>>, vector<1x32x2xf32>
    %40 = vector.shape_cast %39 : vector<1x32x2xf32> to vector<32x2xf32>
    %41 = vector.extract_strided_slice %27 {offsets = [0, 2], sizes = [2, 16], strides = [1, 1]} : vector<2x46xf32> to vector<2x16xf32>
    %cst_21 = arith.constant dense<0.000000e+00> : vector<32x16xf32>
    %42 = tpu.matmul %40, %41, %cst_21 {dimension_numbers = #tpu.dot_dimension_numbers<[1], [0], [0], [1], [0, 0, 1, 1], [], []>} : vector<32x2xf32>, vector<2x16xf32>, vector<32x16xf32> -> vector<32x16xf32>
    %43 = arith.addf %38, %42 : vector<32x16xf32>
    %c3 = arith.constant 3 : index
    %c0_22 = arith.constant 0 : index
    %c0_23 = arith.constant 0 : index
    %44 = vector.load %arg5[%c3, %c0_22, %c0_23] : memref<31x32x2xf32, #tpu.memory_space<vmem>>, vector<1x32x2xf32>
    %45 = vector.shape_cast %44 : vector<1x32x2xf32> to vector<32x2xf32>
    %46 = vector.extract_strided_slice %27 {offsets = [0, 3], sizes = [2, 16], strides = [1, 1]} : vector<2x46xf32> to vector<2x16xf32>
    %cst_24 = arith.constant dense<0.000000e+00> : vector<32x16xf32>
    %47 = tpu.matmul %45, %46, %cst_24 {dimension_numbers = #tpu.dot_dimension_numbers<[1], [0], [0], [1], [0, 0, 1, 1], [], []>} : vector<32x2xf32>, vector<2x16xf32>, vector<32x16xf32> -> vector<32x16xf32>
    %48 = arith.addf %43, %47 : vector<32x16xf32>
    %c4 = arith.constant 4 : index
    %c0_25 = arith.constant 0 : index
    %c0_26 = arith.constant 0 : index
    %49 = vector.load %arg5[%c4, %c0_25, %c0_26] : memref<31x32x2xf32, #tpu.memory_space<vmem>>, vector<1x32x2xf32>
    %50 = vector.shape_cast %49 : vector<1x32x2xf32> to vector<32x2xf32>
    %51 = vector.extract_strided_slice %27 {offsets = [0, 4], sizes = [2, 16], strides = [1, 1]} : vector<2x46xf32> to vector<2x16xf32>
    %cst_27 = arith.constant dense<0.000000e+00> : vector<32x16xf32>
    %52 = tpu.matmul %50, %51, %cst_27 {dimension_numbers = #tpu.dot_dimension_numbers<[1], [0], [0], [1], [0, 0, 1, 1], [], []>} : vector<32x2xf32>, vector<2x16xf32>, vector<32x16xf32> -> vector<32x16xf32>
    %53 = arith.addf %48, %52 : vector<32x16xf32>
    %c5 = arith.constant 5 : index
    %c0_28 = arith.constant 0 : index
    %c0_29 = arith.constant 0 : index
    %54 = vector.load %arg5[%c5, %c0_28, %c0_29] : memref<31x32x2xf32, #tpu.memory_space<vmem>>, vector<1x32x2xf32>
    %55 = vector.shape_cast %54 : vector<1x32x2xf32> to vector<32x2xf32>
    %56 = vector.extract_strided_slice %27 {offsets = [0, 5], sizes = [2, 16], strides = [1, 1]} : vector<2x46xf32> to vector<2x16xf32>
    %cst_30 = arith.constant dense<0.000000e+00> : vector<32x16xf32>
    %57 = tpu.matmul %55, %56, %cst_30 {dimension_numbers = #tpu.dot_dimension_numbers<[1], [0], [0], [1], [0, 0, 1, 1], [], []>} : vector<32x2xf32>, vector<2x16xf32>, vector<32x16xf32> -> vector<32x16xf32>
    %58 = arith.addf %53, %57 : vector<32x16xf32>
    %c6 = arith.constant 6 : index
    %c0_31 = arith.constant 0 : index
    %c0_32 = arith.constant 0 : index
    %59 = vector.load %arg5[%c6, %c0_31, %c0_32] : memref<31x32x2xf32, #tpu.memory_space<vmem>>, vector<1x32x2xf32>
    %60 = vector.shape_cast %59 : vector<1x32x2xf32> to vector<32x2xf32>
    %61 = vector.extract_strided_slice %27 {offsets = [0, 6], sizes = [2, 16], strides = [1, 1]} : vector<2x46xf32> to vector<2x16xf32>
    %cst_33 = arith.constant dense<0.000000e+00> : vector<32x16xf32>
    %62 = tpu.matmul %60, %61, %cst_33 {dimension_numbers = #tpu.dot_dimension_numbers<[1], [0], [0], [1], [0, 0, 1, 1], [], []>} : vector<32x2xf32>, vector<2x16xf32>, vector<32x16xf32> -> vector<32x16xf32>
    %63 = arith.addf %58, %62 : vector<32x16xf32>
    %c7 = arith.constant 7 : index
    %c0_34 = arith.constant 0 : index
    %c0_35 = arith.constant 0 : index
    %64 = vector.load %arg5[%c7, %c0_34, %c0_35] : memref<31x32x2xf32, #tpu.memory_space<vmem>>, vector<1x32x2xf32>
    %65 = vector.shape_cast %64 : vector<1x32x2xf32> to vector<32x2xf32>
    %66 = vector.extract_strided_slice %27 {offsets = [0, 7], sizes = [2, 16], strides = [1, 1]} : vector<2x46xf32> to vector<2x16xf32>
    %cst_36 = arith.constant dense<0.000000e+00> : vector<32x16xf32>
    %67 = tpu.matmul %65, %66, %cst_36 {dimension_numbers = #tpu.dot_dimension_numbers<[1], [0], [0], [1], [0, 0, 1, 1], [], []>} : vector<32x2xf32>, vector<2x16xf32>, vector<32x16xf32> -> vector<32x16xf32>
    %68 = arith.addf %63, %67 : vector<32x16xf32>
    %c8 = arith.constant 8 : index
    %c0_37 = arith.constant 0 : index
    %c0_38 = arith.constant 0 : index
    %69 = vector.load %arg5[%c8, %c0_37, %c0_38] : memref<31x32x2xf32, #tpu.memory_space<vmem>>, vector<1x32x2xf32>
    %70 = vector.shape_cast %69 : vector<1x32x2xf32> to vector<32x2xf32>
    %71 = vector.extract_strided_slice %27 {offsets = [0, 8], sizes = [2, 16], strides = [1, 1]} : vector<2x46xf32> to vector<2x16xf32>
    %cst_39 = arith.constant dense<0.000000e+00> : vector<32x16xf32>
    %72 = tpu.matmul %70, %71, %cst_39 {dimension_numbers = #tpu.dot_dimension_numbers<[1], [0], [0], [1], [0, 0, 1, 1], [], []>} : vector<32x2xf32>, vector<2x16xf32>, vector<32x16xf32> -> vector<32x16xf32>
    %73 = arith.addf %68, %72 : vector<32x16xf32>
    %c9 = arith.constant 9 : index
    %c0_40 = arith.constant 0 : index
    %c0_41 = arith.constant 0 : index
    %74 = vector.load %arg5[%c9, %c0_40, %c0_41] : memref<31x32x2xf32, #tpu.memory_space<vmem>>, vector<1x32x2xf32>
    %75 = vector.shape_cast %74 : vector<1x32x2xf32> to vector<32x2xf32>
    %76 = vector.extract_strided_slice %27 {offsets = [0, 9], sizes = [2, 16], strides = [1, 1]} : vector<2x46xf32> to vector<2x16xf32>
    %cst_42 = arith.constant dense<0.000000e+00> : vector<32x16xf32>
    %77 = tpu.matmul %75, %76, %cst_42 {dimension_numbers = #tpu.dot_dimension_numbers<[1], [0], [0], [1], [0, 0, 1, 1], [], []>} : vector<32x2xf32>, vector<2x16xf32>, vector<32x16xf32> -> vector<32x16xf32>
    %78 = arith.addf %73, %77 : vector<32x16xf32>
    %c10 = arith.constant 10 : index
    %c0_43 = arith.constant 0 : index
    %c0_44 = arith.constant 0 : index
    %79 = vector.load %arg5[%c10, %c0_43, %c0_44] : memref<31x32x2xf32, #tpu.memory_space<vmem>>, vector<1x32x2xf32>
    %80 = vector.shape_cast %79 : vector<1x32x2xf32> to vector<32x2xf32>
    %81 = vector.extract_strided_slice %27 {offsets = [0, 10], sizes = [2, 16], strides = [1, 1]} : vector<2x46xf32> to vector<2x16xf32>
    %cst_45 = arith.constant dense<0.000000e+00> : vector<32x16xf32>
    %82 = tpu.matmul %80, %81, %cst_45 {dimension_numbers = #tpu.dot_dimension_numbers<[1], [0], [0], [1], [0, 0, 1, 1], [], []>} : vector<32x2xf32>, vector<2x16xf32>, vector<32x16xf32> -> vector<32x16xf32>
    %83 = arith.addf %78, %82 : vector<32x16xf32>
    %c11 = arith.constant 11 : index
    %c0_46 = arith.constant 0 : index
    %c0_47 = arith.constant 0 : index
    %84 = vector.load %arg5[%c11, %c0_46, %c0_47] : memref<31x32x2xf32, #tpu.memory_space<vmem>>, vector<1x32x2xf32>
    %85 = vector.shape_cast %84 : vector<1x32x2xf32> to vector<32x2xf32>
    %86 = vector.extract_strided_slice %27 {offsets = [0, 11], sizes = [2, 16], strides = [1, 1]} : vector<2x46xf32> to vector<2x16xf32>
    %cst_48 = arith.constant dense<0.000000e+00> : vector<32x16xf32>
    %87 = tpu.matmul %85, %86, %cst_48 {dimension_numbers = #tpu.dot_dimension_numbers<[1], [0], [0], [1], [0, 0, 1, 1], [], []>} : vector<32x2xf32>, vector<2x16xf32>, vector<32x16xf32> -> vector<32x16xf32>
    %88 = arith.addf %83, %87 : vector<32x16xf32>
    %c12 = arith.constant 12 : index
    %c0_49 = arith.constant 0 : index
    %c0_50 = arith.constant 0 : index
    %89 = vector.load %arg5[%c12, %c0_49, %c0_50] : memref<31x32x2xf32, #tpu.memory_space<vmem>>, vector<1x32x2xf32>
    %90 = vector.shape_cast %89 : vector<1x32x2xf32> to vector<32x2xf32>
    %91 = vector.extract_strided_slice %27 {offsets = [0, 12], sizes = [2, 16], strides = [1, 1]} : vector<2x46xf32> to vector<2x16xf32>
    %cst_51 = arith.constant dense<0.000000e+00> : vector<32x16xf32>
    %92 = tpu.matmul %90, %91, %cst_51 {dimension_numbers = #tpu.dot_dimension_numbers<[1], [0], [0], [1], [0, 0, 1, 1], [], []>} : vector<32x2xf32>, vector<2x16xf32>, vector<32x16xf32> -> vector<32x16xf32>
    %93 = arith.addf %88, %92 : vector<32x16xf32>
    %c13 = arith.constant 13 : index
    %c0_52 = arith.constant 0 : index
    %c0_53 = arith.constant 0 : index
    %94 = vector.load %arg5[%c13, %c0_52, %c0_53] : memref<31x32x2xf32, #tpu.memory_space<vmem>>, vector<1x32x2xf32>
    %95 = vector.shape_cast %94 : vector<1x32x2xf32> to vector<32x2xf32>
    %96 = vector.extract_strided_slice %27 {offsets = [0, 13], sizes = [2, 16], strides = [1, 1]} : vector<2x46xf32> to vector<2x16xf32>
    %cst_54 = arith.constant dense<0.000000e+00> : vector<32x16xf32>
    %97 = tpu.matmul %95, %96, %cst_54 {dimension_numbers = #tpu.dot_dimension_numbers<[1], [0], [0], [1], [0, 0, 1, 1], [], []>} : vector<32x2xf32>, vector<2x16xf32>, vector<32x16xf32> -> vector<32x16xf32>
    %98 = arith.addf %93, %97 : vector<32x16xf32>
    %c14 = arith.constant 14 : index
    %c0_55 = arith.constant 0 : index
    %c0_56 = arith.constant 0 : index
    %99 = vector.load %arg5[%c14, %c0_55, %c0_56] : memref<31x32x2xf32, #tpu.memory_space<vmem>>, vector<1x32x2xf32>
    %100 = vector.shape_cast %99 : vector<1x32x2xf32> to vector<32x2xf32>
    %101 = vector.extract_strided_slice %27 {offsets = [0, 14], sizes = [2, 16], strides = [1, 1]} : vector<2x46xf32> to vector<2x16xf32>
    %cst_57 = arith.constant dense<0.000000e+00> : vector<32x16xf32>
    %102 = tpu.matmul %100, %101, %cst_57 {dimension_numbers = #tpu.dot_dimension_numbers<[1], [0], [0], [1], [0, 0, 1, 1], [], []>} : vector<32x2xf32>, vector<2x16xf32>, vector<32x16xf32> -> vector<32x16xf32>
    %103 = arith.addf %98, %102 : vector<32x16xf32>
    %c15 = arith.constant 15 : index
    %c0_58 = arith.constant 0 : index
    %c0_59 = arith.constant 0 : index
    %104 = vector.load %arg5[%c15, %c0_58, %c0_59] : memref<31x32x2xf32, #tpu.memory_space<vmem>>, vector<1x32x2xf32>
    %105 = vector.shape_cast %104 : vector<1x32x2xf32> to vector<32x2xf32>
    %106 = vector.extract_strided_slice %27 {offsets = [0, 15], sizes = [2, 16], strides = [1, 1]} : vector<2x46xf32> to vector<2x16xf32>
    %cst_60 = arith.constant dense<0.000000e+00> : vector<32x16xf32>
    %107 = tpu.matmul %105, %106, %cst_60 {dimension_numbers = #tpu.dot_dimension_numbers<[1], [0], [0], [1], [0, 0, 1, 1], [], []>} : vector<32x2xf32>, vector<2x16xf32>, vector<32x16xf32> -> vector<32x16xf32>
    %108 = arith.addf %103, %107 : vector<32x16xf32>
    %c16 = arith.constant 16 : index
    %c0_61 = arith.constant 0 : index
    %c0_62 = arith.constant 0 : index
    %109 = vector.load %arg5[%c16, %c0_61, %c0_62] : memref<31x32x2xf32, #tpu.memory_space<vmem>>, vector<1x32x2xf32>
    %110 = vector.shape_cast %109 : vector<1x32x2xf32> to vector<32x2xf32>
    %111 = vector.extract_strided_slice %27 {offsets = [0, 16], sizes = [2, 16], strides = [1, 1]} : vector<2x46xf32> to vector<2x16xf32>
    %cst_63 = arith.constant dense<0.000000e+00> : vector<32x16xf32>
    %112 = tpu.matmul %110, %111, %cst_63 {dimension_numbers = #tpu.dot_dimension_numbers<[1], [0], [0], [1], [0, 0, 1, 1], [], []>} : vector<32x2xf32>, vector<2x16xf32>, vector<32x16xf32> -> vector<32x16xf32>
    %113 = arith.addf %108, %112 : vector<32x16xf32>
    %c17 = arith.constant 17 : index
    %c0_64 = arith.constant 0 : index
    %c0_65 = arith.constant 0 : index
    %114 = vector.load %arg5[%c17, %c0_64, %c0_65] : memref<31x32x2xf32, #tpu.memory_space<vmem>>, vector<1x32x2xf32>
    %115 = vector.shape_cast %114 : vector<1x32x2xf32> to vector<32x2xf32>
    %116 = vector.extract_strided_slice %27 {offsets = [0, 17], sizes = [2, 16], strides = [1, 1]} : vector<2x46xf32> to vector<2x16xf32>
    %cst_66 = arith.constant dense<0.000000e+00> : vector<32x16xf32>
    %117 = tpu.matmul %115, %116, %cst_66 {dimension_numbers = #tpu.dot_dimension_numbers<[1], [0], [0], [1], [0, 0, 1, 1], [], []>} : vector<32x2xf32>, vector<2x16xf32>, vector<32x16xf32> -> vector<32x16xf32>
    %118 = arith.addf %113, %117 : vector<32x16xf32>
    %c18 = arith.constant 18 : index
    %c0_67 = arith.constant 0 : index
    %c0_68 = arith.constant 0 : index
    %119 = vector.load %arg5[%c18, %c0_67, %c0_68] : memref<31x32x2xf32, #tpu.memory_space<vmem>>, vector<1x32x2xf32>
    %120 = vector.shape_cast %119 : vector<1x32x2xf32> to vector<32x2xf32>
    %121 = vector.extract_strided_slice %27 {offsets = [0, 18], sizes = [2, 16], strides = [1, 1]} : vector<2x46xf32> to vector<2x16xf32>
    %cst_69 = arith.constant dense<0.000000e+00> : vector<32x16xf32>
    %122 = tpu.matmul %120, %121, %cst_69 {dimension_numbers = #tpu.dot_dimension_numbers<[1], [0], [0], [1], [0, 0, 1, 1], [], []>} : vector<32x2xf32>, vector<2x16xf32>, vector<32x16xf32> -> vector<32x16xf32>
    %123 = arith.addf %118, %122 : vector<32x16xf32>
    %c19 = arith.constant 19 : index
    %c0_70 = arith.constant 0 : index
    %c0_71 = arith.constant 0 : index
    %124 = vector.load %arg5[%c19, %c0_70, %c0_71] : memref<31x32x2xf32, #tpu.memory_space<vmem>>, vector<1x32x2xf32>
    %125 = vector.shape_cast %124 : vector<1x32x2xf32> to vector<32x2xf32>
    %126 = vector.extract_strided_slice %27 {offsets = [0, 19], sizes = [2, 16], strides = [1, 1]} : vector<2x46xf32> to vector<2x16xf32>
    %cst_72 = arith.constant dense<0.000000e+00> : vector<32x16xf32>
    %127 = tpu.matmul %125, %126, %cst_72 {dimension_numbers = #tpu.dot_dimension_numbers<[1], [0], [0], [1], [0, 0, 1, 1], [], []>} : vector<32x2xf32>, vector<2x16xf32>, vector<32x16xf32> -> vector<32x16xf32>
    %128 = arith.addf %123, %127 : vector<32x16xf32>
    %c20 = arith.constant 20 : index
    %c0_73 = arith.constant 0 : index
    %c0_74 = arith.constant 0 : index
    %129 = vector.load %arg5[%c20, %c0_73, %c0_74] : memref<31x32x2xf32, #tpu.memory_space<vmem>>, vector<1x32x2xf32>
    %130 = vector.shape_cast %129 : vector<1x32x2xf32> to vector<32x2xf32>
    %131 = vector.extract_strided_slice %27 {offsets = [0, 20], sizes = [2, 16], strides = [1, 1]} : vector<2x46xf32> to vector<2x16xf32>
    %cst_75 = arith.constant dense<0.000000e+00> : vector<32x16xf32>
    %132 = tpu.matmul %130, %131, %cst_75 {dimension_numbers = #tpu.dot_dimension_numbers<[1], [0], [0], [1], [0, 0, 1, 1], [], []>} : vector<32x2xf32>, vector<2x16xf32>, vector<32x16xf32> -> vector<32x16xf32>
    %133 = arith.addf %128, %132 : vector<32x16xf32>
    %c21 = arith.constant 21 : index
    %c0_76 = arith.constant 0 : index
    %c0_77 = arith.constant 0 : index
    %134 = vector.load %arg5[%c21, %c0_76, %c0_77] : memref<31x32x2xf32, #tpu.memory_space<vmem>>, vector<1x32x2xf32>
    %135 = vector.shape_cast %134 : vector<1x32x2xf32> to vector<32x2xf32>
    %136 = vector.extract_strided_slice %27 {offsets = [0, 21], sizes = [2, 16], strides = [1, 1]} : vector<2x46xf32> to vector<2x16xf32>
    %cst_78 = arith.constant dense<0.000000e+00> : vector<32x16xf32>
    %137 = tpu.matmul %135, %136, %cst_78 {dimension_numbers = #tpu.dot_dimension_numbers<[1], [0], [0], [1], [0, 0, 1, 1], [], []>} : vector<32x2xf32>, vector<2x16xf32>, vector<32x16xf32> -> vector<32x16xf32>
    %138 = arith.addf %133, %137 : vector<32x16xf32>
    %c22 = arith.constant 22 : index
    %c0_79 = arith.constant 0 : index
    %c0_80 = arith.constant 0 : index
    %139 = vector.load %arg5[%c22, %c0_79, %c0_80] : memref<31x32x2xf32, #tpu.memory_space<vmem>>, vector<1x32x2xf32>
    %140 = vector.shape_cast %139 : vector<1x32x2xf32> to vector<32x2xf32>
    %141 = vector.extract_strided_slice %27 {offsets = [0, 22], sizes = [2, 16], strides = [1, 1]} : vector<2x46xf32> to vector<2x16xf32>
    %cst_81 = arith.constant dense<0.000000e+00> : vector<32x16xf32>
    %142 = tpu.matmul %140, %141, %cst_81 {dimension_numbers = #tpu.dot_dimension_numbers<[1], [0], [0], [1], [0, 0, 1, 1], [], []>} : vector<32x2xf32>, vector<2x16xf32>, vector<32x16xf32> -> vector<32x16xf32>
    %143 = arith.addf %138, %142 : vector<32x16xf32>
    %c23 = arith.constant 23 : index
    %c0_82 = arith.constant 0 : index
    %c0_83 = arith.constant 0 : index
    %144 = vector.load %arg5[%c23, %c0_82, %c0_83] : memref<31x32x2xf32, #tpu.memory_space<vmem>>, vector<1x32x2xf32>
    %145 = vector.shape_cast %144 : vector<1x32x2xf32> to vector<32x2xf32>
    %146 = vector.extract_strided_slice %27 {offsets = [0, 23], sizes = [2, 16], strides = [1, 1]} : vector<2x46xf32> to vector<2x16xf32>
    %cst_84 = arith.constant dense<0.000000e+00> : vector<32x16xf32>
    %147 = tpu.matmul %145, %146, %cst_84 {dimension_numbers = #tpu.dot_dimension_numbers<[1], [0], [0], [1], [0, 0, 1, 1], [], []>} : vector<32x2xf32>, vector<2x16xf32>, vector<32x16xf32> -> vector<32x16xf32>
    %148 = arith.addf %143, %147 : vector<32x16xf32>
    %c24 = arith.constant 24 : index
    %c0_85 = arith.constant 0 : index
    %c0_86 = arith.constant 0 : index
    %149 = vector.load %arg5[%c24, %c0_85, %c0_86] : memref<31x32x2xf32, #tpu.memory_space<vmem>>, vector<1x32x2xf32>
    %150 = vector.shape_cast %149 : vector<1x32x2xf32> to vector<32x2xf32>
    %151 = vector.extract_strided_slice %27 {offsets = [0, 24], sizes = [2, 16], strides = [1, 1]} : vector<2x46xf32> to vector<2x16xf32>
    %cst_87 = arith.constant dense<0.000000e+00> : vector<32x16xf32>
    %152 = tpu.matmul %150, %151, %cst_87 {dimension_numbers = #tpu.dot_dimension_numbers<[1], [0], [0], [1], [0, 0, 1, 1], [], []>} : vector<32x2xf32>, vector<2x16xf32>, vector<32x16xf32> -> vector<32x16xf32>
    %153 = arith.addf %148, %152 : vector<32x16xf32>
    %c25 = arith.constant 25 : index
    %c0_88 = arith.constant 0 : index
    %c0_89 = arith.constant 0 : index
    %154 = vector.load %arg5[%c25, %c0_88, %c0_89] : memref<31x32x2xf32, #tpu.memory_space<vmem>>, vector<1x32x2xf32>
    %155 = vector.shape_cast %154 : vector<1x32x2xf32> to vector<32x2xf32>
    %156 = vector.extract_strided_slice %27 {offsets = [0, 25], sizes = [2, 16], strides = [1, 1]} : vector<2x46xf32> to vector<2x16xf32>
    %cst_90 = arith.constant dense<0.000000e+00> : vector<32x16xf32>
    %157 = tpu.matmul %155, %156, %cst_90 {dimension_numbers = #tpu.dot_dimension_numbers<[1], [0], [0], [1], [0, 0, 1, 1], [], []>} : vector<32x2xf32>, vector<2x16xf32>, vector<32x16xf32> -> vector<32x16xf32>
    %158 = arith.addf %153, %157 : vector<32x16xf32>
    %c26 = arith.constant 26 : index
    %c0_91 = arith.constant 0 : index
    %c0_92 = arith.constant 0 : index
    %159 = vector.load %arg5[%c26, %c0_91, %c0_92] : memref<31x32x2xf32, #tpu.memory_space<vmem>>, vector<1x32x2xf32>
    %160 = vector.shape_cast %159 : vector<1x32x2xf32> to vector<32x2xf32>
    %161 = vector.extract_strided_slice %27 {offsets = [0, 26], sizes = [2, 16], strides = [1, 1]} : vector<2x46xf32> to vector<2x16xf32>
    %cst_93 = arith.constant dense<0.000000e+00> : vector<32x16xf32>
    %162 = tpu.matmul %160, %161, %cst_93 {dimension_numbers = #tpu.dot_dimension_numbers<[1], [0], [0], [1], [0, 0, 1, 1], [], []>} : vector<32x2xf32>, vector<2x16xf32>, vector<32x16xf32> -> vector<32x16xf32>
    %163 = arith.addf %158, %162 : vector<32x16xf32>
    %c27 = arith.constant 27 : index
    %c0_94 = arith.constant 0 : index
    %c0_95 = arith.constant 0 : index
    %164 = vector.load %arg5[%c27, %c0_94, %c0_95] : memref<31x32x2xf32, #tpu.memory_space<vmem>>, vector<1x32x2xf32>
    %165 = vector.shape_cast %164 : vector<1x32x2xf32> to vector<32x2xf32>
    %166 = vector.extract_strided_slice %27 {offsets = [0, 27], sizes = [2, 16], strides = [1, 1]} : vector<2x46xf32> to vector<2x16xf32>
    %cst_96 = arith.constant dense<0.000000e+00> : vector<32x16xf32>
    %167 = tpu.matmul %165, %166, %cst_96 {dimension_numbers = #tpu.dot_dimension_numbers<[1], [0], [0], [1], [0, 0, 1, 1], [], []>} : vector<32x2xf32>, vector<2x16xf32>, vector<32x16xf32> -> vector<32x16xf32>
    %168 = arith.addf %163, %167 : vector<32x16xf32>
    %c28 = arith.constant 28 : index
    %c0_97 = arith.constant 0 : index
    %c0_98 = arith.constant 0 : index
    %169 = vector.load %arg5[%c28, %c0_97, %c0_98] : memref<31x32x2xf32, #tpu.memory_space<vmem>>, vector<1x32x2xf32>
    %170 = vector.shape_cast %169 : vector<1x32x2xf32> to vector<32x2xf32>
    %171 = vector.extract_strided_slice %27 {offsets = [0, 28], sizes = [2, 16], strides = [1, 1]} : vector<2x46xf32> to vector<2x16xf32>
    %cst_99 = arith.constant dense<0.000000e+00> : vector<32x16xf32>
    %172 = tpu.matmul %170, %171, %cst_99 {dimension_numbers = #tpu.dot_dimension_numbers<[1], [0], [0], [1], [0, 0, 1, 1], [], []>} : vector<32x2xf32>, vector<2x16xf32>, vector<32x16xf32> -> vector<32x16xf32>
    %173 = arith.addf %168, %172 : vector<32x16xf32>
    %c29 = arith.constant 29 : index
    %c0_100 = arith.constant 0 : index
    %c0_101 = arith.constant 0 : index
    %174 = vector.load %arg5[%c29, %c0_100, %c0_101] : memref<31x32x2xf32, #tpu.memory_space<vmem>>, vector<1x32x2xf32>
    %175 = vector.shape_cast %174 : vector<1x32x2xf32> to vector<32x2xf32>
    %176 = vector.extract_strided_slice %27 {offsets = [0, 29], sizes = [2, 16], strides = [1, 1]} : vector<2x46xf32> to vector<2x16xf32>
    %cst_102 = arith.constant dense<0.000000e+00> : vector<32x16xf32>
    %177 = tpu.matmul %175, %176, %cst_102 {dimension_numbers = #tpu.dot_dimension_numbers<[1], [0], [0], [1], [0, 0, 1, 1], [], []>} : vector<32x2xf32>, vector<2x16xf32>, vector<32x16xf32> -> vector<32x16xf32>
    %178 = arith.addf %173, %177 : vector<32x16xf32>
    %c30 = arith.constant 30 : index
    %c0_103 = arith.constant 0 : index
    %c0_104 = arith.constant 0 : index
    %179 = vector.load %arg5[%c30, %c0_103, %c0_104] : memref<31x32x2xf32, #tpu.memory_space<vmem>>, vector<1x32x2xf32>
    %180 = vector.shape_cast %179 : vector<1x32x2xf32> to vector<32x2xf32>
    %181 = vector.extract_strided_slice %27 {offsets = [0, 30], sizes = [2, 16], strides = [1, 1]} : vector<2x46xf32> to vector<2x16xf32>
    %cst_105 = arith.constant dense<0.000000e+00> : vector<32x16xf32>
    %182 = tpu.matmul %180, %181, %cst_105 {dimension_numbers = #tpu.dot_dimension_numbers<[1], [0], [0], [1], [0, 0, 1, 1], [], []>} : vector<32x2xf32>, vector<2x16xf32>, vector<32x16xf32> -> vector<32x16xf32>
    %183 = arith.addf %178, %182 : vector<32x16xf32>
    %c0_106 = arith.constant 0 : index
    %c0_107 = arith.constant 0 : index
    %184 = vector.load %arg6[%c0_106, %c0_107] : memref<32x1xf32, #tpu.memory_space<vmem>>, vector<32x1xf32>
    %185 = vector.broadcast %184 : vector<32x1xf32> to vector<32x16xf32>
    %186 = arith.addf %183, %185 : vector<32x16xf32>
    %187 = arith.negf %186 : vector<32x16xf32>
    %188 = math.exp %187 : vector<32x16xf32>
    %cst_108 = arith.constant 1.000000e+00 : f32
    %189 = vector.broadcast %cst_108 : f32 to vector<32x16xf32>
    %190 = arith.addf %189, %188 : vector<32x16xf32>
    %191 = arith.divf %189, %190 : vector<32x16xf32>
    %192 = arith.mulf %186, %191 : vector<32x16xf32>
    %cst_109 = arith.constant 0.000000e+00 : f32
    %193 = vector.broadcast %cst_109 : f32 to vector<32x7xf32>
    %194 = tpu.concatenate %193, %192, %193 in 1 : vector<32x7xf32>, vector<32x16xf32>, vector<32x7xf32> -> vector<32x30xf32>
    %cst_110 = arith.constant 0.000000e+00 : f32
    %195 = vector.broadcast %cst_110 : f32 to vector<32x16xf32>
    %c0_111 = arith.constant 0 : index
    %c0_112 = arith.constant 0 : index
    %c0_113 = arith.constant 0 : index
    %196 = vector.load %arg7[%c0_111, %c0_112, %c0_113] : memref<15x32x32xf32, #tpu.memory_space<vmem>>, vector<1x32x32xf32>
    %197 = vector.shape_cast %196 : vector<1x32x32xf32> to vector<32x32xf32>
    %198 = vector.extract_strided_slice %194 {offsets = [0, 0], sizes = [32, 16], strides = [1, 1]} : vector<32x30xf32> to vector<32x16xf32>
    %cst_114 = arith.constant dense<0.000000e+00> : vector<32x16xf32>
    %199 = tpu.matmul %197, %198, %cst_114 {dimension_numbers = #tpu.dot_dimension_numbers<[1], [0], [0], [1], [0, 0, 1, 1], [], []>} : vector<32x32xf32>, vector<32x16xf32>, vector<32x16xf32> -> vector<32x16xf32>
    %200 = arith.addf %195, %199 : vector<32x16xf32>
    %c1_115 = arith.constant 1 : index
    %c0_116 = arith.constant 0 : index
    %c0_117 = arith.constant 0 : index
    %201 = vector.load %arg7[%c1_115, %c0_116, %c0_117] : memref<15x32x32xf32, #tpu.memory_space<vmem>>, vector<1x32x32xf32>
    %202 = vector.shape_cast %201 : vector<1x32x32xf32> to vector<32x32xf32>
    %203 = vector.extract_strided_slice %194 {offsets = [0, 1], sizes = [32, 16], strides = [1, 1]} : vector<32x30xf32> to vector<32x16xf32>
    %cst_118 = arith.constant dense<0.000000e+00> : vector<32x16xf32>
    %204 = tpu.matmul %202, %203, %cst_118 {dimension_numbers = #tpu.dot_dimension_numbers<[1], [0], [0], [1], [0, 0, 1, 1], [], []>} : vector<32x32xf32>, vector<32x16xf32>, vector<32x16xf32> -> vector<32x16xf32>
    %205 = arith.addf %200, %204 : vector<32x16xf32>
    %c2_119 = arith.constant 2 : index
    %c0_120 = arith.constant 0 : index
    %c0_121 = arith.constant 0 : index
    %206 = vector.load %arg7[%c2_119, %c0_120, %c0_121] : memref<15x32x32xf32, #tpu.memory_space<vmem>>, vector<1x32x32xf32>
    %207 = vector.shape_cast %206 : vector<1x32x32xf32> to vector<32x32xf32>
    %208 = vector.extract_strided_slice %194 {offsets = [0, 2], sizes = [32, 16], strides = [1, 1]} : vector<32x30xf32> to vector<32x16xf32>
    %cst_122 = arith.constant dense<0.000000e+00> : vector<32x16xf32>
    %209 = tpu.matmul %207, %208, %cst_122 {dimension_numbers = #tpu.dot_dimension_numbers<[1], [0], [0], [1], [0, 0, 1, 1], [], []>} : vector<32x32xf32>, vector<32x16xf32>, vector<32x16xf32> -> vector<32x16xf32>
    %210 = arith.addf %205, %209 : vector<32x16xf32>
    %c3_123 = arith.constant 3 : index
    %c0_124 = arith.constant 0 : index
    %c0_125 = arith.constant 0 : index
    %211 = vector.load %arg7[%c3_123, %c0_124, %c0_125] : memref<15x32x32xf32, #tpu.memory_space<vmem>>, vector<1x32x32xf32>
    %212 = vector.shape_cast %211 : vector<1x32x32xf32> to vector<32x32xf32>
    %213 = vector.extract_strided_slice %194 {offsets = [0, 3], sizes = [32, 16], strides = [1, 1]} : vector<32x30xf32> to vector<32x16xf32>
    %cst_126 = arith.constant dense<0.000000e+00> : vector<32x16xf32>
    %214 = tpu.matmul %212, %213, %cst_126 {dimension_numbers = #tpu.dot_dimension_numbers<[1], [0], [0], [1], [0, 0, 1, 1], [], []>} : vector<32x32xf32>, vector<32x16xf32>, vector<32x16xf32> -> vector<32x16xf32>
    %215 = arith.addf %210, %214 : vector<32x16xf32>
    %c4_127 = arith.constant 4 : index
    %c0_128 = arith.constant 0 : index
    %c0_129 = arith.constant 0 : index
    %216 = vector.load %arg7[%c4_127, %c0_128, %c0_129] : memref<15x32x32xf32, #tpu.memory_space<vmem>>, vector<1x32x32xf32>
    %217 = vector.shape_cast %216 : vector<1x32x32xf32> to vector<32x32xf32>
    %218 = vector.extract_strided_slice %194 {offsets = [0, 4], sizes = [32, 16], strides = [1, 1]} : vector<32x30xf32> to vector<32x16xf32>
    %cst_130 = arith.constant dense<0.000000e+00> : vector<32x16xf32>
    %219 = tpu.matmul %217, %218, %cst_130 {dimension_numbers = #tpu.dot_dimension_numbers<[1], [0], [0], [1], [0, 0, 1, 1], [], []>} : vector<32x32xf32>, vector<32x16xf32>, vector<32x16xf32> -> vector<32x16xf32>
    %220 = arith.addf %215, %219 : vector<32x16xf32>
    %c5_131 = arith.constant 5 : index
    %c0_132 = arith.constant 0 : index
    %c0_133 = arith.constant 0 : index
    %221 = vector.load %arg7[%c5_131, %c0_132, %c0_133] : memref<15x32x32xf32, #tpu.memory_space<vmem>>, vector<1x32x32xf32>
    %222 = vector.shape_cast %221 : vector<1x32x32xf32> to vector<32x32xf32>
    %223 = vector.extract_strided_slice %194 {offsets = [0, 5], sizes = [32, 16], strides = [1, 1]} : vector<32x30xf32> to vector<32x16xf32>
    %cst_134 = arith.constant dense<0.000000e+00> : vector<32x16xf32>
    %224 = tpu.matmul %222, %223, %cst_134 {dimension_numbers = #tpu.dot_dimension_numbers<[1], [0], [0], [1], [0, 0, 1, 1], [], []>} : vector<32x32xf32>, vector<32x16xf32>, vector<32x16xf32> -> vector<32x16xf32>
    %225 = arith.addf %220, %224 : vector<32x16xf32>
    %c6_135 = arith.constant 6 : index
    %c0_136 = arith.constant 0 : index
    %c0_137 = arith.constant 0 : index
    %226 = vector.load %arg7[%c6_135, %c0_136, %c0_137] : memref<15x32x32xf32, #tpu.memory_space<vmem>>, vector<1x32x32xf32>
    %227 = vector.shape_cast %226 : vector<1x32x32xf32> to vector<32x32xf32>
    %228 = vector.extract_strided_slice %194 {offsets = [0, 6], sizes = [32, 16], strides = [1, 1]} : vector<32x30xf32> to vector<32x16xf32>
    %cst_138 = arith.constant dense<0.000000e+00> : vector<32x16xf32>
    %229 = tpu.matmul %227, %228, %cst_138 {dimension_numbers = #tpu.dot_dimension_numbers<[1], [0], [0], [1], [0, 0, 1, 1], [], []>} : vector<32x32xf32>, vector<32x16xf32>, vector<32x16xf32> -> vector<32x16xf32>
    %230 = arith.addf %225, %229 : vector<32x16xf32>
    %c7_139 = arith.constant 7 : index
    %c0_140 = arith.constant 0 : index
    %c0_141 = arith.constant 0 : index
    %231 = vector.load %arg7[%c7_139, %c0_140, %c0_141] : memref<15x32x32xf32, #tpu.memory_space<vmem>>, vector<1x32x32xf32>
    %232 = vector.shape_cast %231 : vector<1x32x32xf32> to vector<32x32xf32>
    %233 = vector.extract_strided_slice %194 {offsets = [0, 7], sizes = [32, 16], strides = [1, 1]} : vector<32x30xf32> to vector<32x16xf32>
    %cst_142 = arith.constant dense<0.000000e+00> : vector<32x16xf32>
    %234 = tpu.matmul %232, %233, %cst_142 {dimension_numbers = #tpu.dot_dimension_numbers<[1], [0], [0], [1], [0, 0, 1, 1], [], []>} : vector<32x32xf32>, vector<32x16xf32>, vector<32x16xf32> -> vector<32x16xf32>
    %235 = arith.addf %230, %234 : vector<32x16xf32>
    %c8_143 = arith.constant 8 : index
    %c0_144 = arith.constant 0 : index
    %c0_145 = arith.constant 0 : index
    %236 = vector.load %arg7[%c8_143, %c0_144, %c0_145] : memref<15x32x32xf32, #tpu.memory_space<vmem>>, vector<1x32x32xf32>
    %237 = vector.shape_cast %236 : vector<1x32x32xf32> to vector<32x32xf32>
    %238 = vector.extract_strided_slice %194 {offsets = [0, 8], sizes = [32, 16], strides = [1, 1]} : vector<32x30xf32> to vector<32x16xf32>
    %cst_146 = arith.constant dense<0.000000e+00> : vector<32x16xf32>
    %239 = tpu.matmul %237, %238, %cst_146 {dimension_numbers = #tpu.dot_dimension_numbers<[1], [0], [0], [1], [0, 0, 1, 1], [], []>} : vector<32x32xf32>, vector<32x16xf32>, vector<32x16xf32> -> vector<32x16xf32>
    %240 = arith.addf %235, %239 : vector<32x16xf32>
    %c9_147 = arith.constant 9 : index
    %c0_148 = arith.constant 0 : index
    %c0_149 = arith.constant 0 : index
    %241 = vector.load %arg7[%c9_147, %c0_148, %c0_149] : memref<15x32x32xf32, #tpu.memory_space<vmem>>, vector<1x32x32xf32>
    %242 = vector.shape_cast %241 : vector<1x32x32xf32> to vector<32x32xf32>
    %243 = vector.extract_strided_slice %194 {offsets = [0, 9], sizes = [32, 16], strides = [1, 1]} : vector<32x30xf32> to vector<32x16xf32>
    %cst_150 = arith.constant dense<0.000000e+00> : vector<32x16xf32>
    %244 = tpu.matmul %242, %243, %cst_150 {dimension_numbers = #tpu.dot_dimension_numbers<[1], [0], [0], [1], [0, 0, 1, 1], [], []>} : vector<32x32xf32>, vector<32x16xf32>, vector<32x16xf32> -> vector<32x16xf32>
    %245 = arith.addf %240, %244 : vector<32x16xf32>
    %c10_151 = arith.constant 10 : index
    %c0_152 = arith.constant 0 : index
    %c0_153 = arith.constant 0 : index
    %246 = vector.load %arg7[%c10_151, %c0_152, %c0_153] : memref<15x32x32xf32, #tpu.memory_space<vmem>>, vector<1x32x32xf32>
    %247 = vector.shape_cast %246 : vector<1x32x32xf32> to vector<32x32xf32>
    %248 = vector.extract_strided_slice %194 {offsets = [0, 10], sizes = [32, 16], strides = [1, 1]} : vector<32x30xf32> to vector<32x16xf32>
    %cst_154 = arith.constant dense<0.000000e+00> : vector<32x16xf32>
    %249 = tpu.matmul %247, %248, %cst_154 {dimension_numbers = #tpu.dot_dimension_numbers<[1], [0], [0], [1], [0, 0, 1, 1], [], []>} : vector<32x32xf32>, vector<32x16xf32>, vector<32x16xf32> -> vector<32x16xf32>
    %250 = arith.addf %245, %249 : vector<32x16xf32>
    %c11_155 = arith.constant 11 : index
    %c0_156 = arith.constant 0 : index
    %c0_157 = arith.constant 0 : index
    %251 = vector.load %arg7[%c11_155, %c0_156, %c0_157] : memref<15x32x32xf32, #tpu.memory_space<vmem>>, vector<1x32x32xf32>
    %252 = vector.shape_cast %251 : vector<1x32x32xf32> to vector<32x32xf32>
    %253 = vector.extract_strided_slice %194 {offsets = [0, 11], sizes = [32, 16], strides = [1, 1]} : vector<32x30xf32> to vector<32x16xf32>
    %cst_158 = arith.constant dense<0.000000e+00> : vector<32x16xf32>
    %254 = tpu.matmul %252, %253, %cst_158 {dimension_numbers = #tpu.dot_dimension_numbers<[1], [0], [0], [1], [0, 0, 1, 1], [], []>} : vector<32x32xf32>, vector<32x16xf32>, vector<32x16xf32> -> vector<32x16xf32>
    %255 = arith.addf %250, %254 : vector<32x16xf32>
    %c12_159 = arith.constant 12 : index
    %c0_160 = arith.constant 0 : index
    %c0_161 = arith.constant 0 : index
    %256 = vector.load %arg7[%c12_159, %c0_160, %c0_161] : memref<15x32x32xf32, #tpu.memory_space<vmem>>, vector<1x32x32xf32>
    %257 = vector.shape_cast %256 : vector<1x32x32xf32> to vector<32x32xf32>
    %258 = vector.extract_strided_slice %194 {offsets = [0, 12], sizes = [32, 16], strides = [1, 1]} : vector<32x30xf32> to vector<32x16xf32>
    %cst_162 = arith.constant dense<0.000000e+00> : vector<32x16xf32>
    %259 = tpu.matmul %257, %258, %cst_162 {dimension_numbers = #tpu.dot_dimension_numbers<[1], [0], [0], [1], [0, 0, 1, 1], [], []>} : vector<32x32xf32>, vector<32x16xf32>, vector<32x16xf32> -> vector<32x16xf32>
    %260 = arith.addf %255, %259 : vector<32x16xf32>
    %c13_163 = arith.constant 13 : index
    %c0_164 = arith.constant 0 : index
    %c0_165 = arith.constant 0 : index
    %261 = vector.load %arg7[%c13_163, %c0_164, %c0_165] : memref<15x32x32xf32, #tpu.memory_space<vmem>>, vector<1x32x32xf32>
    %262 = vector.shape_cast %261 : vector<1x32x32xf32> to vector<32x32xf32>
    %263 = vector.extract_strided_slice %194 {offsets = [0, 13], sizes = [32, 16], strides = [1, 1]} : vector<32x30xf32> to vector<32x16xf32>
    %cst_166 = arith.constant dense<0.000000e+00> : vector<32x16xf32>
    %264 = tpu.matmul %262, %263, %cst_166 {dimension_numbers = #tpu.dot_dimension_numbers<[1], [0], [0], [1], [0, 0, 1, 1], [], []>} : vector<32x32xf32>, vector<32x16xf32>, vector<32x16xf32> -> vector<32x16xf32>
    %265 = arith.addf %260, %264 : vector<32x16xf32>
    %c14_167 = arith.constant 14 : index
    %c0_168 = arith.constant 0 : index
    %c0_169 = arith.constant 0 : index
    %266 = vector.load %arg7[%c14_167, %c0_168, %c0_169] : memref<15x32x32xf32, #tpu.memory_space<vmem>>, vector<1x32x32xf32>
    %267 = vector.shape_cast %266 : vector<1x32x32xf32> to vector<32x32xf32>
    %268 = vector.extract_strided_slice %194 {offsets = [0, 14], sizes = [32, 16], strides = [1, 1]} : vector<32x30xf32> to vector<32x16xf32>
    %cst_170 = arith.constant dense<0.000000e+00> : vector<32x16xf32>
    %269 = tpu.matmul %267, %268, %cst_170 {dimension_numbers = #tpu.dot_dimension_numbers<[1], [0], [0], [1], [0, 0, 1, 1], [], []>} : vector<32x32xf32>, vector<32x16xf32>, vector<32x16xf32> -> vector<32x16xf32>
    %270 = arith.addf %265, %269 : vector<32x16xf32>
    %c0_171 = arith.constant 0 : index
    %c0_172 = arith.constant 0 : index
    %271 = vector.load %arg8[%c0_171, %c0_172] : memref<32x1xf32, #tpu.memory_space<vmem>>, vector<32x1xf32>
    %272 = vector.broadcast %271 : vector<32x1xf32> to vector<32x16xf32>
    %273 = arith.addf %270, %272 : vector<32x16xf32>
    %274 = arith.negf %273 : vector<32x16xf32>
    %275 = math.exp %274 : vector<32x16xf32>
    %cst_173 = arith.constant 1.000000e+00 : f32
    %276 = vector.broadcast %cst_173 : f32 to vector<32x16xf32>
    %277 = arith.addf %276, %275 : vector<32x16xf32>
    %278 = arith.divf %276, %277 : vector<32x16xf32>
    %279 = arith.mulf %273, %278 : vector<32x16xf32>
    %cst_174 = arith.constant 0.000000e+00 : f32
    %280 = vector.broadcast %cst_174 : f32 to vector<32x7xf32>
    %281 = tpu.concatenate %280, %279, %280 in 1 : vector<32x7xf32>, vector<32x16xf32>, vector<32x7xf32> -> vector<32x30xf32>
    %cst_175 = arith.constant 0.000000e+00 : f32
    %282 = vector.broadcast %cst_175 : f32 to vector<2x16xf32>
    %c0_176 = arith.constant 0 : index
    %c0_177 = arith.constant 0 : index
    %c0_178 = arith.constant 0 : index
    %283 = vector.load %arg9[%c0_176, %c0_177, %c0_178] : memref<15x2x32xf32, #tpu.memory_space<vmem>>, vector<1x2x32xf32>
    %284 = vector.shape_cast %283 : vector<1x2x32xf32> to vector<2x32xf32>
    %285 = vector.extract_strided_slice %281 {offsets = [0, 0], sizes = [32, 16], strides = [1, 1]} : vector<32x30xf32> to vector<32x16xf32>
    %cst_179 = arith.constant dense<0.000000e+00> : vector<2x16xf32>
    %286 = tpu.matmul %284, %285, %cst_179 {dimension_numbers = #tpu.dot_dimension_numbers<[1], [0], [0], [1], [0, 0, 1, 1], [], []>} : vector<2x32xf32>, vector<32x16xf32>, vector<2x16xf32> -> vector<2x16xf32>
    %287 = arith.addf %282, %286 : vector<2x16xf32>
    %c1_180 = arith.constant 1 : index
    %c0_181 = arith.constant 0 : index
    %c0_182 = arith.constant 0 : index
    %288 = vector.load %arg9[%c1_180, %c0_181, %c0_182] : memref<15x2x32xf32, #tpu.memory_space<vmem>>, vector<1x2x32xf32>
    %289 = vector.shape_cast %288 : vector<1x2x32xf32> to vector<2x32xf32>
    %290 = vector.extract_strided_slice %281 {offsets = [0, 1], sizes = [32, 16], strides = [1, 1]} : vector<32x30xf32> to vector<32x16xf32>
    %cst_183 = arith.constant dense<0.000000e+00> : vector<2x16xf32>
    %291 = tpu.matmul %289, %290, %cst_183 {dimension_numbers = #tpu.dot_dimension_numbers<[1], [0], [0], [1], [0, 0, 1, 1], [], []>} : vector<2x32xf32>, vector<32x16xf32>, vector<2x16xf32> -> vector<2x16xf32>
    %292 = arith.addf %287, %291 : vector<2x16xf32>
    %c2_184 = arith.constant 2 : index
    %c0_185 = arith.constant 0 : index
    %c0_186 = arith.constant 0 : index
    %293 = vector.load %arg9[%c2_184, %c0_185, %c0_186] : memref<15x2x32xf32, #tpu.memory_space<vmem>>, vector<1x2x32xf32>
    %294 = vector.shape_cast %293 : vector<1x2x32xf32> to vector<2x32xf32>
    %295 = vector.extract_strided_slice %281 {offsets = [0, 2], sizes = [32, 16], strides = [1, 1]} : vector<32x30xf32> to vector<32x16xf32>
    %cst_187 = arith.constant dense<0.000000e+00> : vector<2x16xf32>
    %296 = tpu.matmul %294, %295, %cst_187 {dimension_numbers = #tpu.dot_dimension_numbers<[1], [0], [0], [1], [0, 0, 1, 1], [], []>} : vector<2x32xf32>, vector<32x16xf32>, vector<2x16xf32> -> vector<2x16xf32>
    %297 = arith.addf %292, %296 : vector<2x16xf32>
    %c3_188 = arith.constant 3 : index
    %c0_189 = arith.constant 0 : index
    %c0_190 = arith.constant 0 : index
    %298 = vector.load %arg9[%c3_188, %c0_189, %c0_190] : memref<15x2x32xf32, #tpu.memory_space<vmem>>, vector<1x2x32xf32>
    %299 = vector.shape_cast %298 : vector<1x2x32xf32> to vector<2x32xf32>
    %300 = vector.extract_strided_slice %281 {offsets = [0, 3], sizes = [32, 16], strides = [1, 1]} : vector<32x30xf32> to vector<32x16xf32>
    %cst_191 = arith.constant dense<0.000000e+00> : vector<2x16xf32>
    %301 = tpu.matmul %299, %300, %cst_191 {dimension_numbers = #tpu.dot_dimension_numbers<[1], [0], [0], [1], [0, 0, 1, 1], [], []>} : vector<2x32xf32>, vector<32x16xf32>, vector<2x16xf32> -> vector<2x16xf32>
    %302 = arith.addf %297, %301 : vector<2x16xf32>
    %c4_192 = arith.constant 4 : index
    %c0_193 = arith.constant 0 : index
    %c0_194 = arith.constant 0 : index
    %303 = vector.load %arg9[%c4_192, %c0_193, %c0_194] : memref<15x2x32xf32, #tpu.memory_space<vmem>>, vector<1x2x32xf32>
    %304 = vector.shape_cast %303 : vector<1x2x32xf32> to vector<2x32xf32>
    %305 = vector.extract_strided_slice %281 {offsets = [0, 4], sizes = [32, 16], strides = [1, 1]} : vector<32x30xf32> to vector<32x16xf32>
    %cst_195 = arith.constant dense<0.000000e+00> : vector<2x16xf32>
    %306 = tpu.matmul %304, %305, %cst_195 {dimension_numbers = #tpu.dot_dimension_numbers<[1], [0], [0], [1], [0, 0, 1, 1], [], []>} : vector<2x32xf32>, vector<32x16xf32>, vector<2x16xf32> -> vector<2x16xf32>
    %307 = arith.addf %302, %306 : vector<2x16xf32>
    %c5_196 = arith.constant 5 : index
    %c0_197 = arith.constant 0 : index
    %c0_198 = arith.constant 0 : index
    %308 = vector.load %arg9[%c5_196, %c0_197, %c0_198] : memref<15x2x32xf32, #tpu.memory_space<vmem>>, vector<1x2x32xf32>
    %309 = vector.shape_cast %308 : vector<1x2x32xf32> to vector<2x32xf32>
    %310 = vector.extract_strided_slice %281 {offsets = [0, 5], sizes = [32, 16], strides = [1, 1]} : vector<32x30xf32> to vector<32x16xf32>
    %cst_199 = arith.constant dense<0.000000e+00> : vector<2x16xf32>
    %311 = tpu.matmul %309, %310, %cst_199 {dimension_numbers = #tpu.dot_dimension_numbers<[1], [0], [0], [1], [0, 0, 1, 1], [], []>} : vector<2x32xf32>, vector<32x16xf32>, vector<2x16xf32> -> vector<2x16xf32>
    %312 = arith.addf %307, %311 : vector<2x16xf32>
    %c6_200 = arith.constant 6 : index
    %c0_201 = arith.constant 0 : index
    %c0_202 = arith.constant 0 : index
    %313 = vector.load %arg9[%c6_200, %c0_201, %c0_202] : memref<15x2x32xf32, #tpu.memory_space<vmem>>, vector<1x2x32xf32>
    %314 = vector.shape_cast %313 : vector<1x2x32xf32> to vector<2x32xf32>
    %315 = vector.extract_strided_slice %281 {offsets = [0, 6], sizes = [32, 16], strides = [1, 1]} : vector<32x30xf32> to vector<32x16xf32>
    %cst_203 = arith.constant dense<0.000000e+00> : vector<2x16xf32>
    %316 = tpu.matmul %314, %315, %cst_203 {dimension_numbers = #tpu.dot_dimension_numbers<[1], [0], [0], [1], [0, 0, 1, 1], [], []>} : vector<2x32xf32>, vector<32x16xf32>, vector<2x16xf32> -> vector<2x16xf32>
    %317 = arith.addf %312, %316 : vector<2x16xf32>
    %c7_204 = arith.constant 7 : index
    %c0_205 = arith.constant 0 : index
    %c0_206 = arith.constant 0 : index
    %318 = vector.load %arg9[%c7_204, %c0_205, %c0_206] : memref<15x2x32xf32, #tpu.memory_space<vmem>>, vector<1x2x32xf32>
    %319 = vector.shape_cast %318 : vector<1x2x32xf32> to vector<2x32xf32>
    %320 = vector.extract_strided_slice %281 {offsets = [0, 7], sizes = [32, 16], strides = [1, 1]} : vector<32x30xf32> to vector<32x16xf32>
    %cst_207 = arith.constant dense<0.000000e+00> : vector<2x16xf32>
    %321 = tpu.matmul %319, %320, %cst_207 {dimension_numbers = #tpu.dot_dimension_numbers<[1], [0], [0], [1], [0, 0, 1, 1], [], []>} : vector<2x32xf32>, vector<32x16xf32>, vector<2x16xf32> -> vector<2x16xf32>
    %322 = arith.addf %317, %321 : vector<2x16xf32>
    %c8_208 = arith.constant 8 : index
    %c0_209 = arith.constant 0 : index
    %c0_210 = arith.constant 0 : index
    %323 = vector.load %arg9[%c8_208, %c0_209, %c0_210] : memref<15x2x32xf32, #tpu.memory_space<vmem>>, vector<1x2x32xf32>
    %324 = vector.shape_cast %323 : vector<1x2x32xf32> to vector<2x32xf32>
    %325 = vector.extract_strided_slice %281 {offsets = [0, 8], sizes = [32, 16], strides = [1, 1]} : vector<32x30xf32> to vector<32x16xf32>
    %cst_211 = arith.constant dense<0.000000e+00> : vector<2x16xf32>
    %326 = tpu.matmul %324, %325, %cst_211 {dimension_numbers = #tpu.dot_dimension_numbers<[1], [0], [0], [1], [0, 0, 1, 1], [], []>} : vector<2x32xf32>, vector<32x16xf32>, vector<2x16xf32> -> vector<2x16xf32>
    %327 = arith.addf %322, %326 : vector<2x16xf32>
    %c9_212 = arith.constant 9 : index
    %c0_213 = arith.constant 0 : index
    %c0_214 = arith.constant 0 : index
    %328 = vector.load %arg9[%c9_212, %c0_213, %c0_214] : memref<15x2x32xf32, #tpu.memory_space<vmem>>, vector<1x2x32xf32>
    %329 = vector.shape_cast %328 : vector<1x2x32xf32> to vector<2x32xf32>
    %330 = vector.extract_strided_slice %281 {offsets = [0, 9], sizes = [32, 16], strides = [1, 1]} : vector<32x30xf32> to vector<32x16xf32>
    %cst_215 = arith.constant dense<0.000000e+00> : vector<2x16xf32>
    %331 = tpu.matmul %329, %330, %cst_215 {dimension_numbers = #tpu.dot_dimension_numbers<[1], [0], [0], [1], [0, 0, 1, 1], [], []>} : vector<2x32xf32>, vector<32x16xf32>, vector<2x16xf32> -> vector<2x16xf32>
    %332 = arith.addf %327, %331 : vector<2x16xf32>
    %c10_216 = arith.constant 10 : index
    %c0_217 = arith.constant 0 : index
    %c0_218 = arith.constant 0 : index
    %333 = vector.load %arg9[%c10_216, %c0_217, %c0_218] : memref<15x2x32xf32, #tpu.memory_space<vmem>>, vector<1x2x32xf32>
    %334 = vector.shape_cast %333 : vector<1x2x32xf32> to vector<2x32xf32>
    %335 = vector.extract_strided_slice %281 {offsets = [0, 10], sizes = [32, 16], strides = [1, 1]} : vector<32x30xf32> to vector<32x16xf32>
    %cst_219 = arith.constant dense<0.000000e+00> : vector<2x16xf32>
    %336 = tpu.matmul %334, %335, %cst_219 {dimension_numbers = #tpu.dot_dimension_numbers<[1], [0], [0], [1], [0, 0, 1, 1], [], []>} : vector<2x32xf32>, vector<32x16xf32>, vector<2x16xf32> -> vector<2x16xf32>
    %337 = arith.addf %332, %336 : vector<2x16xf32>
    %c11_220 = arith.constant 11 : index
    %c0_221 = arith.constant 0 : index
    %c0_222 = arith.constant 0 : index
    %338 = vector.load %arg9[%c11_220, %c0_221, %c0_222] : memref<15x2x32xf32, #tpu.memory_space<vmem>>, vector<1x2x32xf32>
    %339 = vector.shape_cast %338 : vector<1x2x32xf32> to vector<2x32xf32>
    %340 = vector.extract_strided_slice %281 {offsets = [0, 11], sizes = [32, 16], strides = [1, 1]} : vector<32x30xf32> to vector<32x16xf32>
    %cst_223 = arith.constant dense<0.000000e+00> : vector<2x16xf32>
    %341 = tpu.matmul %339, %340, %cst_223 {dimension_numbers = #tpu.dot_dimension_numbers<[1], [0], [0], [1], [0, 0, 1, 1], [], []>} : vector<2x32xf32>, vector<32x16xf32>, vector<2x16xf32> -> vector<2x16xf32>
    %342 = arith.addf %337, %341 : vector<2x16xf32>
    %c12_224 = arith.constant 12 : index
    %c0_225 = arith.constant 0 : index
    %c0_226 = arith.constant 0 : index
    %343 = vector.load %arg9[%c12_224, %c0_225, %c0_226] : memref<15x2x32xf32, #tpu.memory_space<vmem>>, vector<1x2x32xf32>
    %344 = vector.shape_cast %343 : vector<1x2x32xf32> to vector<2x32xf32>
    %345 = vector.extract_strided_slice %281 {offsets = [0, 12], sizes = [32, 16], strides = [1, 1]} : vector<32x30xf32> to vector<32x16xf32>
    %cst_227 = arith.constant dense<0.000000e+00> : vector<2x16xf32>
    %346 = tpu.matmul %344, %345, %cst_227 {dimension_numbers = #tpu.dot_dimension_numbers<[1], [0], [0], [1], [0, 0, 1, 1], [], []>} : vector<2x32xf32>, vector<32x16xf32>, vector<2x16xf32> -> vector<2x16xf32>
    %347 = arith.addf %342, %346 : vector<2x16xf32>
    %c13_228 = arith.constant 13 : index
    %c0_229 = arith.constant 0 : index
    %c0_230 = arith.constant 0 : index
    %348 = vector.load %arg9[%c13_228, %c0_229, %c0_230] : memref<15x2x32xf32, #tpu.memory_space<vmem>>, vector<1x2x32xf32>
    %349 = vector.shape_cast %348 : vector<1x2x32xf32> to vector<2x32xf32>
    %350 = vector.extract_strided_slice %281 {offsets = [0, 13], sizes = [32, 16], strides = [1, 1]} : vector<32x30xf32> to vector<32x16xf32>
    %cst_231 = arith.constant dense<0.000000e+00> : vector<2x16xf32>
    %351 = tpu.matmul %349, %350, %cst_231 {dimension_numbers = #tpu.dot_dimension_numbers<[1], [0], [0], [1], [0, 0, 1, 1], [], []>} : vector<2x32xf32>, vector<32x16xf32>, vector<2x16xf32> -> vector<2x16xf32>
    %352 = arith.addf %347, %351 : vector<2x16xf32>
    %c14_232 = arith.constant 14 : index
    %c0_233 = arith.constant 0 : index
    %c0_234 = arith.constant 0 : index
    %353 = vector.load %arg9[%c14_232, %c0_233, %c0_234] : memref<15x2x32xf32, #tpu.memory_space<vmem>>, vector<1x2x32xf32>
    %354 = vector.shape_cast %353 : vector<1x2x32xf32> to vector<2x32xf32>
    %355 = vector.extract_strided_slice %281 {offsets = [0, 14], sizes = [32, 16], strides = [1, 1]} : vector<32x30xf32> to vector<32x16xf32>
    %cst_235 = arith.constant dense<0.000000e+00> : vector<2x16xf32>
    %356 = tpu.matmul %354, %355, %cst_235 {dimension_numbers = #tpu.dot_dimension_numbers<[1], [0], [0], [1], [0, 0, 1, 1], [], []>} : vector<2x32xf32>, vector<32x16xf32>, vector<2x16xf32> -> vector<2x16xf32>
    %357 = arith.addf %352, %356 : vector<2x16xf32>
    %c0_236 = arith.constant 0 : index
    %c0_237 = arith.constant 0 : index
    %358 = vector.load %arg10[%c0_236, %c0_237] : memref<2x1xf32, #tpu.memory_space<vmem>>, vector<2x1xf32>
    %359 = vector.broadcast %358 : vector<2x1xf32> to vector<2x16xf32>
    %360 = arith.addf %357, %359 : vector<2x16xf32>
    %361 = vector.extract_strided_slice %360 {offsets = [0, 0], sizes = [1, 16], strides = [1, 1]} : vector<2x16xf32> to vector<1x16xf32>
    %362 = arith.negf %361 : vector<1x16xf32>
    %363 = math.exp %362 : vector<1x16xf32>
    %cst_238 = arith.constant 1.000000e+00 : f32
    %364 = vector.broadcast %cst_238 : f32 to vector<1x16xf32>
    %365 = arith.addf %364, %363 : vector<1x16xf32>
    %366 = arith.divf %364, %365 : vector<1x16xf32>
    %367 = vector.extract_strided_slice %360 {offsets = [1, 0], sizes = [1, 16], strides = [1, 1]} : vector<2x16xf32> to vector<1x16xf32>
    %368 = arith.negf %367 : vector<1x16xf32>
    %369 = math.exp %368 : vector<1x16xf32>
    %cst_239 = arith.constant 1.000000e+00 : f32
    %370 = vector.broadcast %cst_239 : f32 to vector<1x16xf32>
    %371 = arith.addf %370, %369 : vector<1x16xf32>
    %372 = arith.divf %370, %371 : vector<1x16xf32>
    %c0_240 = arith.constant 0 : index
    %c0_241 = arith.constant 0 : index
    %373 = vector.load %arg11[%c0_240, %c0_241] : memref<1x1xf32, #tpu.memory_space<vmem>>, vector<1x1xf32>
    %374 = vector.broadcast %373 : vector<1x1xf32> to vector<1x16xf32>
    %375 = arith.mulf %372, %374 : vector<1x16xf32>
    %cst_242 = arith.constant dense<0.000000e+00> : vector<1xf32>
    %376 = vector.multi_reduction <add>, %375, %cst_242 [1] : vector<1x16xf32> to vector<1xf32>
    %377 = vector.shape_cast %376 : vector<1xf32> to vector<1x1xf32>
    %cst_243 = arith.constant 1.600000e+01 : f32
    %378 = vector.broadcast %cst_243 : f32 to vector<1x1xf32>
    %379 = arith.divf %377, %378 : vector<1x1xf32>
    %cst_244 = arith.constant 1.000000e+00 : f32
    %380 = vector.broadcast %cst_244 : f32 to vector<1x1xf32>
    %381 = arith.maximumf %379, %380 : vector<1x1xf32>
    %382 = vector.broadcast %381 : vector<1x1xf32> to vector<1x16xf32>
    %383 = arith.divf %375, %382 : vector<1x16xf32>
    %cst_245 = arith.constant 0.000000e+00 : f32
    %384 = vector.broadcast %cst_245 : f32 to vector<1x1xf32>
    %385 = vector.extract_strided_slice %383 {offsets = [0, 0], sizes = [1, 15], strides = [1, 1]} : vector<1x16xf32> to vector<1x15xf32>
    %386 = tpu.concatenate %384, %385 in 1 : vector<1x1xf32>, vector<1x15xf32> -> vector<1x16xf32>
    %387 = arith.addf %383, %386 : vector<1x16xf32>
    %cst_246 = arith.constant 0.000000e+00 : f32
    %388 = vector.broadcast %cst_246 : f32 to vector<1x2xf32>
    %389 = vector.extract_strided_slice %387 {offsets = [0, 0], sizes = [1, 14], strides = [1, 1]} : vector<1x16xf32> to vector<1x14xf32>
    %390 = tpu.concatenate %388, %389 in 1 : vector<1x2xf32>, vector<1x14xf32> -> vector<1x16xf32>
    %391 = arith.addf %387, %390 : vector<1x16xf32>
    %cst_247 = arith.constant 0.000000e+00 : f32
    %392 = vector.broadcast %cst_247 : f32 to vector<1x4xf32>
    %393 = vector.extract_strided_slice %391 {offsets = [0, 0], sizes = [1, 12], strides = [1, 1]} : vector<1x16xf32> to vector<1x12xf32>
    %394 = tpu.concatenate %392, %393 in 1 : vector<1x4xf32>, vector<1x12xf32> -> vector<1x16xf32>
    %395 = arith.addf %391, %394 : vector<1x16xf32>
    %cst_248 = arith.constant 0.000000e+00 : f32
    %396 = vector.broadcast %cst_248 : f32 to vector<1x8xf32>
    %397 = vector.extract_strided_slice %395 {offsets = [0, 0], sizes = [1, 8], strides = [1, 1]} : vector<1x16xf32> to vector<1x8xf32>
    %398 = tpu.concatenate %396, %397 in 1 : vector<1x8xf32>, vector<1x8xf32> -> vector<1x16xf32>
    %399 = arith.addf %395, %398 : vector<1x16xf32>
    %400 = math.floor %399 : vector<1x16xf32>
    %401 = arith.subf %399, %400 : vector<1x16xf32>
    %cst_249 = arith.constant 1.000000e+00 : f32
    %402 = vector.broadcast %cst_249 : f32 to vector<1x16xf32>
    %403 = arith.subf %402, %401 : vector<1x16xf32>
    %404 = arith.fptosi %400 : vector<1x16xf32> to vector<1x16xi32>
    %405 = tpu.iota {dimensions = array<i32: 0>} : vector<18x16xi32>
    %406 = vector.broadcast %404 : vector<1x16xi32> to vector<18x16xi32>
    %407 = arith.cmpi eq, %405, %406 : vector<18x16xi32>
    %cst_250 = arith.constant 0.000000e+00 : f32
    %408 = vector.shape_cast %403 : vector<1x16xf32> to vector<1x16xf32>
    %409 = vector.broadcast %408 : vector<1x16xf32> to vector<18x16xf32>
    %410 = vector.broadcast %cst_250 : f32 to vector<18x16xf32>
    %411 = arith.select %407, %409, %410 : vector<18x16xi1>, vector<18x16xf32>
    %c1_i32 = arith.constant 1 : i32
    %412 = vector.broadcast %c1_i32 : i32 to vector<1x16xi32>
    %413 = arith.addi %404, %412 : vector<1x16xi32>
    %414 = vector.broadcast %413 : vector<1x16xi32> to vector<18x16xi32>
    %415 = arith.cmpi eq, %405, %414 : vector<18x16xi32>
    %cst_251 = arith.constant 0.000000e+00 : f32
    %416 = vector.shape_cast %401 : vector<1x16xf32> to vector<1x16xf32>
    %417 = vector.broadcast %416 : vector<1x16xf32> to vector<18x16xf32>
    %418 = vector.broadcast %cst_251 : f32 to vector<18x16xf32>
    %419 = arith.select %415, %417, %418 : vector<18x16xi1>, vector<18x16xf32>
    %420 = arith.addf %411, %419 : vector<18x16xf32>
    %421 = vector.broadcast %366 : vector<1x16xf32> to vector<18x16xf32>
    %422 = arith.mulf %420, %421 : vector<18x16xf32>
    %cst_252 = arith.constant dense<0.000000e+00> : vector<8x18xf32>
    %423 = tpu.matmul %14, %422, %cst_252 {dimension_numbers = #tpu.dot_dimension_numbers<[1], [1], [0], [0], [0, 0, 1, 0], [], []>} : vector<8x16xf32>, vector<18x16xf32>, vector<8x18xf32> -> vector<8x18xf32>
    %c0_253 = arith.constant 0 : index
    %c0_254 = arith.constant 0 : index
    %c0_255 = arith.constant 0 : index
    %424 = vector.load %arg12[%c0_253, %c0_254, %c0_255] : memref<1x8x18xf32, #tpu.memory_space<vmem>>, vector<1x8x18xf32>
    %425 = vector.shape_cast %424 : vector<1x8x18xf32> to vector<8x18xf32>
    %426 = vector.shape_cast %423 : vector<8x18xf32> to vector<1x8x18xf32>
    tpu.vector_store %arg12[%c0_253, %c0_254, %c0_255], %426 {strides = array<i32>} : memref<1x8x18xf32, #tpu.memory_space<vmem>>, vector<1x8x18xf32>,
    return
  }
  func.func @transform_0(%arg0: i32) -> (i32, i32, i32) {
    %c0_i32 = arith.constant 0 : i32
    %c0_i32_0 = arith.constant 0 : i32
    %c0_i32_1 = arith.constant 0 : i32
    return %arg0, %c0_i32, %c0_i32_0 : i32, i32, i32
  }
  func.func @transform_1(%arg0: i32) -> (i32, i32) {
    %c0_i32 = arith.constant 0 : i32
    %c0_i32_0 = arith.constant 0 : i32
    %c0_i32_1 = arith.constant 0 : i32
    return %c0_i32, %c0_i32_0 : i32, i32
  }
  func.func @transform_2(%arg0: i32) -> (i32, i32) {
    %c0_i32 = arith.constant 0 : i32
    %c0_i32_0 = arith.constant 0 : i32
    %c0_i32_1 = arith.constant 0 : i32
    return %c0_i32, %c0_i32_0 : i32, i32
  }
  func.func @transform_3(%arg0: i32) -> (i32, i32) {
    %c0_i32 = arith.constant 0 : i32
    %c0_i32_0 = arith.constant 0 : i32
    %c0_i32_1 = arith.constant 0 : i32
    return %c0_i32, %c0_i32_0 : i32, i32
  }
  func.func @transform_4(%arg0: i32) -> (i32, i32, i32) {
    %c0_i32 = arith.constant 0 : i32
    %c0_i32_0 = arith.constant 0 : i32
    %c0_i32_1 = arith.constant 0 : i32
    %c0_i32_2 = arith.constant 0 : i32
    return %c0_i32, %c0_i32_0, %c0_i32_1 : i32, i32, i32
  }
  func.func @transform_5(%arg0: i32) -> (i32, i32) {
    %c0_i32 = arith.constant 0 : i32
    %c0_i32_0 = arith.constant 0 : i32
    %c0_i32_1 = arith.constant 0 : i32
    return %c0_i32, %c0_i32_0 : i32, i32
  }
  func.func @transform_6(%arg0: i32) -> (i32, i32, i32) {
    %c0_i32 = arith.constant 0 : i32
    %c0_i32_0 = arith.constant 0 : i32
    %c0_i32_1 = arith.constant 0 : i32
    %c0_i32_2 = arith.constant 0 : i32
    return %c0_i32, %c0_i32_0, %c0_i32_1 : i32, i32, i32
  }
  func.func @transform_7(%arg0: i32) -> (i32, i32) {
    %c0_i32 = arith.constant 0 : i32
    %c0_i32_0 = arith.constant 0 : i32
    %c0_i32_1 = arith.constant 0 : i32
    return %c0_i32, %c0_i32_0 : i32, i32
  }
  func.func @transform_8(%arg0: i32) -> (i32, i32, i32) {
    %c0_i32 = arith.constant 0 : i32
    %c0_i32_0 = arith.constant 0 : i32
    %c0_i32_1 = arith.constant 0 : i32
    %c0_i32_2 = arith.constant 0 : i32
    return %c0_i32, %c0_i32_0, %c0_i32_1 : i32, i32, i32
  }
  func.func @transform_9(%arg0: i32) -> (i32, i32) {
    %c0_i32 = arith.constant 0 : i32
    %c0_i32_0 = arith.constant 0 : i32
    %c0_i32_1 = arith.constant 0 : i32
    return %c0_i32, %c0_i32_0 : i32, i32
  }
  func.func @transform_10(%arg0: i32) -> (i32, i32) {
    %c0_i32 = arith.constant 0 : i32
    %c0_i32_0 = arith.constant 0 : i32
    %c0_i32_1 = arith.constant 0 : i32
    return %c0_i32, %c0_i32_0 : i32, i32
  }
  func.func @transform_11(%arg0: i32) -> (i32, i32, i32) {
    %c0_i32 = arith.constant 0 : i32
    %c0_i32_0 = arith.constant 0 : i32
    %c0_i32_1 = arith.constant 0 : i32
    return %arg0, %c0_i32, %c0_i32_0 : i32, i32, i32
  }
}

</mosaic_0001>

<bundles_post_ra>
// kernel: dpool_forward.1
= control target key start
LH: loop header
LB: loop body
LE: loop exit
PB: predicated region body
PF: predicated region fallthrough
CT: control target
= control target key end

     0   :  { %s11218_s0 = inlined_call_operand.vmem [shape: f32[2,12,16], index: 0, kind: input, shape index: {}]   ;;  %s11219_s1 = inlined_call_operand.vmem [shape: f32[16,12], index: 1, kind: input, shape index: {}]   ;;  %s11220_s2 = inlined_call_operand.vmem [shape: f32[16,1], index: 2, kind: input, shape index: {}]   ;;  %s11221_s3 = inlined_call_operand.vmem [shape: f32[1,12], index: 3, kind: input, shape index: {}]   ;;  %s11222_s4 = inlined_call_operand.vmem [shape: f32[31,32,2], index: 4, kind: input, shape index: {}]   ;;  %s11223_s5 = inlined_call_operand.vmem [shape: f32[32,1], index: 5, kind: input, shape index: {}]   ;;  %s11224_s6 = inlined_call_operand.vmem [shape: f32[15,32,32], index: 6, kind: input, shape index: {}]   ;;  %s11225_s7 = inlined_call_operand.vmem [shape: f32[32,1], index: 7, kind: input, shape index: {}]   ;;  %s11226_s8 = inlined_call_operand.vmem [shape: f32[15,2,32], index: 8, kind: input, shape index: {}]   ;;  %s11227_s9 = inlined_call_operand.vmem [shape: f32[2,1], index: 9, kind: input, shape index: {}]   ;;  %s11228_s10 = inlined_call_operand.<no memory space> [shape: f32[1,1], index: 10, kind: input, shape index: {}]   ;;  %s11229_s11 = inlined_call_operand.hbm [shape: f32[2,8,18], index: 11, kind: output, shape index: {}]  }
   0x1   :  { %11263 = sst [smem:[#allocation9_spill]] %s11218_s0  ;;  %v16_v0 = vstv %s11228_s10 }
   0x2   :  { %11264 = sst [smem:[#allocation10_spill]] %s11219_s1  ;;  %17 = vst [vmem:[#allocation2] sm:$0x1] %v16_v0 }
   0x3   :  { %11265 = sst [smem:[#allocation11_spill]] %s11221_s3 }
   0x4   :  { %11266 = sst [smem:[#allocation12_spill]] %s11222_s4 }
   0x5   :  { %11267 = sst [smem:[#allocation13_spill]] %s11223_s5 }
   0x6   :  { %18 = vsyncpa [#allocation4], 0 }
   0x7   :  { %20 = vsyncpa [#allocation4 + $0x1], 0  ;;  %s9964_s19 = smov 0   ;;  %s9966_s20 = smov 0  }
   0x8   :  { %s9968_s21 = smov 0   ;;  %s9970_s22 = smov 0  }
   0x9 LB: > { %11268 = sst [smem:[#allocation6_spill]] %s9853_s21  ;;  %s9985_s10 = sadd.s32 4294967295, %s9857_s22   ;;  %s9857_s22 = sphi %s9970_s22, %s11295_s22   ;;  %s9853_s21 = sphi %s9968_s21, %s11297_s21   ;;  %s9849_s20 = sphi %s9966_s20, %s11299_s20   ;;  %s9845_s19 = sphi %s9964_s19, %s11298_s19  }
   0xa   : > { %s7497_s23 = sadd.s32 4294967294, %s9857_s22   ;;  %s9989_s24 = sadd.s32 1, %s9857_s22  }
   0xb   : > { %11269 = sst [smem:[#allocation7_spill]] %s9989_s24  ;;  %s269_s25 = sadd.s32 1, %s9853_s21 }
   0xc   : > { %s266_s26 = ssub.s32 %s9857_s22, %s9989_s24  ;;  %p279_p0 = scmp.ne.s32.totalorder %s9853_s21, %s9849_s20 }
   0xd   : > { %p267_p1 = scmp.eq.s32.totalorder %s266_s26, 0  ;;  %p280_p2 = scmp.eq.s32.totalorder %s9985_s10, 1 }
   0xe   : > { %p285_p3 = scmp.ne.s32.totalorder %s9849_s20, %s9845_s19  ;;  %p286_p4 = scmp.eq.s32.totalorder %s7497_s23, 1 }
   0xf   : > { %s10000_s27 = scalar_select %p267_p1, %s9853_s21, %s269_s25  }
  0x10   : > { %p10002_p5 = por %p280_p2, %p279_p0  ;;  %p10006_p6 = por %p286_p4, %p285_p3 }
  0x11   : > { %11270 = sst [smem:[#allocation8_spill]] %s10000_s27  ;;  %p7500_p7 = scmp.ge.s32.totalorder %s9857_s22, 1 }
  0x12   : > { %p342_p8 = scmp.lt.s32.totalorder %s9857_s22, 3 }
  0x14   : > { %p343_p9 = pnand %p7500_p7, %p342_p8 }
  0x15   : > { %p382_p10 = scmp.lt.s32.totalorder (!%p343_p9), %s9985_s10, 1  ;;  %v9859_v1 = vmov (!%p343_p9), 0.0|0.0   ;;  %vm9860_vm0 = vmmov (!%p343_p9), 0   ;;  %v9861_v2 = vmov (!%p343_p9), 0.0   ;;  %vm410_vm1 = vcmask (!%p343_p9), 1043456   ;;  %s11273_s0 = sld [smem:[#allocation9_spill]] (!%p343_p9) }
  0x16   : > { %346 = sbr.rel (%p343_p9) target bundleno = 3086 (0xc0e), region = 64  ;;  %8969 = vmatprep.subr.bf16.mxu1 (!%p343_p9), %v9859_v1  ;;  %8328 = vmatprep.mubr.msk.f32.mxu1 (!%p343_p9), %vm9860_vm0, %v9861_v2  ;;  %vm9862_vm2 = vmmov (!%p343_p9), 1   ;;  %vm403_vm4 = vcmask (!%p343_p9), 97280   ;;  %s11274_s3 = sld [smem:[#allocation11_spill]] (!%p343_p9)  ;;  %v570_v7 = vlaneseq (!%p343_p9)  ;;  %vm603_vm6 = vcmask (!%p343_p9), 15360  }
  0x17   : > { %vm8964_vm3 = vmpackc.low (!%p343_p9), %vm410_vm1, %vm9862_vm2  ;;  %s9863_s18 = smov (!%p343_p9), 15   ;;  %s11275_s1 = sld [smem:[#allocation10_spill]] (!%p343_p9)  ;;  %vm587_vm7 = vcmask (!%p343_p9), 121856   ;;  %vm589_vm8 = vcmask (!%p343_p9), 252928   ;;  %vm616_vm9 = vcmask (!%p343_p9), 1041408   ;;  %vm4065_vm10 = vcmask (!%p343_p9), 56320  }
  0x18   : > { %v10024_v8 = vshrl.u32 (!%p343_p9), %v570_v7, 7  ;;  %s11276_s4 = sld [smem:[#allocation12_spill]] (!%p343_p9)  ;;  %s11254_s14 = smov (!%p343_p9), 126   ;;  %vm4070_vm11 = vcmask (!%p343_p9), 187392   ;;  %vm4100_vm12 = vcmask (!%p343_p9), 261120   ;;  %vm7242_vm14 = vcmask (!%p343_p9), 123905  }
  0x19   : > { %s11252_s16 = smov (!%p343_p9), 125   ;;  %s11248_s17 = smov (!%p343_p9), 124   ;;  %vm10722_vm13 = vmpackc.low (!%p343_p9), %vm4070_vm11, %vm4070_vm11  ;;  %vm7256_vm15 = vcmask (!%p343_p9), 7168   ;;  %vm7288_vm1 = vcmask (!%p343_p9), 64512  }
  0x1a   : > { %v10027_v9 = vsub.s32 (!%p343_p9), 0, %v10024_v8  ;;  %vm572_vm5 = vcmp.eq.s32.totalorder (!%p343_p9), %v10024_v8, 0  ;;  %s11230_s23 = smov (!%p343_p9), 122   ;;  %s11232_s25 = smov (!%p343_p9), 121  }
  0x1b   : > { %s11234_s26 = smov (!%p343_p9), 120   ;;  %s11242_s13 = smov (!%p343_p9), 117  }
  0x1c   : > { %v496_v6 = vld [vmem:[%s11274_s3] sm:$0x1] (!%p343_p9)  ;;  %s11277_s5 = sld [smem:[#allocation13_spill]] (!%p343_p9)  ;;  %s11291_s24 = smov (!%p343_p9), 7  }
  0x1d   : > { %s383_s30 = scalar_select %p382_p10, %s9985_s10, 1  ;;  %v389_v16 = vld [vmem:[%s11275_s1] sm:$0xff]  ;;  %v390_v17 = vld [vmem:[%s11275_s1 + $0x8] sm:$0xff] }
  0x1e   : > { %8321 = vmatprep.mubr.msk.f32.mxu0 %vm403_vm4, %v389_v16  ;;  %v7510_v18 = vld [vmem:[%s11276_s4 + $0x20] sm:$0xff]  ;;  %v7511_v23 = vld [vmem:[%s11276_s4 + $0x28] sm:$0xff]  ;;  %v7512_v24 = vld [vmem:[%s11276_s4 + $0x30] sm:$0xff]  ;;  %s11292_s27 = smov 127   ;;  %s11294_s1 = smov 125  }
  0x1f   : > { %s7955_s12 = sshll.u32 %s383_s30, 4  ;;  %s11236_s30 = smov 119   ;;  %v7513_v26 = vld [vmem:[%s11276_s4 + $0x38] sm:$0xff]  ;;  %v591_v27 = vld [vmem:[%s11276_s4] sm:$0xff]  ;;  %v592_v28 = vld [vmem:[%s11276_s4 + $0x8] sm:$0xff] }
  0x20   : > { %s386_s15 = scalar_lea.vmem %s11273_s0, %s7955_s12  ;;  %s11238_s12 = smov 118   ;;  %v593_v29 = vld [vmem:[%s11276_s4 + $0x10] sm:$0xff]  ;;  %v594_v31 = vld [vmem:[%s11276_s4 + $0x18] sm:$0xff]  ;;  %v7524_v32 = vld [vmem:[%s11276_s4 + $0x40] sm:$0xff] }
  0x21   : > { %v387_v3 = vld [vmem:[%s386_s15] sm:$0xff]  ;;  %v388_v4 = vld [vmem:[%s386_s15 + $0x8] sm:$0xf]  ;;  %s11256_s15 = smov 127   ;;  %v7526_v34 = vld [vmem:[%s11276_s4 + $0x50] sm:$0xff]  ;;  %s11293_s0 = smov 126  }
  0x22   : > { %v8963_v5 = vpack.c.bf16 %v388_v4, %v387_v3  ;;  %v7525_v33 = vld [vmem:[%s11276_s4 + $0x48] sm:$0xff]  ;;  %v7527_v36 = vld [vmem:[%s11276_s4 + $0x58] sm:$0xff]  ;;  %v7533_v37 = vld [vmem:[%s11276_s4 + $0x60] sm:$0xff]  ;;  %s9897_s21 = smov 2  }
  0x23   : > { %v7534_v38 = vld [vmem:[%s11276_s4 + $0x68] sm:$0xff]  ;;  %v7535_v39 = vld [vmem:[%s11276_s4 + $0x70] sm:$0xff]  ;;  %v7536_v41 = vld [vmem:[%s11276_s4 + $0x78] sm:$0xff] }
  0x24   : > { %8972 = vmatpush3.bf16.msk.msra.mxu1 %vm8964_vm3, %v8963_v5  ;;  %8965 = vmatprep.subr.msk.bf16.mxu0 %vm8964_vm3, %v8963_v5  ;;  %v7542_v42 = vld [vmem:[%s11276_s4 + $0x80] sm:$0xff]  ;;  %v7543_v43 = vld [vmem:[%s11276_s4 + $0x88] sm:$0xff]  ;;  %v7544_v44 = vld [vmem:[%s11276_s4 + $0x90] sm:$0xff] }
  0x25   : > { %8968 = vmatpush3.bf16.msk.msra.mxu0 %vm8964_vm3, %v8963_v5  ;;  %v7545_v46 = vld [vmem:[%s11276_s4 + $0x98] sm:$0xff]  ;;  %v7551_v47 = vld [vmem:[%s11276_s4 + $0xa0] sm:$0xff]  ;;  %v7552_v48 = vld [vmem:[%s11276_s4 + $0xa8] sm:$0xff] }
  0x26   : > { %v7553_v49 = vld [vmem:[%s11276_s4 + $0xb0] sm:$0xff]  ;;  %v7554_v51 = vld [vmem:[%s11276_s4 + $0xb8] sm:$0xff]  ;;  %v7560_v52 = vld [vmem:[%s11276_s4 + $0xc0] sm:$0xff] }
  0x27   : > { %8329 = vmatmul.mubr.msk.f32.vlgmr.msra.gmra.mrb[0].mxu1 %vm403_vm4, %v496_v6  ;;  %v7561_v53 = vld [vmem:[%s11276_s4 + $0xc8] sm:$0xff]  ;;  %v7562_v54 = vld [vmem:[%s11276_s4 + $0xd0] sm:$0xff]  ;;  %v7563_v56 = vld [vmem:[%s11276_s4 + $0xd8] sm:$0xff] }
  0x28   : > { %8322 = vmatmul.mubr.msk.f32.vlgmr.msra.gmra.mrb[0].mxu0 %vm403_vm4, %v390_v17  ;;  %v7569_v57 = vld [vmem:[%s11276_s4 + $0xe0] sm:$0xff]  ;;  %v7570_v58 = vld [vmem:[%s11276_s4 + $0xe8] sm:$0xff]  ;;  %v7571_v59 = vld [vmem:[%s11276_s4 + $0xf0] sm:$0xff] }
  0x29   : > { %8333 = vmatprep.mubr.msk.f32.mxu0 %vm603_vm6, %v7510_v18  ;;  %v7572_v61 = vld [vmem:[%s11276_s4 + $0xf8] sm:$0xff]  ;;  %v7578_v62 = vld [vmem:[%s11276_s4 + $0x100] sm:$0xff]  ;;  %v7579_v63 = vld [vmem:[%s11276_s4 + $0x108] sm:$0xff] }
  0x2a   : > { %v7580_v0 = vld [vmem:[%s11276_s4 + $0x110] sm:$0xff]  ;;  %v7581_v4 = vld [vmem:[%s11276_s4 + $0x118] sm:$0xff]  ;;  %v7587_v5 = vld [vmem:[%s11276_s4 + $0x120] sm:$0xff] }
  0x2b   : > { %v7588_v6 = vld [vmem:[%s11276_s4 + $0x128] sm:$0xff]  ;;  %v7589_v7 = vld [vmem:[%s11276_s4 + $0x130] sm:$0xff]  ;;  %v7599_v18 = vld [vmem:[%s11276_s4 + $0x158] sm:$0xff] }
  0xfa   : > { %v566_v10 = vpop.f32.mrb[0].mxu1 }
  0xfb   : > { %v577_v11 = vmul.f32 %v566_v10, %v566_v10  ;;  %v8330_v12 = vpop.f32.mrb[1].mxu1  ;;  %v576_v13 = vrot.slane %v566_v10, %v10027_v9 }
  0xfc   : > { %v7596_v12 = vld [vmem:[%s11276_s4 + $0x140] sm:$0xff] }
  0xfd   : > { %v581_v14 = vrot.slane %v577_v11, %v10027_v9  ;;  %v7590_v11 = vld [vmem:[%s11276_s4 + $0x138] sm:$0xff] }
  0xff   : > { %v582_v15 = vsel %vm572_vm5, %v576_v13, %v581_v14  ;;  %v7597_v13 = vld [vmem:[%s11276_s4 + $0x148] sm:$0xff]  ;;  %v10278_v14 = vpop.f32.mrb[0].mxu0 }
 0x100   : > { %584 = vrot.lane.b32.xlu0 %v582_v15, %s9863_s18  ;;  %s11240_s18 = smov 123   ;;  %v7598_v15 = vld [vmem:[%s11276_s4 + $0x150] sm:$0xff]  ;;  %v10284_v16 = vpop.f32.mrb[1].mxu0 }
 0x172   : > { %v585_v19 = vpop.permute.xlu0 %584 }
 0x173   : > { %v588_v20 = vsel %vm587_vm7, 0.0, %v585_v19  ;;  %v7605_v19 = vld [vmem:[%s11276_s4 + $0x160] sm:$0xff] }
 0x174   : > { %v10044_v21 = vsel %vm589_vm8, %v588_v20, 0.0  ;;  %v7606_v20 = vld [vmem:[%s11276_s4 + $0x168] sm:$0xff] }
 0x175   : > { %808 = vrot.lane.b32.xlu1 %v10044_v21, %s11254_s14  ;;  %601 = vrot.lane.b32.xlu0 %v10044_v21, %s11256_s15 }
 0x179   : > { %918 = vrot.lane.b32.xlu1 %v10044_v21, %s11252_s16  ;;  %1028 = vrot.lane.b32.xlu0 %v10044_v21, %s11248_s17  ;;  %s9884_s17 = smov 107  }
 0x17d   : > { %1138 = vrot.lane.b32.xlu1 %v10044_v21, %s11240_s18  ;;  %1248 = vrot.lane.b32.xlu0 %v10044_v21, %s11230_s23  ;;  %s11244_s23 = smov 116   ;;  %s9880_s18 = smov 111  }
 0x181   : > { %1358 = vrot.lane.b32.xlu1 %v10044_v21, %s11232_s25  ;;  %1468 = vrot.lane.b32.xlu0 %v10044_v21, %s11234_s26  ;;  %s11246_s25 = smov 115   ;;  %s11250_s26 = smov 114  }
 0x185   : > { %1578 = vrot.lane.b32.xlu1 %v10044_v21, %s11236_s30  ;;  %1688 = vrot.lane.b32.xlu0 %v10044_v21, %s11238_s12  ;;  %s9878_s30 = smov 113   ;;  %s9879_s12 = smov 112  }
 0x189   : > { %1798 = vrot.lane.b32.xlu1 %v10044_v21, %s11242_s13  ;;  %1908 = vrot.lane.b32.xlu0 %v10044_v21, %s11244_s23  ;;  %s9881_s13 = smov 110   ;;  %s9882_s23 = smov 109  }
 0x18d   : > { %2018 = vrot.lane.b32.xlu1 %v10044_v21, %s11246_s25  ;;  %2128 = vrot.lane.b32.xlu0 %v10044_v21, %s11250_s26  ;;  %s9883_s25 = smov 108   ;;  %s9885_s26 = smov 106  }
 0x191   : > { %2238 = vrot.lane.b32.xlu1 %v10044_v21, %s9878_s30  ;;  %2348 = vrot.lane.b32.xlu0 %v10044_v21, %s9879_s12  ;;  %s9886_s30 = smov 105   ;;  %s9887_s12 = smov 104  }
 0x195   : > { %2458 = vrot.lane.b32.xlu1 %v10044_v21, %s9880_s18  ;;  %2568 = vrot.lane.b32.xlu0 %v10044_v21, %s9881_s13  ;;  %s9888_s18 = smov 103   ;;  %s9889_s13 = smov 102  }
 0x199   : > { %2678 = vrot.lane.b32.xlu1 %v10044_v21, %s9882_s23  ;;  %2788 = vrot.lane.b32.xlu0 %v10044_v21, %s9883_s25  ;;  %s9890_s23 = smov 101   ;;  %s9891_s25 = smov 100  }
 0x19d   : > { %2898 = vrot.lane.b32.xlu1 %v10044_v21, %s9884_s17  ;;  %3008 = vrot.lane.b32.xlu0 %v10044_v21, %s9885_s26  ;;  %s9892_s17 = smov 99   ;;  %s9893_s26 = smov 98  }
 0x1a1   : > { %3118 = vrot.lane.b32.xlu1 %v10044_v21, %s9886_s30  ;;  %3228 = vrot.lane.b32.xlu0 %v10044_v21, %s9887_s12  ;;  %s11278_s12 = smov 124   ;;  %s11284_s30 = smov 118  }
 0x1a5   : > { %3338 = vrot.lane.b32.xlu1 %v10044_v21, %s9888_s18  ;;  %3448 = vrot.lane.b32.xlu0 %v10044_v21, %s9889_s13  ;;  %s11279_s18 = smov 123   ;;  %s11280_s13 = smov 122  }
 0x1a9   : > { %3558 = vrot.lane.b32.xlu1 %v10044_v21, %s9890_s23  ;;  %3668 = vrot.lane.b32.xlu0 %v10044_v21, %s9891_s25  ;;  %s11281_s23 = smov 121   ;;  %s11282_s25 = smov 120  }
 0x1ad   : > { %3778 = vrot.lane.b32.xlu1 %v10044_v21, %s9892_s17  ;;  %3888 = vrot.lane.b32.xlu0 %v10044_v21, %s9893_s26  ;;  %s11258_s17 = smov 7   ;;  %s11283_s26 = smov 119  }
 0x1e7   : > { %v602_v22 = vpop.permute.xlu0 %601  ;;  %v809_v25 = vpop.permute.xlu1 %808 }
 0x1e8   : > { %8331 = vmatprep.subr.msk.mxu0 %vm616_vm9, %v602_v22 }
 0x1e9   : > { %8332 = vmatpush3.msk.msra.mxu0 %vm616_vm9, %v602_v22 }
 0x1ea   : > { %8334 = vmatmul.mubr.msk.f32.vlgmr.msra.gmra.mrb[2].mxu0 %vm603_vm6, %v7511_v23  ;;  %8339 = vmatprep.subr.msk.mxu0 %vm616_vm9, %v10044_v21  ;;  %v7608_v23 = vld [vmem:[%s11276_s4 + $0x178] sm:$0xff] }
 0x1eb   : > { %8340 = vmatpush3.msk.msra.mxu0 %vm616_vm9, %v10044_v21  ;;  %8336 = vmatprep.mubr.msk.f32.mxu0 %vm603_vm6, %v7512_v24  ;;  %v919_v30 = vpop.permute.xlu1 %918  ;;  %v1029_v35 = vpop.permute.xlu0 %1028  ;;  %v7607_v21 = vld [vmem:[%s11276_s4 + $0x170] sm:$0xff]  ;;  %v7614_v24 = vld [vmem:[%s11276_s4 + $0x180] sm:$0xff] }
 0x1ec   : > { %8347 = vmatprep.subr.msk.mxu0 %vm616_vm9, %v809_v25 }
 0x1ee   : > { %8337 = vmatmul.mubr.msk.f32.gmra.mrb[4].mxu0 %vm603_vm6, %v7513_v26  ;;  %v7616_v26 = vld [vmem:[%s11276_s4 + $0x190] sm:$0xff] }
 0x1ef   : > { %8341 = vmatprep.mubr.msk.f32.mxu0 %vm603_vm6, %v591_v27  ;;  %v1139_v40 = vpop.permute.xlu1 %1138  ;;  %v1249_v45 = vpop.permute.xlu0 %1248 }
 0x1f2   : > { %8342 = vmatmul.mubr.msk.f32.vlgmr.msra.gmra.mrb[2].mxu0 %vm603_vm6, %v592_v28  ;;  %v7617_v28 = vld [vmem:[%s11276_s4 + $0x198] sm:$0xff] }
 0x1f3   : > { %8348 = vmatpush3.msk.msra.mxu0 %vm616_vm9, %v809_v25  ;;  %8344 = vmatprep.mubr.msk.f32.mxu0 %vm603_vm6, %v593_v29  ;;  %v1359_v50 = vpop.permute.xlu1 %1358  ;;  %v1469_v55 = vpop.permute.xlu0 %1468  ;;  %v7615_v25 = vld [vmem:[%s11276_s4 + $0x188] sm:$0xff]  ;;  %v7623_v29 = vld [vmem:[%s11276_s4 + $0x1a0] sm:$0xff] }
 0x1f4   : > { %8355 = vmatprep.subr.msk.mxu0 %vm616_vm9, %v919_v30 }
 0x1f6   : > { %8345 = vmatmul.mubr.msk.f32.gmra.mrb[4].mxu0 %vm603_vm6, %v594_v31  ;;  %v7625_v31 = vld [vmem:[%s11276_s4 + $0x1b0] sm:$0xff] }
 0x1f7   : > { %8349 = vmatprep.mubr.msk.f32.mxu0 %vm603_vm6, %v7524_v32  ;;  %v1579_v60 = vpop.permute.xlu1 %1578  ;;  %v1689_v3 = vpop.permute.xlu0 %1688 }
 0x1fa   : > { %8350 = vmatmul.mubr.msk.f32.vlgmr.msra.gmra.mrb[2].mxu0 %vm603_vm6, %v7525_v33  ;;  %v7626_v33 = vld [vmem:[%s11276_s4 + $0x1b8] sm:$0xff] }
 0x1fb   : > { %8356 = vmatpush3.msk.msra.mxu0 %vm616_vm9, %v919_v30  ;;  %8352 = vmatprep.mubr.msk.f32.mxu0 %vm603_vm6, %v7526_v34  ;;  %v1799_v10 = vpop.permute.xlu1 %1798  ;;  %v1909_v17 = vpop.permute.xlu0 %1908  ;;  %v7624_v30 = vld [vmem:[%s11276_s4 + $0x1a8] sm:$0xff]  ;;  %v7632_v34 = vld [vmem:[%s11276_s4 + $0x1c0] sm:$0xff] }
 0x1fc   : > { %8363 = vmatprep.subr.msk.mxu0 %vm616_vm9, %v1029_v35 }
 0x1fe   : > { %8353 = vmatmul.mubr.msk.f32.gmra.mrb[4].mxu0 %vm603_vm6, %v7527_v36  ;;  %v7634_v36 = vld [vmem:[%s11276_s4 + $0x1d0] sm:$0xff] }
 0x1ff   : > { %8357 = vmatprep.mubr.msk.f32.mxu0 %vm603_vm6, %v7533_v37  ;;  %v2019_v22 = vpop.permute.xlu1 %2018  ;;  %v2129_v27 = vpop.permute.xlu0 %2128 }
 0x202   : > { %8358 = vmatmul.mubr.msk.f32.vlgmr.msra.gmra.mrb[2].mxu0 %vm603_vm6, %v7534_v38  ;;  %v7635_v38 = vld [vmem:[%s11276_s4 + $0x1d8] sm:$0xff] }
 0x203   : > { %8364 = vmatpush3.msk.msra.mxu0 %vm616_vm9, %v1029_v35  ;;  %8360 = vmatprep.mubr.msk.f32.mxu0 %vm603_vm6, %v7535_v39  ;;  %v2239_v32 = vpop.permute.xlu1 %2238  ;;  %v7633_v35 = vld [vmem:[%s11276_s4 + $0x1c8] sm:$0xff]  ;;  %v2349_v37 = vpop.permute.xlu0 %2348  ;;  %v7641_v39 = vld [vmem:[%s11276_s4 + $0x1e0] sm:$0xff] }
 0x204   : > { %8371 = vmatprep.subr.msk.mxu0 %vm616_vm9, %v1139_v40 }
 0x206   : > { %8361 = vmatmul.mubr.msk.f32.gmra.mrb[4].mxu0 %vm603_vm6, %v7536_v41  ;;  %v7642_v41 = vld [vmem:[%s11276_s4 + $0x1e8] sm:$0xff] }
 0x207   : > { %8365 = vmatprep.mubr.msk.f32.mxu0 %vm603_vm6, %v7542_v42  ;;  %v9894_v42 = vmov 0  }
 0x208   : > { %9451 = vset.pattern.permute.xlu1 %v9894_v42  ;;  %9452 = vset.pattern.permute.xlu0 %v9894_v42  ;;  %v7741_v42 = vld [vmem:[%s11276_s4 + $0x348] sm:$0xff] }
 0x20a   : > { %8366 = vmatmul.mubr.msk.f32.vlgmr.msra.gmra.mrb[2].mxu0 %vm603_vm6, %v7543_v43  ;;  %v3994_v43 = vld [vmem:[%s11277_s5 + $0x8] sm:$0xff] }
 0x20b   : > { %8372 = vmatpush3.msk.msra.mxu0 %vm616_vm9, %v1139_v40  ;;  %8368 = vmatprep.mubr.msk.f32.mxu0 %vm603_vm6, %v7544_v44  ;;  %v3993_v40 = vld [vmem:[%s11277_s5] sm:$0xff]  ;;  %v7643_v44 = vld [vmem:[%s11276_s4 + $0x1f0] sm:$0xff] }
 0x20c   : > { %8379 = vmatprep.subr.msk.mxu0 %vm616_vm9, %v1249_v45  ;;  %3999 = vperm.xlu1 %9451, %v3993_v40   ;;  %v7734_v40 = vld [vmem:[%s11276_s4 + $0x338] sm:$0xff] }
 0x20d   : > { %4004 = vperm.xlu0 %9452, %v3994_v43   ;;  %v7742_v43 = vld [vmem:[%s11276_s4 + $0x350] sm:$0xff] }
 0x20e   : > { %8369 = vmatmul.mubr.msk.f32.gmra.mrb[4].mxu0 %vm603_vm6, %v7545_v46  ;;  %v2459_v46 = vpop.permute.xlu1 %2458 }
 0x20f   : > { %8373 = vmatprep.mubr.msk.f32.mxu0 %vm603_vm6, %v7551_v47  ;;  %v7644_v47 = vld [vmem:[%s11276_s4 + $0x1f8] sm:$0xff] }
 0x212   : > { %8374 = vmatmul.mubr.msk.f32.vlgmr.msra.gmra.mrb[2].mxu0 %vm603_vm6, %v7552_v48  ;;  %v7650_v48 = vld [vmem:[%s11276_s4 + $0x200] sm:$0xff] }
 0x213   : > { %8380 = vmatpush3.msk.msra.mxu0 %vm616_vm9, %v1249_v45  ;;  %8376 = vmatprep.mubr.msk.f32.mxu0 %vm603_vm6, %v7553_v49  ;;  %v3995_v45 = vld [vmem:[%s11277_s5 + $0x10] sm:$0xff]  ;;  %v3996_v49 = vld [vmem:[%s11277_s5 + $0x18] sm:$0xff]  ;;  %s9896_s5 = smov 1  }
 0x214   : > { %8387 = vmatprep.subr.msk.mxu0 %vm616_vm9, %v1359_v50  ;;  %4009 = vperm.xlu1 %9451, %v3995_v45   ;;  %v7743_v45 = vld [vmem:[%s11276_s4 + $0x358] sm:$0xff] }
 0x216   : > { %8377 = vmatmul.mubr.msk.f32.gmra.mrb[4].mxu0 %vm603_vm6, %v7554_v51  ;;  %v7652_v51 = vld [vmem:[%s11276_s4 + $0x210] sm:$0xff] }
 0x217   : > { %8381 = vmatprep.mubr.msk.f32.mxu0 %vm603_vm6, %v7560_v52  ;;  %v2569_v52 = vpop.permute.xlu0 %2568 }
 0x218   : > { %4014 = vperm.xlu1 %9451, %v3996_v49  }
 0x21a   : > { %8382 = vmatmul.mubr.msk.f32.vlgmr.msra.gmra.mrb[2].mxu0 %vm603_vm6, %v7561_v53  ;;  %v7653_v53 = vld [vmem:[%s11276_s4 + $0x218] sm:$0xff] }
 0x21b   : > { %8388 = vmatpush3.msk.msra.mxu0 %vm616_vm9, %v1359_v50  ;;  %8384 = vmatprep.mubr.msk.f32.mxu0 %vm603_vm6, %v7562_v54  ;;  %v7651_v50 = vld [vmem:[%s11276_s4 + $0x208] sm:$0xff]  ;;  %v7659_v54 = vld [vmem:[%s11276_s4 + $0x220] sm:$0xff] }
 0x21c   : > { %8395 = vmatprep.subr.msk.mxu0 %vm616_vm9, %v1469_v55 }
 0x21e   : > { %8385 = vmatmul.mubr.msk.f32.gmra.mrb[4].mxu0 %vm603_vm6, %v7563_v56  ;;  %v7661_v56 = vld [vmem:[%s11276_s4 + $0x230] sm:$0xff] }
 0x21f   : > { %8389 = vmatprep.mubr.msk.f32.mxu0 %vm603_vm6, %v7569_v57  ;;  %v2679_v57 = vpop.permute.xlu1 %2678 }
 0x222   : > { %8390 = vmatmul.mubr.msk.f32.vlgmr.msra.gmra.mrb[2].mxu0 %vm603_vm6, %v7570_v58  ;;  %v7662_v58 = vld [vmem:[%s11276_s4 + $0x238] sm:$0xff] }
 0x223   : > { %8396 = vmatpush3.msk.msra.mxu0 %vm616_vm9, %v1469_v55  ;;  %8392 = vmatprep.mubr.msk.f32.mxu0 %vm603_vm6, %v7571_v59  ;;  %v7660_v55 = vld [vmem:[%s11276_s4 + $0x228] sm:$0xff]  ;;  %v7668_v59 = vld [vmem:[%s11276_s4 + $0x240] sm:$0xff] }
 0x224   : > { %8403 = vmatprep.subr.msk.mxu0 %vm616_vm9, %v1579_v60 }
 0x226   : > { %8393 = vmatmul.mubr.msk.f32.gmra.mrb[4].mxu0 %vm603_vm6, %v7572_v61  ;;  %v7670_v61 = vld [vmem:[%s11276_s4 + $0x250] sm:$0xff] }
 0x227   : > { %8397 = vmatprep.mubr.msk.f32.mxu0 %vm603_vm6, %v7578_v62  ;;  %v2789_v62 = vpop.permute.xlu0 %2788 }
 0x22a   : > { %8398 = vmatmul.mubr.msk.f32.vlgmr.msra.gmra.mrb[2].mxu0 %vm603_vm6, %v7579_v63  ;;  %v7671_v63 = vld [vmem:[%s11276_s4 + $0x258] sm:$0xff] }
 0x22b   : > { %8404 = vmatpush3.msk.msra.mxu0 %vm616_vm9, %v1579_v60  ;;  %8400 = vmatprep.mubr.msk.f32.mxu0 %vm603_vm6, %v7580_v0  ;;  %v7669_v60 = vld [vmem:[%s11276_s4 + $0x248] sm:$0xff]  ;;  %v7677_v0 = vld [vmem:[%s11276_s4 + $0x260] sm:$0xff] }
 0x22c   : > { %8411 = vmatprep.subr.msk.mxu0 %vm616_vm9, %v1689_v3 }
 0x22e   : > { %8401 = vmatmul.mubr.msk.f32.gmra.mrb[4].mxu0 %vm603_vm6, %v7581_v4  ;;  %v7679_v4 = vld [vmem:[%s11276_s4 + $0x270] sm:$0xff] }
 0x22f   : > { %8405 = vmatprep.mubr.msk.f32.mxu0 %vm603_vm6, %v7587_v5  ;;  %v2899_v5 = vpop.permute.xlu1 %2898 }
 0x232   : > { %8406 = vmatmul.mubr.msk.f32.vlgmr.msra.gmra.mrb[2].mxu0 %vm603_vm6, %v7588_v6  ;;  %v7680_v6 = vld [vmem:[%s11276_s4 + $0x278] sm:$0xff] }
 0x233   : > { %8412 = vmatpush3.msk.msra.mxu0 %vm616_vm9, %v1689_v3  ;;  %8408 = vmatprep.mubr.msk.f32.mxu0 %vm603_vm6, %v7589_v7  ;;  %v7678_v3 = vld [vmem:[%s11276_s4 + $0x268] sm:$0xff]  ;;  %v7686_v7 = vld [vmem:[%s11276_s4 + $0x280] sm:$0xff] }
 0x234   : > { %8419 = vmatprep.subr.msk.mxu0 %vm616_vm9, %v1799_v10 }
 0x236   : > { %8409 = vmatmul.mubr.msk.f32.gmra.mrb[4].mxu0 %vm603_vm6, %v7590_v11  ;;  %v7688_v11 = vld [vmem:[%s11276_s4 + $0x290] sm:$0xff] }
 0x237   : > { %8413 = vmatprep.mubr.msk.f32.mxu0 %vm603_vm6, %v7596_v12  ;;  %v3009_v12 = vpop.permute.xlu0 %3008 }
 0x23a   : > { %8414 = vmatmul.mubr.msk.f32.vlgmr.msra.gmra.mrb[2].mxu0 %vm603_vm6, %v7597_v13  ;;  %v7689_v13 = vld [vmem:[%s11276_s4 + $0x298] sm:$0xff] }
 0x23b   : > { %8420 = vmatpush3.msk.msra.mxu0 %vm616_vm9, %v1799_v10  ;;  %8416 = vmatprep.mubr.msk.f32.mxu0 %vm603_vm6, %v7598_v15  ;;  %v7687_v10 = vld [vmem:[%s11276_s4 + $0x288] sm:$0xff]  ;;  %v7695_v15 = vld [vmem:[%s11276_s4 + $0x2a0] sm:$0xff] }
 0x23c   : > { %8427 = vmatprep.subr.msk.mxu0 %vm616_vm9, %v1909_v17 }
 0x23e   : > { %8417 = vmatmul.mubr.msk.f32.gmra.mrb[4].mxu0 %vm603_vm6, %v7599_v18  ;;  %v7697_v18 = vld [vmem:[%s11276_s4 + $0x2b0] sm:$0xff] }
 0x23f   : > { %8421 = vmatprep.mubr.msk.f32.mxu0 %vm603_vm6, %v7605_v19  ;;  %v3119_v19 = vpop.permute.xlu1 %3118 }
 0x242   : > { %8422 = vmatmul.mubr.msk.f32.vlgmr.msra.gmra.mrb[2].mxu0 %vm603_vm6, %v7606_v20  ;;  %v7698_v20 = vld [vmem:[%s11276_s4 + $0x2b8] sm:$0xff] }
 0x243   : > { %8428 = vmatpush3.msk.msra.mxu0 %vm616_vm9, %v1909_v17  ;;  %8424 = vmatprep.mubr.msk.f32.mxu0 %vm603_vm6, %v7607_v21  ;;  %v7696_v17 = vld [vmem:[%s11276_s4 + $0x2a8] sm:$0xff]  ;;  %v7704_v21 = vld [vmem:[%s11276_s4 + $0x2c0] sm:$0xff] }
 0x244   : > { %8435 = vmatprep.subr.msk.mxu0 %vm616_vm9, %v2019_v22 }
 0x246   : > { %8425 = vmatmul.mubr.msk.f32.gmra.mrb[4].mxu0 %vm603_vm6, %v7608_v23  ;;  %v7706_v23 = vld [vmem:[%s11276_s4 + $0x2d0] sm:$0xff] }
 0x247   : > { %8429 = vmatprep.mubr.msk.f32.mxu0 %vm603_vm6, %v7614_v24  ;;  %v3229_v24 = vpop.permute.xlu0 %3228 }
 0x24a   : > { %8430 = vmatmul.mubr.msk.f32.vlgmr.msra.gmra.mrb[2].mxu0 %vm603_vm6, %v7615_v25  ;;  %v7707_v25 = vld [vmem:[%s11276_s4 + $0x2d8] sm:$0xff] }
 0x24b   : > { %8436 = vmatpush3.msk.msra.mxu0 %vm616_vm9, %v2019_v22  ;;  %8432 = vmatprep.mubr.msk.f32.mxu0 %vm603_vm6, %v7616_v26  ;;  %v7705_v22 = vld [vmem:[%s11276_s4 + $0x2c8] sm:$0xff]  ;;  %v7713_v26 = vld [vmem:[%s11276_s4 + $0x2e0] sm:$0xff] }
 0x24c   : > { %8443 = vmatprep.subr.msk.mxu0 %vm616_vm9, %v2129_v27 }
 0x24e   : > { %8433 = vmatmul.mubr.msk.f32.gmra.mrb[4].mxu0 %vm603_vm6, %v7617_v28  ;;  %v7715_v28 = vld [vmem:[%s11276_s4 + $0x2f0] sm:$0xff] }
 0x24f   : > { %8437 = vmatprep.mubr.msk.f32.mxu0 %vm603_vm6, %v7623_v29  ;;  %v3339_v29 = vpop.permute.xlu1 %3338 }
 0x252   : > { %8438 = vmatmul.mubr.msk.f32.vlgmr.msra.gmra.mrb[2].mxu0 %vm603_vm6, %v7624_v30  ;;  %v7716_v30 = vld [vmem:[%s11276_s4 + $0x2f8] sm:$0xff] }
 0x253   : > { %8444 = vmatpush3.msk.msra.mxu0 %vm616_vm9, %v2129_v27  ;;  %8440 = vmatprep.mubr.msk.f32.mxu0 %vm603_vm6, %v7625_v31  ;;  %v7714_v27 = vld [vmem:[%s11276_s4 + $0x2e8] sm:$0xff]  ;;  %v7722_v31 = vld [vmem:[%s11276_s4 + $0x300] sm:$0xff] }
 0x254   : > { %8451 = vmatprep.subr.msk.mxu0 %vm616_vm9, %v2239_v32 }
 0x256   : > { %8441 = vmatmul.mubr.msk.f32.gmra.mrb[4].mxu0 %vm603_vm6, %v7626_v33  ;;  %v7724_v33 = vld [vmem:[%s11276_s4 + $0x310] sm:$0xff] }
 0x257   : > { %8445 = vmatprep.mubr.msk.f32.mxu0 %vm603_vm6, %v7632_v34  ;;  %v3449_v34 = vpop.permute.xlu0 %3448 }
 0x25a   : > { %8446 = vmatmul.mubr.msk.f32.vlgmr.msra.gmra.mrb[2].mxu0 %vm603_vm6, %v7633_v35  ;;  %v7725_v35 = vld [vmem:[%s11276_s4 + $0x318] sm:$0xff] }
 0x25b   : > { %8452 = vmatpush3.msk.msra.mxu0 %vm616_vm9, %v2239_v32  ;;  %8448 = vmatprep.mubr.msk.f32.mxu0 %vm603_vm6, %v7634_v36  ;;  %v7723_v32 = vld [vmem:[%s11276_s4 + $0x308] sm:$0xff]  ;;  %v7731_v36 = vld [vmem:[%s11276_s4 + $0x320] sm:$0xff] }
 0x25c   : > { %8459 = vmatprep.subr.msk.mxu0 %vm616_vm9, %v2349_v37 }
 0x25e   : > { %8449 = vmatmul.mubr.msk.f32.gmra.mrb[4].mxu0 %vm603_vm6, %v7635_v38  ;;  %v7733_v38 = vld [vmem:[%s11276_s4 + $0x330] sm:$0xff] }
 0x25f   : > { %8453 = vmatprep.mubr.msk.f32.mxu0 %vm603_vm6, %v7641_v39  ;;  %v3559_v39 = vpop.permute.xlu1 %3558 }
 0x262   : > { %8454 = vmatmul.mubr.msk.f32.vlgmr.msra.gmra.mrb[2].mxu0 %vm603_vm6, %v7642_v41  ;;  %v7740_v41 = vld [vmem:[%s11276_s4 + $0x340] sm:$0xff] }
 0x263   : > { %8460 = vmatpush3.msk.msra.mxu0 %vm616_vm9, %v2349_v37  ;;  %8456 = vmatprep.mubr.msk.f32.mxu0 %vm603_vm6, %v7643_v44  ;;  %v7732_v37 = vld [vmem:[%s11276_s4 + $0x328] sm:$0xff]  ;;  %v3669_v44 = vpop.permute.xlu0 %3668  ;;  %v3779_v49 = vpop.permute.xlu1 %3778 }
 0x264   : > { %8467 = vmatprep.subr.msk.mxu0 %vm616_vm9, %v2459_v46 }
 0x266   : > { %8457 = vmatmul.mubr.msk.f32.gmra.mrb[4].mxu0 %vm603_vm6, %v7644_v47  ;;  %v7750_v47 = vld [vmem:[%s11276_s4 + $0x368] sm:$0xff] }
 0x267   : > { %8461 = vmatprep.mubr.msk.f32.mxu0 %vm603_vm6, %v7650_v48  ;;  %v7751_v48 = vld [vmem:[%s11276_s4 + $0x370] sm:$0xff] }
 0x26a   : > { %8462 = vmatmul.mubr.msk.f32.vlgmr.msra.gmra.mrb[2].mxu0 %vm603_vm6, %v7651_v50  ;;  %v7752_v50 = vld [vmem:[%s11276_s4 + $0x378] sm:$0xff] }
 0x26b   : > { %8468 = vmatpush3.msk.msra.mxu0 %vm616_vm9, %v2459_v46  ;;  %8464 = vmatprep.mubr.msk.f32.mxu0 %vm603_vm6, %v7652_v51  ;;  %v7749_v46 = vld [vmem:[%s11276_s4 + $0x360] sm:$0xff] }
 0x26c   : > { %8475 = vmatprep.subr.msk.mxu0 %vm616_vm9, %v2569_v52  ;;  %v7758_v51 = vld [vmem:[%s11276_s4 + $0x380] sm:$0xff] }
 0x26e   : > { %8465 = vmatmul.mubr.msk.f32.gmra.mrb[4].mxu0 %vm603_vm6, %v7653_v53  ;;  %v7760_v53 = vld [vmem:[%s11276_s4 + $0x390] sm:$0xff] }
 0x26f   : > { %8469 = vmatprep.mubr.msk.f32.mxu0 %vm603_vm6, %v7659_v54  ;;  %v3889_v54 = vpop.permute.xlu0 %3888 }
 0x272   : > { %8470 = vmatmul.mubr.msk.f32.vlgmr.msra.gmra.mrb[2].mxu0 %vm603_vm6, %v7660_v55  ;;  %v7761_v55 = vld [vmem:[%s11276_s4 + $0x398] sm:$0xff] }
 0x273   : > { %8476 = vmatpush3.msk.msra.mxu0 %vm616_vm9, %v2569_v52  ;;  %8472 = vmatprep.mubr.msk.f32.mxu0 %vm603_vm6, %v7661_v56  ;;  %v7759_v52 = vld [vmem:[%s11276_s4 + $0x388] sm:$0xff]  ;;  %v7767_v56 = vld [vmem:[%s11276_s4 + $0x3a0] sm:$0xff] }
 0x274   : > { %8483 = vmatprep.subr.msk.mxu0 %vm616_vm9, %v2679_v57 }
 0x276   : > { %8473 = vmatmul.mubr.msk.f32.gmra.mrb[4].mxu0 %vm603_vm6, %v7662_v58  ;;  %v7769_v58 = vld [vmem:[%s11276_s4 + $0x3b0] sm:$0xff] }
 0x277   : > { %8477 = vmatprep.mubr.msk.f32.mxu0 %vm603_vm6, %v7668_v59  ;;  %v7770_v59 = vld [vmem:[%s11276_s4 + $0x3b8] sm:$0xff] }
 0x27a   : > { %8478 = vmatmul.mubr.msk.f32.vlgmr.msra.gmra.mrb[2].mxu0 %vm603_vm6, %v7669_v60  ;;  %v7776_v60 = vld [vmem:[%s11276_s4 + $0x3c0] sm:$0xff] }
 0x27b   : > { %8484 = vmatpush3.msk.msra.mxu0 %vm616_vm9, %v2679_v57  ;;  %8480 = vmatprep.mubr.msk.f32.mxu0 %vm603_vm6, %v7670_v61  ;;  %v7768_v57 = vld [vmem:[%s11276_s4 + $0x3a8] sm:$0xff] }
 0x27c   : > { %8491 = vmatprep.subr.msk.mxu0 %vm616_vm9, %v2789_v62  ;;  %v7777_v61 = vld [vmem:[%s11276_s4 + $0x3c8] sm:$0xff] }
 0x27e   : > { %8481 = vmatmul.mubr.msk.f32.gmra.mrb[4].mxu0 %vm603_vm6, %v7671_v63  ;;  %v7779_v63 = vld [vmem:[%s11276_s4 + $0x3d8] sm:$0xff] }
 0x27f   : > { %8485 = vmatprep.mubr.msk.f32.mxu0 %vm603_vm6, %v7677_v0 }
 0x282   : > { %8486 = vmatmul.mubr.msk.f32.vlgmr.msra.gmra.mrb[2].mxu0 %vm603_vm6, %v7678_v3 }
 0x283   : > { %8492 = vmatpush3.msk.msra.mxu0 %vm616_vm9, %v2789_v62  ;;  %8488 = vmatprep.mubr.msk.f32.mxu0 %vm603_vm6, %v7679_v4  ;;  %v7778_v62 = vld [vmem:[%s11276_s4 + $0x3d0] sm:$0xff] }
 0x284   : > { %8499 = vmatprep.subr.msk.mxu0 %vm616_vm9, %v2899_v5 }
 0x286   : > { %8489 = vmatmul.mubr.msk.f32.gmra.mrb[4].mxu0 %vm603_vm6, %v7680_v6 }
 0x287   : > { %8493 = vmatprep.mubr.msk.f32.mxu0 %vm603_vm6, %v7686_v7 }
 0x28a   : > { %8494 = vmatmul.mubr.msk.f32.vlgmr.msra.gmra.mrb[2].mxu0 %vm603_vm6, %v7687_v10 }
 0x28b   : > { %8500 = vmatpush3.msk.msra.mxu0 %vm616_vm9, %v2899_v5  ;;  %8496 = vmatprep.mubr.msk.f32.mxu0 %vm603_vm6, %v7688_v11  ;;  %v4000_v0 = vpop.permute.xlu1 %3999 }
 0x28c   : > { %8507 = vmatprep.subr.msk.mxu0 %vm616_vm9, %v3009_v12  ;;  %v4005_v4 = vpop.permute.xlu0 %4004 }
 0x28e   : > { %8497 = vmatmul.mubr.msk.f32.gmra.mrb[4].mxu0 %vm603_vm6, %v7689_v13 }
 0x28f   : > { %8501 = vmatprep.mubr.msk.f32.mxu0 %vm603_vm6, %v7695_v15 }
 0x292   : > { %8502 = vmatmul.mubr.msk.f32.vlgmr.msra.gmra.mrb[2].mxu0 %vm603_vm6, %v7696_v17 }
 0x293   : > { %8508 = vmatpush3.msk.msra.mxu0 %vm616_vm9, %v3009_v12  ;;  %8504 = vmatprep.mubr.msk.f32.mxu0 %vm603_vm6, %v7697_v18  ;;  %v4010_v3 = vpop.permute.xlu1 %4009 }
 0x294   : > { %8515 = vmatprep.subr.msk.mxu0 %vm616_vm9, %v3119_v19 }
 0x296   : > { %8505 = vmatmul.mubr.msk.f32.gmra.mrb[4].mxu0 %vm603_vm6, %v7698_v20 }
 0x297   : > { %8509 = vmatprep.mubr.msk.f32.mxu0 %vm603_vm6, %v7704_v21  ;;  %v4015_v12 = vpop.permute.xlu1 %4014 }
 0x29a   : > { %8510 = vmatmul.mubr.msk.f32.vlgmr.msra.gmra.mrb[2].mxu0 %vm603_vm6, %v7705_v22 }
 0x29b   : > { %8516 = vmatpush3.msk.msra.mxu0 %vm616_vm9, %v3119_v19  ;;  %8512 = vmatprep.mubr.msk.f32.mxu0 %vm603_vm6, %v7706_v23 }
 0x29c   : > { %8523 = vmatprep.subr.msk.mxu0 %vm616_vm9, %v3229_v24 }
 0x29e   : > { %8513 = vmatmul.mubr.msk.f32.gmra.mrb[4].mxu0 %vm603_vm6, %v7707_v25 }
 0x29f   : > { %8517 = vmatprep.mubr.msk.f32.mxu0 %vm603_vm6, %v7713_v26 }
 0x2a2   : > { %8518 = vmatmul.mubr.msk.f32.vlgmr.msra.gmra.mrb[2].mxu0 %vm603_vm6, %v7714_v27 }
 0x2a3   : > { %8524 = vmatpush3.msk.msra.mxu0 %vm616_vm9, %v3229_v24  ;;  %8520 = vmatprep.mubr.msk.f32.mxu0 %vm603_vm6, %v7715_v28 }
 0x2a4   : > { %8531 = vmatprep.subr.msk.mxu0 %vm616_vm9, %v3339_v29 }
 0x2a6   : > { %8521 = vmatmul.mubr.msk.f32.gmra.mrb[4].mxu0 %vm603_vm6, %v7716_v30 }
 0x2a7   : > { %8525 = vmatprep.mubr.msk.f32.mxu0 %vm603_vm6, %v7722_v31 }
 0x2aa   : > { %8526 = vmatmul.mubr.msk.f32.vlgmr.msra.gmra.mrb[2].mxu0 %vm603_vm6, %v7723_v32 }
 0x2ab   : > { %8532 = vmatpush3.msk.msra.mxu0 %vm616_vm9, %v3339_v29  ;;  %8528 = vmatprep.mubr.msk.f32.mxu0 %vm603_vm6, %v7724_v33 }
 0x2ac   : > { %8539 = vmatprep.subr.msk.mxu0 %vm616_vm9, %v3449_v34 }
 0x2ae   : > { %8529 = vmatmul.mubr.msk.f32.gmra.mrb[4].mxu0 %vm603_vm6, %v7725_v35 }
 0x2af   : > { %8533 = vmatprep.mubr.msk.f32.mxu0 %vm603_vm6, %v7731_v36 }
 0x2b2   : > { %8534 = vmatmul.mubr.msk.f32.vlgmr.msra.gmra.mrb[2].mxu0 %vm603_vm6, %v7732_v37 }
 0x2b3   : > { %8540 = vmatpush3.msk.msra.mxu0 %vm616_vm9, %v3449_v34  ;;  %8536 = vmatprep.mubr.msk.f32.mxu0 %vm603_vm6, %v7733_v38 }
 0x2b4   : > { %8547 = vmatprep.subr.msk.mxu0 %vm616_vm9, %v3559_v39 }
 0x2b6   : > { %8537 = vmatmul.mubr.msk.f32.gmra.mrb[4].mxu0 %vm603_vm6, %v7734_v40 }
 0x2b7   : > { %8541 = vmatprep.mubr.msk.f32.mxu0 %vm603_vm6, %v7740_v41 }
 0x2ba   : > { %8542 = vmatmul.mubr.msk.f32.vlgmr.msra.gmra.mrb[2].mxu0 %vm603_vm6, %v7741_v42 }
 0x2bb   : > { %8548 = vmatpush3.msk.msra.mxu0 %vm616_vm9, %v3559_v39  ;;  %8544 = vmatprep.mubr.msk.f32.mxu0 %vm603_vm6, %v7742_v43 }
 0x2bc   : > { %8555 = vmatprep.subr.msk.mxu0 %vm616_vm9, %v3669_v44 }
 0x2be   : > { %8545 = vmatmul.mubr.msk.f32.gmra.mrb[4].mxu0 %vm603_vm6, %v7743_v45 }
 0x2bf   : > { %8549 = vmatprep.mubr.msk.f32.mxu0 %vm603_vm6, %v7749_v46 }
 0x2c2   : > { %8550 = vmatmul.mubr.msk.f32.vlgmr.msra.gmra.mrb[2].mxu0 %vm603_vm6, %v7750_v47 }
 0x2c3   : > { %8556 = vmatpush3.msk.msra.mxu0 %vm616_vm9, %v3669_v44  ;;  %8552 = vmatprep.mubr.msk.f32.mxu0 %vm603_vm6, %v7751_v48 }
 0x2c4   : > { %8563 = vmatprep.subr.msk.mxu0 %vm616_vm9, %v3779_v49 }
 0x2c6   : > { %8553 = vmatmul.mubr.msk.f32.gmra.mrb[4].mxu0 %vm603_vm6, %v7752_v50 }
 0x2c7   : > { %8557 = vmatprep.mubr.msk.f32.mxu0 %vm603_vm6, %v7758_v51 }
 0x2ca   : > { %8558 = vmatmul.mubr.msk.f32.vlgmr.msra.gmra.mrb[2].mxu0 %vm603_vm6, %v7759_v52 }
 0x2cb   : > { %8564 = vmatpush3.msk.msra.mxu0 %vm616_vm9, %v3779_v49  ;;  %8560 = vmatprep.mubr.msk.f32.mxu0 %vm603_vm6, %v7760_v53  ;;  %v7789_v49 = vld [vmem:[%s11224_s6 + $0x20] sm:$0xff] }
 0x2cc   : > { %8571 = vmatprep.subr.msk.mxu0 %vm616_vm9, %v3889_v54  ;;  %8587 = vmatprep.mubr.msk.f32.mxu1 %vm4100_vm12, %v7789_v49 }
 0x2ce   : > { %8561 = vmatmul.mubr.msk.f32.gmra.mrb[4].mxu0 %vm603_vm6, %v7761_v55 }
 0x2cf   : > { %8565 = vmatprep.mubr.msk.f32.mxu0 %vm603_vm6, %v7767_v56 }
 0x2d2   : > { %8566 = vmatmul.mubr.msk.f32.vlgmr.msra.gmra.mrb[2].mxu0 %vm603_vm6, %v7768_v57 }
 0x2d3   : > { %8572 = vmatpush3.msk.msra.mxu0 %vm616_vm9, %v3889_v54  ;;  %8568 = vmatprep.mubr.msk.f32.mxu0 %vm603_vm6, %v7769_v58 }
 0x2d6   : > { %8569 = vmatmul.mubr.msk.f32.gmra.mrb[4].mxu0 %vm603_vm6, %v7770_v59  ;;  %v5829_v59 = vld [vmem:[%s11225_s7] sm:$0xff] }
 0x2d7   : > { %8573 = vmatprep.mubr.msk.f32.mxu0 %vm603_vm6, %v7776_v60  ;;  %v5831_v60 = vld [vmem:[%s11225_s7 + $0x10] sm:$0xff] }
 0x2da   : > { %8574 = vmatmul.mubr.msk.f32.vlgmr.msra.gmra.mrb[2].mxu0 %vm603_vm6, %v7777_v61  ;;  %v5830_v61 = vld [vmem:[%s11225_s7 + $0x8] sm:$0xff] }
 0x2db   : > { %8576 = vmatprep.mubr.msk.f32.mxu0 %vm603_vm6, %v7778_v62  ;;  %v5832_v62 = vld [vmem:[%s11225_s7 + $0x18] sm:$0xff] }
 0x2de   : > { %8577 = vmatmul.mubr.msk.f32.gmra.mrb[4].mxu0 %vm603_vm6, %v7779_v63 }
 0x3ad   : > { %v8575_v5 = vpop.f32.mrb[2].mxu0 }
 0x3ae   : > { %v4018_v6 = vadd.f32 %v8575_v5, %v4005_v4  ;;  %v3970_v7 = vpop.f32.mrb[3].mxu0 }
 0x3af   : > { %v4017_v10 = vadd.f32 %v4000_v0, %v3970_v7 }
 0x3b0   : > { %v7786_v11 = vmul.f32 -1.442695, %v4018_v6 }
 0x3b1   : > { %v7785_v13 = vmul.f32 -1.442695, %v4017_v10  ;;  %v8578_v15 = vpop.f32.mrb[4].mxu0 }
 0x3b2   : > { %9753 = vpow2.f32 %v7786_v11  ;;  %v4020_v17 = vadd.f32 %v8578_v15, %v4015_v12  ;;  %v3980_v18 = vpop.f32.mrb[5].mxu0  ;;  %v7791_v15 = vld [vmem:[%s11224_s6 + $0x30] sm:$0xff] }
 0x3b3   : > { %9755 = vpow2.f32 %v7785_v13  ;;  %v4019_v19 = vadd.f32 %v4010_v3, %v3980_v18  ;;  %v7790_v13 = vld [vmem:[%s11224_s6 + $0x28] sm:$0xff] }
 0x3b4   : > { %v7788_v20 = vmul.f32 -1.442695, %v4020_v17 }
 0x3b5   : > { %v7787_v21 = vmul.f32 -1.442695, %v4019_v19 }
 0x3b6   : > { %9757 = vpow2.f32 %v7788_v20  ;;  %v7792_v20 = vld [vmem:[%s11224_s6 + $0x38] sm:$0xff] }
 0x3b7   : > { %9759 = vpow2.f32 %v7787_v21  ;;  %v4075_v21 = vld [vmem:[%s11224_s6] sm:$0xff] }
 0x3bc   : > { %v9754_v22 = vpop.eup %9753 }
 0x3bd   : > { %v9756_v23 = vpop.eup %9755  ;;  %v4034_v24 = vadd.f32 1.0, %v9754_v22 }
 0x3be   : > { %v4033_v25 = vadd.f32 1.0, %v9756_v23 }
 0x3bf   : > { %9761 = vrcp.f32 %v4034_v24 }
 0x3c0   : > { %v9758_v26 = vpop.eup %9757  ;;  %9763 = vrcp.f32 %v4033_v25 }
 0x3c1   : > { %v9760_v27 = vpop.eup %9759  ;;  %v4036_v28 = vadd.f32 1.0, %v9758_v26  ;;  %v4076_v26 = vld [vmem:[%s11224_s6 + $0x8] sm:$0xff] }
 0x3c2   : > { %v4035_v29 = vadd.f32 1.0, %v9760_v27  ;;  %v4077_v27 = vld [vmem:[%s11224_s6 + $0x10] sm:$0xff] }
 0x3c3   : > { %9765 = vrcp.f32 %v4036_v28 }
 0x3c4   : > { %9767 = vrcp.f32 %v4035_v29 }
 0x3c9   : > { %v9762_v30 = vpop.eup %9761 }
 0x3ca   : > { %v9764_v31 = vpop.eup %9763  ;;  %v4046_v32 = vmul.f32 %v9762_v30, %v4018_v6 }
 0x3cb   : > { %v4045_v33 = vmul.f32 %v9764_v31, %v4017_v10 }
 0x3cd   : > { %v9766_v34 = vpop.eup %9765  ;;  %v9453_v35 = vpack.i.bf16 %v4046_v32, %v4045_v33  ;;  %v4078_v32 = vld [vmem:[%s11224_s6 + $0x18] sm:$0xff]  ;;  %v7805_v33 = vld [vmem:[%s11224_s6 + $0x40] sm:$0xff] }
 0x3ce   : > { %v9768_v36 = vpop.eup %9767  ;;  %v4048_v37 = vmul.f32 %v9766_v34, %v4020_v17 }
 0x3cf   : > { %v4047_v38 = vmul.f32 %v9768_v36, %v4019_v19  ;;  %9454 = vrot.lane.b32.xlu0 %v9453_v35, %s11258_s17 }
 0x3d1   : > { %v9458_v39 = vpack.i.bf16 %v4048_v37, %v4047_v38  ;;  %v7806_v38 = vld [vmem:[%s11224_s6 + $0x48] sm:$0xff] }
 0x3d3   : > { %9459 = vrot.lane.b32.xlu1 %v9458_v39, %s11258_s17  ;;  %s11288_s17 = smov 114   ;;  %v7807_v39 = vld [vmem:[%s11224_s6 + $0x50] sm:$0xff] }
 0x441   : > { %v9455_v40 = vpop.permute.xlu0 %9454 }
 0x442   : > { %v9457_v41 = vunpack.i.h.bf16 %v9455_v40  ;;  %v9456_v42 = vunpack.i.l.bf16 %v9455_v40 }
 0x444   : > { %v4067_v43 = vsel %vm4065_vm10, 0.0, %v9457_v41  ;;  %v4066_v44 = vsel %vm4065_vm10, 0.0, %v9456_v42 }
 0x445   : > { %v4072_v45 = vsel %vm4070_vm11, %v4067_v43, 0.0  ;;  %v4071_v46 = vsel %vm4070_vm11, %v4066_v44, 0.0  ;;  %v10668_v47 = vpack.c.bf16 %v4067_v43, %v4066_v44  ;;  %v9460_v48 = vpop.permute.xlu1 %9459  ;;  %v7808_v44 = vld [vmem:[%s11224_s6 + $0x58] sm:$0xff] }
 0x446   : > { %v9462_v50 = vunpack.i.h.bf16 %v9460_v48  ;;  %v9461_v51 = vunpack.i.l.bf16 %v9460_v48  ;;  %v9463_v52 = vpack.i.bf16 %v4072_v45, %v4071_v46  ;;  %v7813_v45 = vld [vmem:[%s11224_s6 + $0x60] sm:$0xff] }
 0x448   : > { %v4069_v53 = vsel %vm4065_vm10, 0.0, %v9462_v50  ;;  %v4068_v54 = vsel %vm4065_vm10, 0.0, %v9461_v51  ;;  %9464 = vrot.lane.b32.xlu0 %v9463_v52, %s11256_s15  ;;  %v7814_v50 = vld [vmem:[%s11224_s6 + $0x68] sm:$0xff]  ;;  %v7815_v51 = vld [vmem:[%s11224_s6 + $0x70] sm:$0xff] }
 0x449   : > { %v4074_v55 = vsel %vm4070_vm11, %v4069_v53, 0.0  ;;  %v4073_v56 = vsel %vm4070_vm11, %v4068_v54, 0.0  ;;  %v10679_v57 = vpack.c.bf16 %v4069_v53, %v4068_v54 }
 0x44a   : > { %v9468_v58 = vpack.i.bf16 %v4074_v55, %v4073_v56  ;;  %v7816_v56 = vld [vmem:[%s11224_s6 + $0x78] sm:$0xff] }
 0x44c   : > { %9474 = vrot.lane.b32.xlu0 %v9463_v52, %s11254_s14  ;;  %9469 = vrot.lane.b32.xlu1 %v9468_v58, %s11256_s15  ;;  %s11287_s15 = smov 115  }
 0x450   : > { %9484 = vrot.lane.b32.xlu0 %v9463_v52, %s11252_s16  ;;  %9479 = vrot.lane.b32.xlu1 %v9468_v58, %s11254_s14  ;;  %s11286_s14 = smov 116  }
 0x454   : > { %9494 = vrot.lane.b32.xlu0 %v9463_v52, %s11278_s12  ;;  %9489 = vrot.lane.b32.xlu1 %v9468_v58, %s11252_s16  ;;  %s11285_s16 = smov 117  }
 0x458   : > { %9504 = vrot.lane.b32.xlu0 %v9463_v52, %s11279_s18  ;;  %9499 = vrot.lane.b32.xlu1 %v9468_v58, %s11278_s12 }
 0x45c   : > { %9514 = vrot.lane.b32.xlu0 %v9463_v52, %s11280_s13  ;;  %9509 = vrot.lane.b32.xlu1 %v9468_v58, %s11279_s18 }
 0x460   : > { %9524 = vrot.lane.b32.xlu0 %v9463_v52, %s11281_s23  ;;  %9519 = vrot.lane.b32.xlu1 %v9468_v58, %s11280_s13 }
 0x464   : > { %9534 = vrot.lane.b32.xlu0 %v9463_v52, %s11282_s25  ;;  %9529 = vrot.lane.b32.xlu1 %v9468_v58, %s11281_s23 }
 0x468   : > { %9544 = vrot.lane.b32.xlu0 %v9463_v52, %s11283_s26  ;;  %9539 = vrot.lane.b32.xlu1 %v9468_v58, %s11282_s25 }
 0x46c   : > { %9554 = vrot.lane.b32.xlu0 %v9463_v52, %s11284_s30  ;;  %9549 = vrot.lane.b32.xlu1 %v9468_v58, %s11283_s26 }
 0x470   : > { %9564 = vrot.lane.b32.xlu0 %v9463_v52, %s11285_s16  ;;  %9559 = vrot.lane.b32.xlu1 %v9468_v58, %s11284_s30 }
 0x474   : > { %9574 = vrot.lane.b32.xlu0 %v9463_v52, %s11286_s14  ;;  %9569 = vrot.lane.b32.xlu1 %v9468_v58, %s11285_s16 }
 0x478   : > { %9584 = vrot.lane.b32.xlu0 %v9463_v52, %s11287_s15  ;;  %9579 = vrot.lane.b32.xlu1 %v9468_v58, %s11286_s14 }
 0x47c   : > { %9594 = vrot.lane.b32.xlu0 %v9463_v52, %s11288_s17  ;;  %9589 = vrot.lane.b32.xlu1 %v9468_v58, %s11287_s15 }
 0x480   : > { %5835 = vperm.xlu0 %9452, %v5829_v59   ;;  %9599 = vrot.lane.b32.xlu1 %v9468_v58, %s11288_s17 }
 0x484   : > { %5845 = vperm.xlu0 %9452, %v5831_v60   ;;  %5840 = vperm.xlu1 %9451, %v5830_v61  }
 0x488   : > { %5850 = vperm.xlu1 %9451, %v5832_v62   ;;  %v7822_v62 = vld [vmem:[%s11224_s6 + $0x88] sm:$0xff] }
 0x4ba   : > { %v9465_v63 = vpop.permute.xlu0 %9464 }
 0x4bb   : > { %v9467_v0 = vunpack.i.h.bf16 %v9465_v63  ;;  %v9466_v3 = vunpack.i.l.bf16 %v9465_v63  ;;  %v7823_v63 = vld [vmem:[%s11224_s6 + $0x90] sm:$0xff] }
 0x4bd   : > { %v8973_v4 = vpack.c.bf16 %v9467_v0, %v9466_v3 }
 0x4be   : > { %v9470_v5 = vpop.permute.xlu1 %9469  ;;  %v9475_v12 = vpop.permute.xlu0 %9474 }
 0x4bf   : > { %v9472_v6 = vunpack.i.h.bf16 %v9470_v5  ;;  %v9471_v7 = vunpack.i.l.bf16 %v9470_v5  ;;  %8974 = vmatprep.subr.bf16.mxu1 %v8973_v4  ;;  %v9477_v17 = vunpack.i.h.bf16 %v9475_v12  ;;  %v9476_v18 = vunpack.i.l.bf16 %v9475_v12 }
 0x4c0   : > { %8976 = vmatpush3.bf16.msra.mxu1 %v8973_v4 }
 0x4c1   : > { %v8977_v10 = vpack.c.bf16 %v9472_v6, %v9471_v7  ;;  %v8993_v22 = vpack.c.bf16 %v9477_v17, %v9476_v18  ;;  %v7824_v6 = vld [vmem:[%s11224_s6 + $0x98] sm:$0xff]  ;;  %v7829_v7 = vld [vmem:[%s11224_s6 + $0xa0] sm:$0xff]  ;;  %v7830_v17 = vld [vmem:[%s11224_s6 + $0xa8] sm:$0xff] }
 0x4c2   : > { %v9480_v19 = vpop.permute.xlu1 %9479  ;;  %v9485_v25 = vpop.permute.xlu0 %9484  ;;  %v7831_v18 = vld [vmem:[%s11224_s6 + $0xb0] sm:$0xff] }
 0x4c3   : > { %8978 = vmatprep.subr.bf16.mxu1 %v8977_v10  ;;  %v9482_v23 = vunpack.i.h.bf16 %v9480_v19  ;;  %v9481_v24 = vunpack.i.l.bf16 %v9480_v19  ;;  %v9487_v28 = vunpack.i.h.bf16 %v9485_v25  ;;  %v9486_v29 = vunpack.i.l.bf16 %v9485_v25 }
 0x4c4   : > { %8980 = vmatpush3.bf16.msra.mxu1 %v8977_v10 }
 0x4c5   : > { %8983 = vmatprep.subr.msk.bf16.mxu1 %vm10722_vm13, %v10668_v47  ;;  %v8997_v30 = vpack.c.bf16 %v9482_v23, %v9481_v24  ;;  %v9001_v34 = vpack.c.bf16 %v9487_v28, %v9486_v29  ;;  %v7832_v23 = vld [vmem:[%s11224_s6 + $0xb8] sm:$0xff]  ;;  %v7837_v24 = vld [vmem:[%s11224_s6 + $0xc0] sm:$0xff]  ;;  %v7838_v29 = vld [vmem:[%s11224_s6 + $0xc8] sm:$0xff] }
 0x4c6   : > { %v9490_v31 = vpop.permute.xlu1 %9489  ;;  %v9495_v37 = vpop.permute.xlu0 %9494 }
 0x4c7   : > { %8588 = vmatmul.mubr.msk.f32.vlgmr.msra.gmra.mrb[2].mxu1 %vm4100_vm12, %v7790_v13  ;;  %v9492_v35 = vunpack.i.h.bf16 %v9490_v31  ;;  %v9491_v36 = vunpack.i.l.bf16 %v9490_v31  ;;  %v9497_v40 = vunpack.i.h.bf16 %v9495_v37  ;;  %v9496_v41 = vunpack.i.l.bf16 %v9495_v37 }
 0x4c8   : > { %8986 = vmatpush3.bf16.msk.msra.mxu1 %vm10722_vm13, %v10668_v47  ;;  %8590 = vmatprep.mubr.msk.f32.mxu1 %vm4100_vm12, %v7791_v15 }
 0x4c9   : > { %8989 = vmatprep.subr.msk.bf16.mxu1 %vm10722_vm13, %v10679_v57  ;;  %v9005_v42 = vpack.c.bf16 %v9492_v35, %v9491_v36  ;;  %v9009_v46 = vpack.c.bf16 %v9497_v40, %v9496_v41  ;;  %v7840_v35 = vld [vmem:[%s11224_s6 + $0xd8] sm:$0xff]  ;;  %v7845_v36 = vld [vmem:[%s11224_s6 + $0xe0] sm:$0xff]  ;;  %v7846_v41 = vld [vmem:[%s11224_s6 + $0xe8] sm:$0xff] }
 0x4ca   : > { %v9500_v43 = vpop.permute.xlu1 %9499  ;;  %v9505_v49 = vpop.permute.xlu0 %9504 }
 0x4cb   : > { %8591 = vmatmul.mubr.msk.f32.gmra.mrb[4].mxu1 %vm4100_vm12, %v7792_v20  ;;  %v9502_v47 = vunpack.i.h.bf16 %v9500_v43  ;;  %v9501_v48 = vunpack.i.l.bf16 %v9500_v43  ;;  %v9507_v52 = vunpack.i.h.bf16 %v9505_v49  ;;  %v9506_v53 = vunpack.i.l.bf16 %v9505_v49 }
 0x4cc   : > { %8992 = vmatpush3.bf16.msk.msra.mxu1 %vm10722_vm13, %v10679_v57  ;;  %8601 = vmatprep.mubr.msk.f32.mxu1 %vm4100_vm12, %v4075_v21  ;;  %v7821_v57 = vld [vmem:[%s11224_s6 + $0x80] sm:$0xff] }
 0x4cd   : > { %8994 = vmatprep.subr.bf16.mxu1 %v8993_v22  ;;  %v9013_v54 = vpack.c.bf16 %v9502_v47, %v9501_v48  ;;  %v9017_v58 = vpack.c.bf16 %v9507_v52, %v9506_v53  ;;  %v7848_v47 = vld [vmem:[%s11224_s6 + $0xf8] sm:$0xff]  ;;  %v7853_v48 = vld [vmem:[%s11224_s6 + $0x100] sm:$0xff]  ;;  %v7854_v53 = vld [vmem:[%s11224_s6 + $0x108] sm:$0xff] }
 0x4ce   : > { %v9510_v55 = vpop.permute.xlu1 %9509  ;;  %v9515_v61 = vpop.permute.xlu0 %9514 }
 0x4cf   : > { %8602 = vmatmul.mubr.msk.f32.vlgmr.msra.gmra.mrb[2].mxu1 %vm4100_vm12, %v4076_v26  ;;  %v9512_v59 = vunpack.i.h.bf16 %v9510_v55  ;;  %v9511_v60 = vunpack.i.l.bf16 %v9510_v55  ;;  %v9517_v0 = vunpack.i.h.bf16 %v9515_v61  ;;  %v9516_v3 = vunpack.i.l.bf16 %v9515_v61 }
 0x4d0   : > { %8996 = vmatpush3.bf16.msra.mxu1 %v8993_v22  ;;  %8604 = vmatprep.mubr.msk.f32.mxu1 %vm4100_vm12, %v4077_v27 }
 0x4d1   : > { %8998 = vmatprep.subr.bf16.mxu1 %v8997_v30  ;;  %v9021_v4 = vpack.c.bf16 %v9512_v59, %v9511_v60  ;;  %v9025_v10 = vpack.c.bf16 %v9517_v0, %v9516_v3  ;;  %v7856_v59 = vld [vmem:[%s11224_s6 + $0x118] sm:$0xff]  ;;  %v7861_v60 = vld [vmem:[%s11224_s6 + $0x120] sm:$0xff]  ;;  %v7862_v3 = vld [vmem:[%s11224_s6 + $0x128] sm:$0xff] }
 0x4d2   : > { %v9520_v5 = vpop.permute.xlu1 %9519  ;;  %v9525_v15 = vpop.permute.xlu0 %9524 }
 0x4d3   : > { %8605 = vmatmul.mubr.msk.f32.gmra.mrb[4].mxu1 %vm4100_vm12, %v4078_v32  ;;  %v9522_v12 = vunpack.i.h.bf16 %v9520_v5  ;;  %v9521_v13 = vunpack.i.l.bf16 %v9520_v5  ;;  %v9527_v19 = vunpack.i.h.bf16 %v9525_v15  ;;  %v9526_v20 = vunpack.i.l.bf16 %v9525_v15 }
 0x4d4   : > { %9000 = vmatpush3.bf16.msra.mxu1 %v8997_v30  ;;  %8615 = vmatprep.mubr.msk.f32.mxu1 %vm4100_vm12, %v7805_v33  ;;  %v7839_v30 = vld [vmem:[%s11224_s6 + $0xd0] sm:$0xff] }
 0x4d5   : > { %9002 = vmatprep.subr.bf16.mxu1 %v9001_v34  ;;  %v9029_v21 = vpack.c.bf16 %v9522_v12, %v9521_v13  ;;  %v9033_v25 = vpack.c.bf16 %v9527_v19, %v9526_v20  ;;  %v7864_v12 = vld [vmem:[%s11224_s6 + $0x138] sm:$0xff]  ;;  %v7869_v13 = vld [vmem:[%s11224_s6 + $0x140] sm:$0xff]  ;;  %v7870_v20 = vld [vmem:[%s11224_s6 + $0x148] sm:$0xff] }
 0x4d6   : > { %v9530_v22 = vpop.permute.xlu1 %9529  ;;  %v9535_v28 = vpop.permute.xlu0 %9534 }
 0x4d7   : > { %8616 = vmatmul.mubr.msk.f32.vlgmr.msra.gmra.mrb[2].mxu1 %vm4100_vm12, %v7806_v38  ;;  %v9532_v26 = vunpack.i.h.bf16 %v9530_v22  ;;  %v9531_v27 = vunpack.i.l.bf16 %v9530_v22  ;;  %v9537_v31 = vunpack.i.h.bf16 %v9535_v28  ;;  %v9536_v32 = vunpack.i.l.bf16 %v9535_v28 }
 0x4d8   : > { %9004 = vmatpush3.bf16.msra.mxu1 %v9001_v34  ;;  %8618 = vmatprep.mubr.msk.f32.mxu1 %vm4100_vm12, %v7807_v39 }
 0x4d9   : > { %9006 = vmatprep.subr.bf16.mxu1 %v9005_v42  ;;  %v9037_v33 = vpack.c.bf16 %v9532_v26, %v9531_v27  ;;  %v9041_v37 = vpack.c.bf16 %v9537_v31, %v9536_v32  ;;  %v7872_v26 = vld [vmem:[%s11224_s6 + $0x158] sm:$0xff]  ;;  %v7877_v27 = vld [vmem:[%s11224_s6 + $0x160] sm:$0xff]  ;;  %v7878_v32 = vld [vmem:[%s11224_s6 + $0x168] sm:$0xff] }
 0x4da   : > { %v9540_v34 = vpop.permute.xlu1 %9539  ;;  %v9545_v40 = vpop.permute.xlu0 %9544 }
 0x4db   : > { %8619 = vmatmul.mubr.msk.f32.gmra.mrb[4].mxu1 %vm4100_vm12, %v7808_v44  ;;  %v9542_v38 = vunpack.i.h.bf16 %v9540_v34  ;;  %v9541_v39 = vunpack.i.l.bf16 %v9540_v34  ;;  %v9547_v43 = vunpack.i.h.bf16 %v9545_v40  ;;  %v9546_v44 = vunpack.i.l.bf16 %v9545_v40 }
 0x4dc   : > { %9008 = vmatpush3.bf16.msra.mxu1 %v9005_v42  ;;  %8629 = vmatprep.mubr.msk.f32.mxu1 %vm4100_vm12, %v7813_v45  ;;  %v7847_v42 = vld [vmem:[%s11224_s6 + $0xf0] sm:$0xff] }
 0x4dd   : > { %9010 = vmatprep.subr.bf16.mxu1 %v9009_v46  ;;  %v9045_v45 = vpack.c.bf16 %v9542_v38, %v9541_v39  ;;  %v9049_v49 = vpack.c.bf16 %v9547_v43, %v9546_v44  ;;  %v7880_v38 = vld [vmem:[%s11224_s6 + $0x178] sm:$0xff]  ;;  %v7885_v39 = vld [vmem:[%s11224_s6 + $0x180] sm:$0xff]  ;;  %v7886_v44 = vld [vmem:[%s11224_s6 + $0x188] sm:$0xff] }
 0x4de   : > { %v9555_v52 = vpop.permute.xlu0 %9554 }
 0x4df   : > { %8630 = vmatmul.mubr.msk.f32.vlgmr.msra.gmra.mrb[2].mxu1 %vm4100_vm12, %v7814_v50  ;;  %v9557_v55 = vunpack.i.h.bf16 %v9555_v52 }
 0x4e0   : > { %9012 = vmatpush3.bf16.msra.mxu1 %v9009_v46  ;;  %8632 = vmatprep.mubr.msk.f32.mxu1 %vm4100_vm12, %v7815_v51  ;;  %v9550_v46 = vpop.permute.xlu1 %9549 }
 0x4e1   : > { %9014 = vmatprep.subr.bf16.mxu1 %v9013_v54  ;;  %v9552_v50 = vunpack.i.h.bf16 %v9550_v46  ;;  %v9551_v51 = vunpack.i.l.bf16 %v9550_v46 }
 0x4e2   : > { %v9565_v0 = vpop.permute.xlu0 %9564 }
 0x4e3   : > { %8633 = vmatmul.mubr.msk.f32.gmra.mrb[4].mxu1 %vm4100_vm12, %v7816_v56  ;;  %v9556_v56 = vunpack.i.l.bf16 %v9555_v52  ;;  %v9567_v5 = vunpack.i.h.bf16 %v9565_v0 }
 0x4e4   : > { %9016 = vmatpush3.bf16.msra.mxu1 %v9013_v54  ;;  %8643 = vmatprep.mubr.msk.f32.mxu1 %vm4100_vm12, %v7821_v57  ;;  %v7855_v54 = vld [vmem:[%s11224_s6 + $0x110] sm:$0xff]  ;;  %v9053_v57 = vpack.c.bf16 %v9552_v50, %v9551_v51  ;;  %v7888_v50 = vld [vmem:[%s11224_s6 + $0x198] sm:$0xff]  ;;  %v7893_v51 = vld [vmem:[%s11224_s6 + $0x1a0] sm:$0xff] }
 0x4e5   : > { %9018 = vmatprep.subr.bf16.mxu1 %v9017_v58  ;;  %v9057_v61 = vpack.c.bf16 %v9557_v55, %v9556_v56  ;;  %v7894_v55 = vld [vmem:[%s11224_s6 + $0x1a8] sm:$0xff]  ;;  %v7895_v56 = vld [vmem:[%s11224_s6 + $0x1b0] sm:$0xff] }
 0x4e6   : > { %v9575_v19 = vpop.permute.xlu0 %9574 }
 0x4e7   : > { %8644 = vmatmul.mubr.msk.f32.vlgmr.msra.gmra.mrb[2].mxu1 %vm4100_vm12, %v7822_v62  ;;  %v9577_v22 = vunpack.i.h.bf16 %v9575_v19 }
 0x4e8   : > { %9020 = vmatpush3.bf16.msra.mxu1 %v9017_v58  ;;  %8646 = vmatprep.mubr.msk.f32.mxu1 %vm4100_vm12, %v7823_v63  ;;  %v9560_v58 = vpop.permute.xlu1 %9559 }
 0x4e9   : > { %9022 = vmatprep.subr.bf16.mxu1 %v9021_v4  ;;  %v9562_v62 = vunpack.i.h.bf16 %v9560_v58  ;;  %v9561_v63 = vunpack.i.l.bf16 %v9560_v58  ;;  %v7896_v58 = vld [vmem:[%s11224_s6 + $0x1b8] sm:$0xff] }
 0x4ea   : > { %v9585_v31 = vpop.permute.xlu0 %9584 }
 0x4eb   : > { %8647 = vmatmul.mubr.msk.f32.gmra.mrb[4].mxu1 %vm4100_vm12, %v7824_v6  ;;  %v9566_v6 = vunpack.i.l.bf16 %v9565_v0  ;;  %v9587_v34 = vunpack.i.h.bf16 %v9585_v31 }
 0x4ec   : > { %9024 = vmatpush3.bf16.msra.mxu1 %v9021_v4  ;;  %8657 = vmatprep.mubr.msk.f32.mxu1 %vm4100_vm12, %v7829_v7  ;;  %v7863_v4 = vld [vmem:[%s11224_s6 + $0x130] sm:$0xff]  ;;  %v9061_v7 = vpack.c.bf16 %v9562_v62, %v9561_v63  ;;  %v7904_v62 = vld [vmem:[%s11224_s6 + $0x1d8] sm:$0xff] }
 0x4ed   : > { %9026 = vmatprep.subr.bf16.mxu1 %v9025_v10  ;;  %v9065_v15 = vpack.c.bf16 %v9567_v5, %v9566_v6 }
 0x4ee   : > { %v9595_v43 = vpop.permute.xlu0 %9594 }
 0x4ef   : > { %8658 = vmatmul.mubr.msk.f32.vlgmr.msra.gmra.mrb[2].mxu1 %vm4100_vm12, %v7830_v17  ;;  %v9597_v46 = vunpack.i.h.bf16 %v9595_v43 }
 0x4f0   : > { %9028 = vmatpush3.bf16.msra.mxu1 %v9025_v10  ;;  %8660 = vmatprep.mubr.msk.f32.mxu1 %vm4100_vm12, %v7831_v18  ;;  %v9570_v10 = vpop.permute.xlu1 %9569 }
 0x4f1   : > { %9030 = vmatprep.subr.bf16.mxu1 %v9029_v21  ;;  %v9572_v17 = vunpack.i.h.bf16 %v9570_v10  ;;  %v9571_v18 = vunpack.i.l.bf16 %v9570_v10 }
 0x4f3   : > { %8661 = vmatmul.mubr.msk.f32.gmra.mrb[4].mxu1 %vm4100_vm12, %v7832_v23  ;;  %v9576_v23 = vunpack.i.l.bf16 %v9575_v19 }
 0x4f4   : > { %9032 = vmatpush3.bf16.msra.mxu1 %v9029_v21  ;;  %8671 = vmatprep.mubr.msk.f32.mxu1 %vm4100_vm12, %v7837_v24  ;;  %v7871_v21 = vld [vmem:[%s11224_s6 + $0x150] sm:$0xff]  ;;  %v9069_v24 = vpack.c.bf16 %v9572_v17, %v9571_v18 }
 0x4f5   : > { %9034 = vmatprep.subr.bf16.mxu1 %v9033_v25  ;;  %v9073_v28 = vpack.c.bf16 %v9577_v22, %v9576_v23 }
 0x4f7   : > { %8672 = vmatmul.mubr.msk.f32.vlgmr.msra.gmra.mrb[2].mxu1 %vm4100_vm12, %v7838_v29 }
 0x4f8   : > { %9036 = vmatpush3.bf16.msra.mxu1 %v9033_v25  ;;  %8674 = vmatprep.mubr.msk.f32.mxu1 %vm4100_vm12, %v7839_v30  ;;  %v9580_v25 = vpop.permute.xlu1 %9579 }
 0x4f9   : > { %9038 = vmatprep.subr.bf16.mxu1 %v9037_v33  ;;  %v9582_v29 = vunpack.i.h.bf16 %v9580_v25  ;;  %v9581_v30 = vunpack.i.l.bf16 %v9580_v25 }
 0x4fb   : > { %8675 = vmatmul.mubr.msk.f32.gmra.mrb[4].mxu1 %vm4100_vm12, %v7840_v35  ;;  %v9586_v35 = vunpack.i.l.bf16 %v9585_v31 }
 0x4fc   : > { %9040 = vmatpush3.bf16.msra.mxu1 %v9037_v33  ;;  %8685 = vmatprep.mubr.msk.f32.mxu1 %vm4100_vm12, %v7845_v36  ;;  %v7879_v33 = vld [vmem:[%s11224_s6 + $0x170] sm:$0xff]  ;;  %v9077_v36 = vpack.c.bf16 %v9582_v29, %v9581_v30 }
 0x4fd   : > { %9042 = vmatprep.subr.bf16.mxu1 %v9041_v37  ;;  %v9081_v40 = vpack.c.bf16 %v9587_v34, %v9586_v35 }
 0x4ff   : > { %8686 = vmatmul.mubr.msk.f32.vlgmr.msra.gmra.mrb[2].mxu1 %vm4100_vm12, %v7846_v41  ;;  %v5836_v0 = vpop.permute.xlu0 %5835 }
 0x500   : > { %9044 = vmatpush3.bf16.msra.mxu1 %v9041_v37  ;;  %8688 = vmatprep.mubr.msk.f32.mxu1 %vm4100_vm12, %v7847_v42  ;;  %v9590_v37 = vpop.permute.xlu1 %9589 }
 0x501   : > { %9046 = vmatprep.subr.bf16.mxu1 %v9045_v45  ;;  %v9592_v41 = vunpack.i.h.bf16 %v9590_v37  ;;  %v9591_v42 = vunpack.i.l.bf16 %v9590_v37 }
 0x503   : > { %8689 = vmatmul.mubr.msk.f32.gmra.mrb[4].mxu1 %vm4100_vm12, %v7848_v47  ;;  %v9596_v47 = vunpack.i.l.bf16 %v9595_v43 }
 0x504   : > { %9048 = vmatpush3.bf16.msra.mxu1 %v9045_v45  ;;  %8699 = vmatprep.mubr.msk.f32.mxu1 %vm4100_vm12, %v7853_v48  ;;  %v7887_v45 = vld [vmem:[%s11224_s6 + $0x190] sm:$0xff]  ;;  %v9085_v48 = vpack.c.bf16 %v9592_v41, %v9591_v42 }
 0x505   : > { %9050 = vmatprep.subr.bf16.mxu1 %v9049_v49  ;;  %v9089_v52 = vpack.c.bf16 %v9597_v46, %v9596_v47 }
 0x507   : > { %8700 = vmatmul.mubr.msk.f32.vlgmr.msra.gmra.mrb[2].mxu1 %vm4100_vm12, %v7854_v53 }
 0x508   : > { %9052 = vmatpush3.bf16.msra.mxu1 %v9049_v49  ;;  %8702 = vmatprep.mubr.msk.f32.mxu1 %vm4100_vm12, %v7855_v54  ;;  %v9600_v49 = vpop.permute.xlu1 %9599 }
 0x509   : > { %9054 = vmatprep.subr.bf16.mxu1 %v9053_v57  ;;  %v9602_v53 = vunpack.i.h.bf16 %v9600_v49  ;;  %v9601_v54 = vunpack.i.l.bf16 %v9600_v49 }
 0x50b   : > { %8703 = vmatmul.mubr.msk.f32.gmra.mrb[4].mxu1 %vm4100_vm12, %v7856_v59  ;;  %v7901_v59 = vld [vmem:[%s11224_s6 + $0x1c0] sm:$0xff] }
 0x50c   : > { %9056 = vmatpush3.bf16.msra.mxu1 %v9053_v57  ;;  %8713 = vmatprep.mubr.msk.f32.mxu1 %vm4100_vm12, %v7861_v60  ;;  %v9093_v57 = vpack.c.bf16 %v9602_v53, %v9601_v54  ;;  %v7902_v60 = vld [vmem:[%s11224_s6 + $0x1c8] sm:$0xff]  ;;  %v5841_v63 = vpop.permute.xlu1 %5840 }
 0x50d   : > { %9058 = vmatprep.subr.bf16.mxu1 %v9057_v61 }
 0x50f   : > { %8714 = vmatmul.mubr.msk.f32.vlgmr.msra.gmra.mrb[2].mxu1 %vm4100_vm12, %v7862_v3 }
 0x510   : > { %9060 = vmatpush3.bf16.msra.mxu1 %v9057_v61  ;;  %8716 = vmatprep.mubr.msk.f32.mxu1 %vm4100_vm12, %v7863_v4  ;;  %v7903_v61 = vld [vmem:[%s11224_s6 + $0x1d0] sm:$0xff]  ;;  %v5851_v10 = vpop.permute.xlu1 %5850 }
 0x511   : > { %9062 = vmatprep.subr.bf16.mxu1 %v9061_v7 }
 0x513   : > { %8717 = vmatmul.mubr.msk.f32.gmra.mrb[4].mxu1 %vm4100_vm12, %v7864_v12 }
 0x514   : > { %9064 = vmatpush3.bf16.msra.mxu1 %v9061_v7  ;;  %8727 = vmatprep.mubr.msk.f32.mxu1 %vm4100_vm12, %v7869_v13 }
 0x515   : > { %9066 = vmatprep.subr.bf16.mxu1 %v9065_v15 }
 0x517   : > { %8728 = vmatmul.mubr.msk.f32.vlgmr.msra.gmra.mrb[2].mxu1 %vm4100_vm12, %v7870_v20 }
 0x518   : > { %9068 = vmatpush3.bf16.msra.mxu1 %v9065_v15  ;;  %8730 = vmatprep.mubr.msk.f32.mxu1 %vm4100_vm12, %v7871_v21  ;;  %v5846_v15 = vpop.permute.xlu0 %5845 }
 0x519   : > { %9070 = vmatprep.subr.bf16.mxu1 %v9069_v24 }
 0x51b   : > { %8731 = vmatmul.mubr.msk.f32.gmra.mrb[4].mxu1 %vm4100_vm12, %v7872_v26 }
 0x51c   : > { %9072 = vmatpush3.bf16.msra.mxu1 %v9069_v24  ;;  %8741 = vmatprep.mubr.msk.f32.mxu1 %vm4100_vm12, %v7877_v27 }
 0x51d   : > { %9074 = vmatprep.subr.bf16.mxu1 %v9073_v28 }
 0x51f   : > { %8742 = vmatmul.mubr.msk.f32.vlgmr.msra.gmra.mrb[2].mxu1 %vm4100_vm12, %v7878_v32 }
 0x520   : > { %9076 = vmatpush3.bf16.msra.mxu1 %v9073_v28  ;;  %8744 = vmatprep.mubr.msk.f32.mxu1 %vm4100_vm12, %v7879_v33 }
 0x521   : > { %9078 = vmatprep.subr.bf16.mxu1 %v9077_v36 }
 0x523   : > { %8745 = vmatmul.mubr.msk.f32.gmra.mrb[4].mxu1 %vm4100_vm12, %v7880_v38 }
 0x524   : > { %9080 = vmatpush3.bf16.msra.mxu1 %v9077_v36  ;;  %8755 = vmatprep.mubr.msk.f32.mxu1 %vm4100_vm12, %v7885_v39 }
 0x525   : > { %9082 = vmatprep.subr.bf16.mxu1 %v9081_v40 }
 0x527   : > { %8756 = vmatmul.mubr.msk.f32.vlgmr.msra.gmra.mrb[2].mxu1 %vm4100_vm12, %v7886_v44 }
 0x528   : > { %9084 = vmatpush3.bf16.msra.mxu1 %v9081_v40  ;;  %8758 = vmatprep.mubr.msk.f32.mxu1 %vm4100_vm12, %v7887_v45 }
 0x529   : > { %9086 = vmatprep.subr.bf16.mxu1 %v9085_v48 }
 0x52b   : > { %8759 = vmatmul.mubr.msk.f32.gmra.mrb[4].mxu1 %vm4100_vm12, %v7888_v50 }
 0x52c   : > { %9088 = vmatpush3.bf16.msra.mxu1 %v9085_v48  ;;  %8769 = vmatprep.mubr.msk.f32.mxu1 %vm4100_vm12, %v7893_v51 }
 0x52d   : > { %9090 = vmatprep.subr.bf16.mxu1 %v9089_v52 }
 0x52f   : > { %8770 = vmatmul.mubr.msk.f32.vlgmr.msra.gmra.mrb[2].mxu1 %vm4100_vm12, %v7894_v55 }
 0x530   : > { %9092 = vmatpush3.bf16.msra.mxu1 %v9089_v52  ;;  %8772 = vmatprep.mubr.msk.f32.mxu1 %vm4100_vm12, %v7895_v56 }
 0x531   : > { %9094 = vmatprep.subr.bf16.mxu1 %v9093_v57 }
 0x533   : > { %8773 = vmatmul.mubr.msk.f32.gmra.mrb[4].mxu1 %vm4100_vm12, %v7896_v58  ;;  %v7218_v58 = vld [vmem:[%s11227_s9] sm:$0x3] }
 0x534   : > { %9096 = vmatpush3.bf16.msra.mxu1 %v9093_v57  ;;  %8783 = vmatprep.mubr.msk.f32.mxu1 %vm4100_vm12, %v7901_v59  ;;  %v7231_v59 = vld [vmem:[#allocation2] sm:$0x1] }
 0x535   : > { %9097 = vmatprep.subr.bf16.mxu1 %v9859_v1 }
 0x537   : > { %8784 = vmatmul.mubr.msk.f32.vlgmr.msra.gmra.mrb[2].mxu1 %vm4100_vm12, %v7902_v60 }
 0x538   : > { %8786 = vmatprep.mubr.msk.f32.mxu1 %vm4100_vm12, %v7903_v61 }
 0x53b   : > { %8787 = vmatmul.mubr.msk.f32.gmra.mrb[4].mxu1 %vm4100_vm12, %v7904_v62 }
 0x53c   : > { %8797 = vmatprep.mubr.msk.f32.mxu1 %vm9860_vm0, %v9861_v2 }
 0x60a   : > { %v8785_v3 = vpop.f32.mrb[2].mxu1 }
 0x60b   : > { %v5854_v4 = vadd.f32 %v8785_v3, %v5841_v63  ;;  %v5806_v5 = vpop.f32.mrb[3].mxu1 }
 0x60c   : > { %v5853_v6 = vadd.f32 %v5836_v0, %v5806_v5 }
 0x60d   : > { %v7910_v7 = vmul.f32 -1.442695, %v5854_v4 }
 0x60e   : > { %v7909_v12 = vmul.f32 -1.442695, %v5853_v6  ;;  %v8788_v13 = vpop.f32.mrb[4].mxu1 }
 0x60f   : > { %9769 = vpow2.f32 %v7910_v7  ;;  %v5856_v17 = vadd.f32 %v8788_v13, %v5851_v10  ;;  %v5816_v18 = vpop.f32.mrb[5].mxu1 }
 0x610   : > { %9771 = vpow2.f32 %v7909_v12  ;;  %v5855_v19 = vadd.f32 %v5846_v15, %v5816_v18  ;;  %v5909_v15 = vld [vmem:[%s11226_s8] sm:$0x3] }
 0x611   : > { %v7912_v20 = vmul.f32 -1.442695, %v5856_v17 }
 0x612   : > { %v7911_v21 = vmul.f32 -1.442695, %v5855_v19 }
 0x613   : > { %9773 = vpow2.f32 %v7912_v20 }
 0x614   : > { %9775 = vpow2.f32 %v7911_v21 }
 0x619   : > { %v9770_v22 = vpop.eup %9769 }
 0x61a   : > { %v9772_v23 = vpop.eup %9771  ;;  %v5870_v24 = vadd.f32 1.0, %v9770_v22 }
 0x61b   : > { %v5869_v25 = vadd.f32 1.0, %v9772_v23 }
 0x61c   : > { %9777 = vrcp.f32 %v5870_v24  ;;  %v7920_v24 = vld [vmem:[%s11226_s8 + $0x4] sm:$0x3] }
 0x61d   : > { %v9774_v26 = vpop.eup %9773  ;;  %9779 = vrcp.f32 %v5869_v25 }
 0x61e   : > { %v9776_v27 = vpop.eup %9775  ;;  %v5872_v28 = vadd.f32 1.0, %v9774_v26 }
 0x61f   : > { %v5871_v29 = vadd.f32 1.0, %v9776_v27 }
 0x620   : > { %9781 = vrcp.f32 %v5872_v28 }
 0x621   : > { %9783 = vrcp.f32 %v5871_v29 }
 0x626   : > { %v9778_v30 = vpop.eup %9777 }
 0x627   : > { %v9780_v31 = vpop.eup %9779  ;;  %v5882_v32 = vmul.f32 %v9778_v30, %v5854_v4 }
 0x628   : > { %v5881_v33 = vmul.f32 %v9780_v31, %v5853_v6  ;;  %v7913_v6 = vld [vmem:[%s11226_s8 + $0x2] sm:$0x3] }
 0x62a   : > { %v9782_v34 = vpop.eup %9781  ;;  %v9603_v35 = vpack.i.bf16 %v5882_v32, %v5881_v33  ;;  %v7922_v33 = vld [vmem:[%s11226_s8 + $0x6] sm:$0x3] }
 0x62b   : > { %v9784_v36 = vpop.eup %9783  ;;  %v5884_v37 = vmul.f32 %v9782_v34, %v5856_v17 }
 0x62c   : > { %v5883_v38 = vmul.f32 %v9784_v36, %v5855_v19  ;;  %9604 = vrot.lane.b32.xlu0 %v9603_v35, %s11291_s24 }
 0x62e   : > { %v9608_v39 = vpack.i.bf16 %v5884_v37, %v5883_v38 }
 0x630   : > { %9609 = vrot.lane.b32.xlu1 %v9608_v39, %s11291_s24  ;;  %s9898_s24 = smov 4  }
 0x69e   : > { %v9605_v40 = vpop.permute.xlu0 %9604 }
 0x69f   : > { %v9607_v41 = vunpack.i.h.bf16 %v9605_v40  ;;  %v9606_v42 = vunpack.i.l.bf16 %v9605_v40 }
 0x6a1   : > { %v10980_v43 = vsel %vm4065_vm10, 0.0, %v9607_v41  ;;  %v5901_v44 = vsel %vm4065_vm10, 0.0, %v9606_v42  ;;  %v7924_v42 = vld [vmem:[%s11226_s8 + $0x8] sm:$0x3] }
 0x6a2   : > { %v5906_v45 = vsel %vm4070_vm11, %v10980_v43, 0.0  ;;  %v5905_v46 = vsel %vm4070_vm11, %v5901_v44, 0.0  ;;  %v9104_v47 = vpack.c.bf16 %v10980_v43, %v5901_v44  ;;  %v9610_v48 = vpop.permute.xlu1 %9609 }
 0x6a3   : > { %v9612_v49 = vunpack.i.h.bf16 %v9610_v48  ;;  %v9611_v50 = vunpack.i.l.bf16 %v9610_v48  ;;  %v9613_v51 = vpack.i.bf16 %v5906_v45, %v5905_v46 }
 0x6a5   : > { %v5904_v52 = vsel %vm4065_vm10, 0.0, %v9612_v49  ;;  %v5903_v53 = vsel %vm4065_vm10, 0.0, %v9611_v50  ;;  %9614 = vrot.lane.b32.xlu0 %v9613_v51, %s11292_s27  ;;  %vm7422_vm10 = vcmask 146432  }
 0x6a6   : > { %v5908_v54 = vsel %vm4070_vm11, %v5904_v52, 0.0  ;;  %v5907_v55 = vsel %vm4070_vm11, %v5903_v53, 0.0  ;;  %v9108_v56 = vpack.c.bf16 %v5904_v52, %v5903_v53 }
 0x6a7   : > { %v9618_v57 = vpack.i.bf16 %v5908_v54, %v5907_v55 }
 0x6a9   : > { %9624 = vrot.lane.b32.xlu0 %v9613_v51, %s11293_s0  ;;  %9619 = vrot.lane.b32.xlu1 %v9618_v57, %s11292_s27 }
 0x6ad   : > { %9634 = vrot.lane.b32.xlu0 %v9613_v51, %s11294_s1  ;;  %9629 = vrot.lane.b32.xlu1 %v9618_v57, %s11293_s0 }
 0x6b1   : > { %9644 = vrot.lane.b32.xlu0 %v9613_v51, %s11278_s12  ;;  %9639 = vrot.lane.b32.xlu1 %v9618_v57, %s11294_s1  ;;  %s9899_s1 = smov 8  }
 0x6b5   : > { %9654 = vrot.lane.b32.xlu0 %v9613_v51, %s11279_s18  ;;  %9649 = vrot.lane.b32.xlu1 %v9618_v57, %s11278_s12 }
 0x6b9   : > { %9664 = vrot.lane.b32.xlu0 %v9613_v51, %s11280_s13  ;;  %9659 = vrot.lane.b32.xlu1 %v9618_v57, %s11279_s18 }
 0x6bd   : > { %9674 = vrot.lane.b32.xlu0 %v9613_v51, %s11281_s23  ;;  %9669 = vrot.lane.b32.xlu1 %v9618_v57, %s11280_s13 }
 0x6c1   : > { %9684 = vrot.lane.b32.xlu0 %v9613_v51, %s11282_s25  ;;  %9679 = vrot.lane.b32.xlu1 %v9618_v57, %s11281_s23 }
 0x6c5   : > { %9694 = vrot.lane.b32.xlu0 %v9613_v51, %s11283_s26  ;;  %9689 = vrot.lane.b32.xlu1 %v9618_v57, %s11282_s25 }
 0x6c9   : > { %9704 = vrot.lane.b32.xlu0 %v9613_v51, %s11284_s30  ;;  %9699 = vrot.lane.b32.xlu1 %v9618_v57, %s11283_s26 }
 0x6cd   : > { %9714 = vrot.lane.b32.xlu0 %v9613_v51, %s11285_s16  ;;  %9709 = vrot.lane.b32.xlu1 %v9618_v57, %s11284_s30 }
 0x6d1   : > { %9724 = vrot.lane.b32.xlu0 %v9613_v51, %s11286_s14  ;;  %9719 = vrot.lane.b32.xlu1 %v9618_v57, %s11285_s16  ;;  %s7952_s16 = sshll.u32 %s9985_s10, 7  ;;  %s9900_s10 = smov [#allocation3]  }
 0x6d2   : > { %s11176_s26 = scalar_lea.hbm %s11229_s11, %s7952_s16  ;;  %s9799_s4 = sshll.u32 %s9900_s10, 4  ;;  %s9800_s4 = int_to_ptr.vmem [resolvable:$false] %s9799_s4 }
 0x6d5   : > { %9734 = vrot.lane.b32.xlu0 %v9613_v51, %s11287_s15  ;;  %9729 = vrot.lane.b32.xlu1 %v9618_v57, %s11286_s14  ;;  %s379_s14 = sand.u32 1, %s9849_s20  }
 0x6d6   : > { %s7425_s30 = scalar_lea.sflag [#allocation4], %s379_s14 }
 0x6d9   : > { %9744 = vrot.lane.b32.xlu0 %v9613_v51, %s11288_s17  ;;  %9739 = vrot.lane.b32.xlu1 %v9618_v57, %s11287_s15  ;;  %v7926_v51 = vld [vmem:[%s11226_s8 + $0xa] sm:$0x3]  ;;  %s7501_s15 = sshll.u32 %s379_s14, 3 }
 0x6dd   : > { %7221 = vperm.xlu0 %9452, %v7218_v58   ;;  %9749 = vrot.lane.b32.xlu1 %v9618_v57, %s11288_s17  ;;  %s381_s17 = scalar_lea.vmem [#allocation3], %s7501_s15 }
 0x6de   : > { %s7438_s13 = sshll.u32 %s381_s17, 4  ;;  %s11178_s13 = int_to_ptr.vmem [resolvable:$true] %s7438_s13 }
 0x6df   : > { %s9795_s3 = scalar_lea.vmem %s11178_s13, 128  ;;  %p9802_p0 = scmp.lt.s32.totalorder %s11178_s13, %s9800_s4 }
 0x6e0   : > { %p9796_p11 = scmp.ne.s32.totalorder %s11178_s13, %s9795_s3 }
 0x6e1   : > { %7234 = vperm.xlu1 %9451, %v7231_v59  }
 0x6e2   : > { %p9797_p12 = pnand %p9796_p11, %p10002_p5 }
 0x6e4   : > { %p9798_p13 = pneg %p9797_p12 }
 0x717   : > { %v9615_v60 = vpop.permute.xlu0 %9614 }
 0x718   : > { %v9617_v61 = vunpack.i.h.bf16 %v9615_v60  ;;  %v9616_v62 = vunpack.i.l.bf16 %v9615_v60  ;;  %v7928_v60 = vld [vmem:[%s11226_s8 + $0xc] sm:$0x3] }
 0x71a   : > { %v9098_v63 = vpack.c.bf16 %v9617_v61, %v9616_v62 }
 0x71b   : > { %v9620_v0 = vpop.permute.xlu1 %9619  ;;  %v9625_v7 = vpop.permute.xlu0 %9624 }
 0x71c   : > { %v9622_v3 = vunpack.i.h.bf16 %v9620_v0  ;;  %v9621_v4 = vunpack.i.l.bf16 %v9620_v0  ;;  %9099 = vmatpush3.bf16.msra.mxu1 %v9098_v63  ;;  %v9627_v10 = vunpack.i.h.bf16 %v9625_v7  ;;  %v9626_v12 = vunpack.i.l.bf16 %v9625_v7  ;;  %v7930_v7 = vld [vmem:[%s11226_s8 + $0xe] sm:$0x3] }
 0x71d   : > { %9100 = vmatprep.subr.bf16.mxu1 %v9859_v1 }
 0x71e   : > { %v9101_v5 = vpack.c.bf16 %v9622_v3, %v9621_v4  ;;  %v9112_v17 = vpack.c.bf16 %v9627_v10, %v9626_v12 }
 0x71f   : > { %v9630_v13 = vpop.permute.xlu1 %9629  ;;  %v9635_v20 = vpop.permute.xlu0 %9634 }
 0x720   : > { %9102 = vmatpush3.bf16.msra.mxu1 %v9101_v5  ;;  %v9632_v18 = vunpack.i.h.bf16 %v9630_v13  ;;  %v9631_v19 = vunpack.i.l.bf16 %v9630_v13  ;;  %v9637_v11 = vunpack.i.h.bf16 %v9635_v20  ;;  %v9636_v21 = vunpack.i.l.bf16 %v9635_v20 }
 0x721   : > { %9103 = vmatprep.subr.bf16.mxu1 %v9859_v1 }
 0x722   : > { %v9115_v22 = vpack.c.bf16 %v9632_v18, %v9631_v19  ;;  %v9118_v25 = vpack.c.bf16 %v9637_v11, %v9636_v21  ;;  %v7932_v11 = vld [vmem:[%s11226_s8 + $0x10] sm:$0x3] }
 0x723   : > { %8798 = vmatmul.mubr.msk.f32.vlgmr.msra.gmra.mrb[6].mxu1 %vm4100_vm12, %v7913_v6  ;;  %v9640_v23 = vpop.permute.xlu1 %9639  ;;  %v9645_v28 = vpop.permute.xlu0 %9644 }
 0x724   : > { %9106 = vmatpush3.bf16.msk.msra.mxu1 %vm10722_vm13, %v9104_v47  ;;  %8808 = vmatprep.mubr.msk.f32.mxu1 %vm9860_vm0, %v9861_v2  ;;  %v9642_v26 = vunpack.i.h.bf16 %v9640_v23  ;;  %v9641_v27 = vunpack.i.l.bf16 %v9640_v23  ;;  %v9647_v29 = vunpack.i.h.bf16 %v9645_v28  ;;  %v9646_v30 = vunpack.i.l.bf16 %v9645_v28 }
 0x725   : > { %9107 = vmatprep.subr.bf16.mxu1 %v9859_v1 }
 0x726   : > { %v9121_v31 = vpack.c.bf16 %v9642_v26, %v9641_v27  ;;  %v9124_v34 = vpack.c.bf16 %v9647_v29, %v9646_v30  ;;  %v7934_v29 = vld [vmem:[%s11226_s8 + $0x12] sm:$0x3] }
 0x727   : > { %v9650_v32 = vpop.permute.xlu1 %9649  ;;  %v9655_v37 = vpop.permute.xlu0 %9654 }
 0x728   : > { %9110 = vmatpush3.bf16.msk.msra.mxu1 %vm10722_vm13, %v9108_v56  ;;  %v9652_v35 = vunpack.i.h.bf16 %v9650_v32  ;;  %v9651_v36 = vunpack.i.l.bf16 %v9650_v32  ;;  %v9657_v38 = vunpack.i.h.bf16 %v9655_v37  ;;  %v9656_v39 = vunpack.i.l.bf16 %v9655_v37 }
 0x729   : > { %9111 = vmatprep.subr.bf16.mxu1 %v9859_v1 }
 0x72a   : > { %v9127_v40 = vpack.c.bf16 %v9652_v35, %v9651_v36  ;;  %v9130_v43 = vpack.c.bf16 %v9657_v38, %v9656_v39  ;;  %v7936_v38 = vld [vmem:[%s11226_s8 + $0x14] sm:$0x3] }
 0x72b   : > { %8809 = vmatmul.mubr.msk.f32.vlgmr.msra.gmra.mrb[8].mxu1 %vm4100_vm12, %v5909_v15  ;;  %v9660_v41 = vpop.permute.xlu1 %9659  ;;  %v9665_v46 = vpop.permute.xlu0 %9664 }
 0x72c   : > { %9113 = vmatpush3.bf16.msra.mxu1 %v9112_v17  ;;  %8819 = vmatprep.mubr.msk.f32.mxu1 %vm9860_vm0, %v9861_v2  ;;  %v9662_v44 = vunpack.i.h.bf16 %v9660_v41  ;;  %v9661_v45 = vunpack.i.l.bf16 %v9660_v41  ;;  %v9667_v47 = vunpack.i.h.bf16 %v9665_v46  ;;  %v9666_v48 = vunpack.i.l.bf16 %v9665_v46 }
 0x72d   : > { %9114 = vmatprep.subr.bf16.mxu1 %v9859_v1 }
 0x72e   : > { %v9133_v49 = vpack.c.bf16 %v9662_v44, %v9661_v45  ;;  %v9136_v52 = vpack.c.bf16 %v9667_v47, %v9666_v48  ;;  %v7938_v47 = vld [vmem:[%s11226_s8 + $0x16] sm:$0x3] }
 0x72f   : > { %v9670_v50 = vpop.permute.xlu1 %9669  ;;  %v9675_v55 = vpop.permute.xlu0 %9674 }
 0x730   : > { %9116 = vmatpush3.bf16.msra.mxu1 %v9115_v22  ;;  %v9672_v53 = vunpack.i.h.bf16 %v9670_v50  ;;  %v9671_v54 = vunpack.i.l.bf16 %v9670_v50  ;;  %v9677_v56 = vunpack.i.h.bf16 %v9675_v55  ;;  %v9676_v57 = vunpack.i.l.bf16 %v9675_v55 }
 0x731   : > { %9117 = vmatprep.subr.bf16.mxu1 %v9859_v1 }
 0x732   : > { %v9139_v58 = vpack.c.bf16 %v9672_v53, %v9671_v54  ;;  %v9142_v61 = vpack.c.bf16 %v9677_v56, %v9676_v57  ;;  %v7940_v56 = vld [vmem:[%s11226_s8 + $0x18] sm:$0x3] }
 0x733   : > { %8820 = vmatmul.mubr.msk.f32.vlgmr.msra.gmra.mrb[10].mxu1 %vm4100_vm12, %v7920_v24  ;;  %v9680_v59 = vpop.permute.xlu1 %9679  ;;  %v9685_v0 = vpop.permute.xlu0 %9684 }
 0x734   : > { %9119 = vmatpush3.bf16.msra.mxu1 %v9118_v25  ;;  %8830 = vmatprep.mubr.msk.f32.mxu1 %vm9860_vm0, %v9861_v2  ;;  %v9682_v62 = vunpack.i.h.bf16 %v9680_v59  ;;  %v9681_v63 = vunpack.i.l.bf16 %v9680_v59  ;;  %v9687_v3 = vunpack.i.h.bf16 %v9685_v0  ;;  %v9686_v4 = vunpack.i.l.bf16 %v9685_v0 }
 0x735   : > { %9120 = vmatprep.subr.bf16.mxu1 %v9859_v1 }
 0x736   : > { %v9145_v5 = vpack.c.bf16 %v9682_v62, %v9681_v63  ;;  %v9148_v10 = vpack.c.bf16 %v9687_v3, %v9686_v4  ;;  %v7942_v3 = vld [vmem:[%s11226_s8 + $0x1a] sm:$0x3] }
 0x737   : > { %v9690_v6 = vpop.permute.xlu1 %9689  ;;  %v9695_v15 = vpop.permute.xlu0 %9694 }
 0x738   : > { %9122 = vmatpush3.bf16.msra.mxu1 %v9121_v31  ;;  %v9692_v12 = vunpack.i.h.bf16 %v9690_v6  ;;  %v9691_v13 = vunpack.i.l.bf16 %v9690_v6  ;;  %v9697_v17 = vunpack.i.h.bf16 %v9695_v15  ;;  %v9696_v18 = vunpack.i.l.bf16 %v9695_v15 }
 0x739   : > { %9123 = vmatprep.subr.bf16.mxu1 %v9859_v1 }
 0x73a   : > { %v9151_v19 = vpack.c.bf16 %v9692_v12, %v9691_v13  ;;  %v9154_v21 = vpack.c.bf16 %v9697_v17, %v9696_v18 }
 0x73b   : > { %8831 = vmatmul.mubr.msk.f32.vlgmr.msra.gmra.mrb[12].mxu1 %vm4100_vm12, %v7922_v33  ;;  %v9700_v20 = vpop.permute.xlu1 %9699  ;;  %v9705_v24 = vpop.permute.xlu0 %9704 }
 0x73c   : > { %9125 = vmatpush3.bf16.msra.mxu1 %v9124_v34  ;;  %8841 = vmatprep.mubr.msk.f32.mxu1 %vm9860_vm0, %v9861_v2  ;;  %v9702_v22 = vunpack.i.h.bf16 %v9700_v20  ;;  %v9701_v23 = vunpack.i.l.bf16 %v9700_v20  ;;  %v9707_v25 = vunpack.i.h.bf16 %v9705_v24  ;;  %v9706_v26 = vunpack.i.l.bf16 %v9705_v24 }
 0x73d   : > { %9126 = vmatprep.subr.bf16.mxu1 %v9859_v1 }
 0x73e   : > { %v9157_v27 = vpack.c.bf16 %v9702_v22, %v9701_v23  ;;  %v9160_v30 = vpack.c.bf16 %v9707_v25, %v9706_v26 }
 0x73f   : > { %v9710_v28 = vpop.permute.xlu1 %9709  ;;  %v9715_v33 = vpop.permute.xlu0 %9714 }
 0x740   : > { %9128 = vmatpush3.bf16.msra.mxu1 %v9127_v40  ;;  %v9712_v31 = vunpack.i.h.bf16 %v9710_v28  ;;  %v9711_v32 = vunpack.i.l.bf16 %v9710_v28  ;;  %v9717_v34 = vunpack.i.h.bf16 %v9715_v33  ;;  %v9716_v35 = vunpack.i.l.bf16 %v9715_v33 }
 0x741   : > { %9129 = vmatprep.subr.bf16.mxu1 %v9859_v1 }
 0x742   : > { %v9163_v36 = vpack.c.bf16 %v9712_v31, %v9711_v32  ;;  %v9166_v39 = vpack.c.bf16 %v9717_v34, %v9716_v35 }
 0x743   : > { %8842 = vmatmul.mubr.msk.f32.vlgmr.msra.gmra.mrb[14].mxu1 %vm4100_vm12, %v7924_v42  ;;  %v9720_v37 = vpop.permute.xlu1 %9719  ;;  %v9725_v42 = vpop.permute.xlu0 %9724 }
 0x744   : > { %9131 = vmatpush3.bf16.msra.mxu1 %v9130_v43  ;;  %8852 = vmatprep.mubr.msk.f32.mxu1 %vm9860_vm0, %v9861_v2  ;;  %v9722_v40 = vunpack.i.h.bf16 %v9720_v37  ;;  %v9721_v41 = vunpack.i.l.bf16 %v9720_v37  ;;  %v9727_v43 = vunpack.i.h.bf16 %v9725_v42  ;;  %v9726_v44 = vunpack.i.l.bf16 %v9725_v42 }
 0x745   : > { %9132 = vmatprep.subr.bf16.mxu1 %v9859_v1 }
 0x746   : > { %v9169_v45 = vpack.c.bf16 %v9722_v40, %v9721_v41  ;;  %v9172_v48 = vpack.c.bf16 %v9727_v43, %v9726_v44 }
 0x747   : > { %v9730_v46 = vpop.permute.xlu1 %9729 }
 0x748   : > { %9134 = vmatpush3.bf16.msra.mxu1 %v9133_v49  ;;  %v9732_v49 = vunpack.i.h.bf16 %v9730_v46  ;;  %v9731_v50 = vunpack.i.l.bf16 %v9730_v46 }
 0x749   : > { %9135 = vmatprep.subr.bf16.mxu1 %v9859_v1 }
 0x74a   : > { %v9175_v54 = vpack.c.bf16 %v9732_v49, %v9731_v50 }
 0x74b   : > { %8853 = vmatmul.mubr.msk.f32.vlgmr.msra.gmra.mrb[16].mxu1 %vm4100_vm12, %v7926_v51  ;;  %v9735_v51 = vpop.permute.xlu0 %9734  ;;  %v9740_v55 = vpop.permute.xlu1 %9739 }
 0x74c   : > { %9137 = vmatpush3.bf16.msra.mxu1 %v9136_v52  ;;  %8863 = vmatprep.mubr.msk.f32.mxu1 %vm9860_vm0, %v9861_v2  ;;  %v9737_v52 = vunpack.i.h.bf16 %v9735_v51  ;;  %v9736_v53 = vunpack.i.l.bf16 %v9735_v51  ;;  %v9741_v59 = vunpack.i.l.bf16 %v9740_v55 }
 0x74d   : > { %9138 = vmatprep.subr.bf16.mxu1 %v9859_v1 }
 0x74e   : > { %v9178_v57 = vpack.c.bf16 %v9737_v52, %v9736_v53 }
 0x74f   : > { %v9750_v0 = vpop.permute.xlu1 %9749 }
 0x750   : > { %9140 = vmatpush3.bf16.msra.mxu1 %v9139_v58  ;;  %v9742_v58 = vunpack.i.h.bf16 %v9740_v55  ;;  %v9751_v6 = vunpack.i.l.bf16 %v9750_v0 }
 0x751   : > { %9141 = vmatprep.subr.bf16.mxu1 %v9859_v1 }
 0x752   : > { %v9181_v63 = vpack.c.bf16 %v9742_v58, %v9741_v59 }
 0x753   : > { %8864 = vmatmul.mubr.msk.f32.vlgmr.msra.gmra.mrb[18].mxu1 %vm4100_vm12, %v7928_v60  ;;  %v9745_v60 = vpop.permute.xlu0 %9744 }
 0x754   : > { %9143 = vmatpush3.bf16.msra.mxu1 %v9142_v61  ;;  %8874 = vmatprep.mubr.msk.f32.mxu1 %vm9860_vm0, %v9861_v2  ;;  %v9747_v61 = vunpack.i.h.bf16 %v9745_v60  ;;  %v9746_v62 = vunpack.i.l.bf16 %v9745_v60 }
 0x755   : > { %9144 = vmatprep.subr.bf16.mxu1 %v9859_v1 }
 0x756   : > { %v9184_v4 = vpack.c.bf16 %v9747_v61, %v9746_v62 }
 0x758   : > { %9146 = vmatpush3.bf16.msra.mxu1 %v9145_v5  ;;  %v9752_v5 = vunpack.i.h.bf16 %v9750_v0 }
 0x759   : > { %9147 = vmatprep.subr.bf16.mxu1 %v9859_v1 }
 0x75b   : > { %8875 = vmatmul.mubr.msk.f32.vlgmr.msra.gmra.mrb[20].mxu1 %vm4100_vm12, %v7930_v7  ;;  %v9187_v7 = vpack.c.bf16 %v9752_v5, %v9751_v6 }
 0x75c   : > { %9149 = vmatpush3.bf16.msra.mxu1 %v9148_v10  ;;  %8885 = vmatprep.mubr.msk.f32.mxu1 %vm9860_vm0, %v9861_v2  ;;  %v7944_v10 = vld [vmem:[%s11226_s8 + $0x1c] sm:$0x3] }
 0x75d   : > { %9150 = vmatprep.subr.bf16.mxu1 %v9859_v1 }
 0x760   : > { %9152 = vmatpush3.bf16.msra.mxu1 %v9151_v19  ;;  %v7235_v61 = vpop.permute.xlu1 %7234 }
 0x761   : > { %9153 = vmatprep.subr.bf16.mxu1 %v9859_v1  ;;  %v7240_v62 = vrot.slane %v7235_v61, %v10027_v9 }
 0x763   : > { %8886 = vmatmul.mubr.msk.f32.vlgmr.msra.gmra.mrb[22].mxu1 %vm4100_vm12, %v7932_v11 }
 0x764   : > { %9155 = vmatpush3.bf16.msra.mxu1 %v9154_v21  ;;  %8896 = vmatprep.mubr.msk.f32.mxu1 %vm9860_vm0, %v9861_v2 }
 0x765   : > { %9156 = vmatprep.subr.bf16.mxu1 %v9859_v1 }
 0x768   : > { %9158 = vmatpush3.bf16.msra.mxu1 %v9157_v27 }
 0x769   : > { %9159 = vmatprep.subr.bf16.mxu1 %v9859_v1 }
 0x76b   : > { %8897 = vmatmul.mubr.msk.f32.vlgmr.msra.gmra.mrb[24].mxu1 %vm4100_vm12, %v7934_v29 }
 0x76c   : > { %9161 = vmatpush3.bf16.msra.mxu1 %v9160_v30  ;;  %8907 = vmatprep.mubr.msk.f32.mxu1 %vm9860_vm0, %v9861_v2 }
 0x76d   : > { %9162 = vmatprep.subr.bf16.mxu1 %v9859_v1 }
 0x770   : > { %9164 = vmatpush3.bf16.msra.mxu1 %v9163_v36 }
 0x771   : > { %9165 = vmatprep.subr.bf16.mxu1 %v9859_v1 }
 0x773   : > { %8908 = vmatmul.mubr.msk.f32.vlgmr.msra.gmra.mrb[26].mxu1 %vm4100_vm12, %v7936_v38 }
 0x774   : > { %9167 = vmatpush3.bf16.msra.mxu1 %v9166_v39  ;;  %8918 = vmatprep.mubr.msk.f32.mxu1 %vm9860_vm0, %v9861_v2 }
 0x775   : > { %9168 = vmatprep.subr.bf16.mxu1 %v9859_v1 }
 0x778   : > { %9170 = vmatpush3.bf16.msra.mxu1 %v9169_v45 }
 0x779   : > { %9171 = vmatprep.subr.bf16.mxu1 %v9859_v1 }
 0x77b   : > { %8919 = vmatmul.mubr.msk.f32.vlgmr.msra.gmra.mrb[28].mxu1 %vm4100_vm12, %v7938_v47 }
 0x77c   : > { %9173 = vmatpush3.bf16.msra.mxu1 %v9172_v48  ;;  %8929 = vmatprep.mubr.msk.f32.mxu1 %vm9860_vm0, %v9861_v2 }
 0x77d   : > { %9174 = vmatprep.subr.bf16.mxu1 %v9859_v1 }
 0x780   : > { %9176 = vmatpush3.bf16.msra.mxu1 %v9175_v54 }
 0x781   : > { %9177 = vmatprep.subr.bf16.mxu1 %v9859_v1 }
 0x783   : > { %8930 = vmatmul.mubr.msk.f32.vlgmr.msra.gmra.mrb[30].mxu1 %vm4100_vm12, %v7940_v56  ;;  %v7222_v56 = vpop.permute.xlu0 %7221 }
 0x784   : > { %9179 = vmatpush3.bf16.msra.mxu1 %v9178_v57  ;;  %8940 = vmatprep.mubr.msk.f32.mxu1 %vm9860_vm0, %v9861_v2 }
 0x785   : > { %9180 = vmatprep.subr.bf16.mxu1 %v9859_v1 }
 0x788   : > { %9182 = vmatpush3.bf16.msra.mxu1 %v9181_v63 }
 0x789   : > { %9183 = vmatprep.subr.bf16.mxu1 %v9859_v1 }
 0x78b   : > { %8941 = vmatmul.mubr.msk.f32.vlgmr.msra.gmra.mrb[32].mxu1 %vm4100_vm12, %v7942_v3 }
 0x78c   : > { %9185 = vmatpush3.bf16.msra.mxu1 %v9184_v4  ;;  %8951 = vmatprep.mubr.msk.f32.mxu1 %vm9860_vm0, %v9861_v2 }
 0x78d   : > { %9186 = vmatprep.subr.bf16.mxu1 %v9859_v1 }
 0x790   : > { %9188 = vmatpush3.bf16.msra.mxu1 %v9187_v7 }
 0x791   : > { %9189 = vmatprep.subr.bf16.mxu1 %v9859_v1 }
 0x793   : > { %8952 = vmatmul.mubr.msk.f32.vlgmr.msra.gmra.mrb[34].mxu1 %vm4100_vm12, %v7944_v10 }
 0x794   : > { %8960 = vmatprep.mubr.msk.f32.mxu1 %vm9860_vm0, %v9861_v2  ;;  %vm7277_vm0 = vcmask 31744  }
 0x7f6   : > { %v5997_v12 = vpop.f32.mrb[6].mxu1 }
 0x7f7   : > { %v8799_v13 = vpop.f32.mrb[7].mxu1 }
 0x7fe   : > { %v6070_v15 = vpop.f32.mrb[8].mxu1 }
 0x7ff   : > { %v6071_v17 = vadd.f32 %v6070_v15, %v5997_v12  ;;  %v8810_v18 = vpop.f32.mrb[9].mxu1 }
 0x806   : > { %v6157_v19 = vpop.f32.mrb[10].mxu1 }
 0x807   : > { %v6161_v20 = vadd.f32 %v6157_v19, %v6071_v17  ;;  %v8821_v11 = vpop.f32.mrb[11].mxu1 }
 0x80e   : > { %v6245_v21 = vpop.f32.mrb[12].mxu1 }
 0x80f   : > { %v6249_v22 = vadd.f32 %v6245_v21, %v6161_v20  ;;  %v8832_v23 = vpop.f32.mrb[13].mxu1 }
 0x816   : > { %v6333_v24 = vpop.f32.mrb[14].mxu1 }
 0x817   : > { %v6337_v25 = vadd.f32 %v6333_v24, %v6249_v22  ;;  %v8843_v26 = vpop.f32.mrb[15].mxu1  ;;  %v392_v24 = vld [vmem:[%s11220_s2 + $0x8] sm:$0xff] }
 0x81e   : > { %v6421_v1 = vpop.f32.mrb[16].mxu1 }
 0x81f   : > { %v6425_v27 = vadd.f32 %v6421_v1, %v6337_v25  ;;  %v8854_v28 = vpop.f32.mrb[17].mxu1 }
 0x826   : > { %v6509_v29 = vpop.f32.mrb[18].mxu1 }
 0x827   : > { %v6513_v30 = vadd.f32 %v6509_v29, %v6425_v27  ;;  %v8865_v31 = vpop.f32.mrb[19].mxu1  ;;  %v391_v29 = vld [vmem:[%s11220_s2] sm:$0xff] }
 0x82e   : > { %v6597_v32 = vpop.f32.mrb[20].mxu1 }
 0x82f   : > { %v6601_v33 = vadd.f32 %v6597_v32, %v6513_v30  ;;  %v8876_v34 = vpop.f32.mrb[21].mxu1 }
 0x836   : > { %v6685_v35 = vpop.f32.mrb[22].mxu1 }
 0x837   : > { %v6689_v36 = vadd.f32 %v6685_v35, %v6601_v33  ;;  %v8887_v37 = vpop.f32.mrb[23].mxu1 }
 0x83e   : > { %v6773_v38 = vpop.f32.mrb[24].mxu1 }
 0x83f   : > { %v6777_v39 = vadd.f32 %v6773_v38, %v6689_v36  ;;  %v8898_v40 = vpop.f32.mrb[25].mxu1 }
 0x846   : > { %v6861_v41 = vpop.f32.mrb[26].mxu1 }
 0x847   : > { %v6865_v42 = vadd.f32 %v6861_v41, %v6777_v39  ;;  %v8909_v43 = vpop.f32.mrb[27].mxu1 }
 0x848   : > { %v7302_v43 = vsub.s32 1, %v10024_v8 }
 0x84e   : > { %v6949_v44 = vpop.f32.mrb[28].mxu1 }
 0x84f   : > { %v6953_v45 = vadd.f32 %v6949_v44, %v6865_v42  ;;  %v8920_v46 = vpop.f32.mrb[29].mxu1  ;;  %v7298_v42 = vadd.s32 8, %v10024_v8 }
 0x856   : > { %v7037_v47 = vpop.f32.mrb[30].mxu1 }
 0x857   : > { %v7041_v48 = vadd.f32 %v7037_v47, %v6953_v45  ;;  %v8931_v49 = vpop.f32.mrb[31].mxu1 }
 0x85e   : > { %v7125_v50 = vpop.f32.mrb[32].mxu1 }
 0x85f   : > { %v7129_v51 = vadd.f32 %v7125_v50, %v7041_v48  ;;  %v8942_v52 = vpop.f32.mrb[33].mxu1 }
 0x866   : > { %v7213_v53 = vpop.f32.mrb[34].mxu1 }
 0x867   : > { %v7217_v54 = vadd.f32 %v7213_v53, %v7129_v51  ;;  %v8953_v55 = vpop.f32.mrb[35].mxu1  ;;  %v7299_v51 = vadd.s32 16, %v10024_v8 }
 0x869   : > { %v7224_v57 = vadd.f32 %v7222_v56, %v7217_v54 }
 0x86b   : > { %v7946_v58 = vmul.f32 -1.442695, %v7224_v57 }
 0x86d   : > { %9785 = vpow2.f32 %v7946_v58 }
 0x877   : > { %v9786_v59 = vpop.eup %9785 }
 0x878   : > { %v7228_v60 = vadd.f32 1.0, %v9786_v59 }
 0x87a   : > { %9787 = vrcp.f32 %v7228_v60 }
 0x884   : > { %v11147_v63 = vpop.eup %9787 }
 0x885   : > { %v7241_v0 = vmul.f32 %v11147_v63, %v7240_v62  ;;  %v7335_v50 = vrot.slane %v11147_v63, %v10027_v9 }
 0x887   : > { %v7243_v3 = vsel %vm7242_vm14, %v7241_v0, 0.0 }
 0x888   : > { %7244 = vadd.xlane.f32.xlu0 %v7243_v3 }
 0x915   : > { %v7245_v4 = vpop.xlane.xlu0 %7244 }
 0x916   : > { %v7247_v5 = vmul.f32 0.0625, %v7245_v4 }
 0x918   : > { %v7248_v6 = vmax.f32 %v7247_v5, 1.0 }
 0x91a   : > { %9789 = vrcp.f32 %v7248_v6 }
 0x924   : > { %v9790_v7 = vpop.eup %9789 }
 0x925   : > { %v7250_v10 = vmul.f32 %v9790_v7, %v7241_v0 }
 0x927   : > { %v7252_v12 = vrot.slane %v7250_v10, 1 }
 0x929   : > { %7253 = vrot.lane.b32.xlu1 %v7252_v12, %s9896_s5  ;;  %s9801_s5 = scalar_lea.vmem %s9800_s4, 256 }
 0x92a   : > { %p9803_p1 = scmp.lt.s32.totalorder %s9801_s5, %s9795_s3 }
 0x92c   : > { %p9804_p2 = por %p9803_p1, %p9802_p0 }
 0x92e   : > { %p9805_p3 = pnand %p9804_p2, %p9798_p13 }
 0x99b   : > { %v7254_v13 = vpop.permute.xlu1 %7253 }
 0x99c   : > { %v7257_v15 = vsel %vm7256_vm15, 0.0, %v7254_v13 }
 0x99d   : > { %v7259_v17 = vrot.slane %v7257_v15, 7 }
 0x99f   : > { %v7261_v18 = vadd.f32 %v7259_v17, %v7250_v10 }
 0x9a1   : > { %v7263_v19 = vrot.slane %v7261_v18, 1 }
 0x9a3   : > { %7264 = vrot.lane.b32.xlu1 %v7263_v19, %s9897_s21 }
 0xa15   : > { %v7265_v20 = vpop.permute.xlu1 %7264 }
 0xa16   : > { %v7267_v11 = vsel %vm603_vm6, 0.0, %v7265_v20  ;;  %vm7339_vm6 = vcmask 130048  }
 0xa17   : > { %v7269_v21 = vrot.slane %v7267_v11, 7  ;;  %vm9191_vm8 = vmpackc.low %vm7339_vm6, %vm7339_vm6 }
 0xa19   : > { %v7271_v22 = vadd.f32 %v7269_v21, %v7261_v18 }
 0xa1b   : > { %v7273_v23 = vrot.slane %v7271_v22, 1 }
 0xa1d   : > { %7274 = vrot.lane.b32.xlu1 %v7273_v23, %s9898_s24 }
 0xa21   : > { %400 = vperm.xlu1 %9451, %v392_v24  }
 0xa8f   : > { %v7275_v25 = vpop.permute.xlu1 %7274 }
 0xa90   : > { %v7278_v26 = vsel %vm7277_vm0, 0.0, %v7275_v25 }
 0xa91   : > { %v7280_v1 = vrot.slane %v7278_v26, 7 }
 0xa93   : > { %v7282_v27 = vadd.f32 %v7280_v1, %v7271_v22 }
 0xa95   : > { %v7284_v28 = vrot.slane %v7282_v27, 1 }
 0xa97   : > { %7285 = vrot.lane.b32.xlu1 %v7284_v28, %s9899_s1 }
 0xa9b   : > { %395 = vperm.xlu1 %9451, %v391_v29  }
 0xaa0   : > { %v401_v30 = vpop.permute.xlu1 %400 }
 0xaa1   : > { %v486_v31 = vadd.f32 %v10278_v14, %v401_v30 }
 0xaa3   : > { %v7507_v32 = vmul.f32 -1.442695, %v486_v31 }
 0xaa5   : > { %9791 = vpow2.f32 %v7507_v32 }
 0xaaf   : > { %v9792_v35 = vpop.eup %9791 }
 0xab0   : > { %v492_v38 = vadd.f32 1.0, %v9792_v35 }
 0xab2   : > { %9793 = vrcp.f32 %v492_v38 }
 0xabc   : > { %v9794_v60 = vpop.eup %9793 }
 0xb09   : > { %v7286_v33 = vpop.permute.xlu1 %7285 }
 0xb0a   : > { %v7289_v34 = vsel %vm7288_vm1, 0.0, %v7286_v33 }
 0xb0b   : > { %v7291_v36 = vrot.slane %v7289_v34, 7 }
 0xb0d   : > { %v7293_v37 = vadd.f32 %v7291_v36, %v7282_v27 }
 0xb0f   : > { %v7294_v39 = vfloor.f32 %v7293_v37 }
 0xb11   : > { %v7295_v40 = vsub.f32 %v7293_v37, %v7294_v39  ;;  %v9369_v41 = vtrunc.f32 %v7294_v39 }
 0xb13   : > { %v7296_v44 = vsub.f32 1.0, %v7295_v40  ;;  %v9370_v45 = vcvt.f32.s32 %v9369_v41  ;;  %v7325_v49 = vrot.slane %v7295_v40, %v7302_v43 }
 0xb15   : > { %v7303_v14 = vrot.slane %v9370_v45, %v7302_v43  ;;  %v7314_v46 = vadd.s32 1, %v9370_v45  ;;  %v7310_v47 = vrot.slane %v7296_v44, %v7302_v43 }
 0xb17   : > { %vm7304_vm2 = vcmp.eq.s32.totalorder %v10024_v8, %v7303_v14  ;;  %vm7305_vm3 = vcmp.eq.s32.totalorder %v7298_v42, %v7303_v14  ;;  %v7318_v48 = vrot.slane %v7314_v46, %v7302_v43  ;;  %vm7306_vm9 = vcmp.eq.s32.totalorder %v7299_v51, %v7303_v14 }
 0xb18   : > { %v7311_v52 = vsel %vm7304_vm2, %v7310_v47, 0.0  ;;  %v7312_v53 = vsel %vm7305_vm3, %v7310_v47, 0.0  ;;  %v7313_v0 = vsel %vm7306_vm9, %v7310_v47, 0.0 }
 0xb19   : > { %vm7319_vm4 = vcmp.eq.s32.totalorder %v10024_v8, %v7318_v48  ;;  %vm7320_vm5 = vcmp.eq.s32.totalorder %v7298_v42, %v7318_v48  ;;  %vm7321_vm7 = vcmp.eq.s32.totalorder %v7299_v51, %v7318_v48 }
 0xb1a   : > { %v7326_v54 = vsel %vm7319_vm4, %v7325_v49, 0.0  ;;  %v7327_v55 = vsel %vm7320_vm5, %v7325_v49, 0.0  ;;  %v396_v56 = vpop.permute.xlu1 %395  ;;  %v7328_v63 = vsel %vm7321_vm7, %v7325_v49, 0.0 }
 0xb1b   : > { %v7329_v57 = vadd.f32 %v7326_v54, %v7311_v52  ;;  %v7330_v58 = vadd.f32 %v7327_v55, %v7312_v53  ;;  %v481_v59 = vadd.f32 %v10284_v16, %v396_v56  ;;  %v7331_v3 = vadd.f32 %v7328_v63, %v7313_v0 }
 0xb1d   : > { %v495_v61 = vmul.f32 %v9794_v60, %v481_v59  ;;  %v7336_v9 = vmul.f32 %v7335_v50, %v7329_v57  ;;  %v7337_v62 = vmul.f32 %v7335_v50, %v7330_v58  ;;  %v7338_v16 = vmul.f32 %v7335_v50, %v7331_v3 }
 0xb1f   : > { %v9190_v8 = vpack.c.bf16 %v7337_v62, %v7336_v9 }
 0xb21   : > { %9192 = vmatpush3.bf16.xpose.msk.msra.mxu1 %vm9191_vm8, %v9190_v8 }
 0xb22   : > { %8958 = vmatprep.subr.mxu1 %v9861_v2 }
 0xb29   : > { %8959 = vmatpush3.xpose.msk.msra.mxu1 %vm7339_vm6, %v7338_v16 }
 0xb2c   : > { %8961 = vmatmul.mubr.msk.f32.vlgmr.msra.gmra.mrb[36].mxu1 %vm7339_vm6, %v495_v61 }
 0xbff   : > { %v7418_v2 = vpop.f32.mrb[36].mxu1 }
 0xc00   : > { %7423 = vst.msk [vmem:[%s381_s17] sm:$0xff] %vm7422_vm10, %v7418_v2  ;;  %v8962_v4 = vpop.f32.mrb[37].mxu1 }
 0xc01   : > { %9808 = shalt.err (!%p9805_p3)
}
 0xc02   : > { %s9809_s21 = scalar_lea.hbm %s11176_s26, 128  ;;  %s9813_s0 = scalar_lea.hbm %s11229_s11, 256 }
 0xc03   : > { %p9810_p4 = scmp.ne.s32.totalorder %s11176_s26, %s9809_s21  ;;  %p9814_p9 = scmp.lt.u32.totalorder %s11176_s26, %s11229_s11 }
 0xc04   : > { %p9815_p10 = scmp.lt.u32.totalorder %s9813_s0, %s9809_s21  ;;  %p9817_p12 = scmp.lt.u32.totalorder %s9809_s21, %s11176_s26 }
 0xc05   : > { %p9811_p7 = pnand %p9810_p4, %p10002_p5 }
 0xc06   : > { %p9816_p11 = por %p9815_p10, %p9814_p9 }
 0xc07   : > { %p9812_p8 = pneg %p9811_p7 }
 0xc08   : > { %p9818_p13 = por %p9817_p12, %p9816_p11 }
 0xc0a   : > { %p9819_p0 = pnand %p9818_p13, %p9812_p8 }
 0xc0c   : > { %9822 = shalt.err (!%p9819_p0)
}
 0xc0d   : > { %9371 = dma.vmem_to_hbm [thread:$0]  (%p10002_p5), %s11178_s13, 128, %s11176_s26, %s7425_s30  }
 0xc0e PF: > { %p9377_p1 = scmp.ge.s32.totalorder %s9857_s22, 2  ;;  %s7450_s18 = sand.u32 1, %s9845_s19  }
 0xc0f   : > { %s7451_s14 = scalar_lea.sflag [#allocation4], %s7450_s18 }
 0xc10   : > { %p9374_p2 = pnand %p9377_p1, %p10006_p6 }
 0xc12   : > { %9840 = dma.done.wait (!%p9374_p2), %s7451_s14, 128  }
 0xc13   : > { %9842 = vsyncadd (!%p9374_p2), %s7451_s14, 4294967168  ;;  %s11295_s22 = sld [smem:[#allocation7_spill]]  ;;  %s11296_s15 = sld [smem:[#allocation6_spill]] }
 0xc14   : > { %s11297_s21 = sld [smem:[#allocation8_spill]]  ;;  %s11298_s19 = smov %s9849_s20 }
 0xc19   : > { %p23_p3 = scmp.ge.s32.totalorder %s11295_s22, 4   ;;  %s11299_s20 = smov %s11296_s15 }
 0xc1b   :  { %25 = sbr.rel (!%p23_p3) target bundleno = 9 (0x9), region = 157 }
 0xc22   :  { %7456 = vsyncpa [#allocation4], 1 }
 0xc23   :  { %7458 = vsyncpa [#allocation4 + $0x1], 1 }

</bundles_post_ra>
